<compile_context>
chip_gen: v7x
topology: tpu7x:2x2x1
jax: 0.10.0
libtpu: 0.0.40
codegen_flags: <defaults>
</compile_context>

<pallas_src>
import functools

import jax
import jax.numpy as jnp
from jax.experimental import pallas as pl
from jax.experimental.pallas import tpu as pltpu

BN_EPS = 1e-5
LANE = 128


def _round_up(x, m):
    return (x + m - 1) // m * m


def _vmem_limit_bytes():
    """Per-generation VMEM request: physical capacity minus 16 MiB headroom, capped at 100 MiB
    (~48 MiB on v7x's 64 MiB VMEM, ~100 MiB on v5e/v6e's 128 MiB)."""
    cap = 64 << 20
    try:
        info = pltpu.get_tpu_info()
        cap = int(getattr(info, "vmem_capacity_bytes", cap))
    except Exception:
        pass
    return int(max(min(cap - (16 << 20), 100 << 20), 32 << 20))


VMEM_LIMIT = _vmem_limit_bytes()


def _pick_strip_rows(H, W, Cin, Cout_p, use_tap_loop, budget_bytes):
    """Largest divisor of H whose per-step strip footprint fits the VMEM budget."""
    best = 1
    for th in range(1, H + 1):
        if H % th:
            continue
        xpad = (th + 2) * W * Cin * 2                       # bf16 padded-row scratch
        out_bufs = 2 * th * W * Cout_p * 2                  # double-buffered bf16 output strip
        acc = th * W * Cout_p * 4                           # f32 matmul accumulator
        slab = 0 if use_tap_loop else th * W * 9 * Cin * 2  # materialized im2col (tiny Cin only)
        taps = 2 * th * W * Cin * 2                         # shifted-tap working values
        if xpad + out_bufs + acc + slab + taps <= budget_bytes:
            best = th
    return best


# --------------------------------------------------------------------------------------
# Kernel A: (optional fused input BN+ReLU) -> 3x3 SAME conv -> raw bf16 conv output strip
#           + per-(image, strip) partial BN statistics.
# --------------------------------------------------------------------------------------
def _conv_stats_kernel(x_ref, w_ref, sc_ref, sh_ref, o_ref, sum_ref, ssq_ref, xpad_ref,
                       *, apply_preact, use_tap_loop):
    """One (image, H-strip) grid step.

    x_ref:   (H, W, Cin)      bf16  whole image (same block for every strip of this image)
    w_ref:   (9*Cin, Cout_p)  bf16  conv weights, taps flattened dy-major / dx / channel-minor
    sc_ref:  (1, Cin)         f32   fused input-BN scale (block 2 only)
    sh_ref:  (1, Cin)         f32   fused input-BN shift
    o_ref:   (TH, W, Cout_p)  bf16  raw (pre-BN) conv output strip
    sum_ref: (1, Cout_p)      f32   partial sum over this strip's pixels
    ssq_ref: (1, Cout_p)      f32   partial sum of squares over this strip's pixels
    xpad_ref:(TH+2, W, Cin)   bf16  strip rows + 1-row halos (zeroed at the image border)
    """
    s = pl.program_id(1)
    n_strips = pl.num_programs(1)
    H, W, Cin = x_ref.shape
    TH, _, Cout_p = o_ref.shape

    def act(rows):                                     # rows: (R, W, Cin) -> f32 (R, W, Cin)
        rows = rows.astype(jnp.float32)
        if apply_preact:                               # previous block's BN+ReLU, fused here
            scale = sc_ref[...].astype(jnp.float32).reshape(1, 1, Cin)
            shift = sh_ref[...].astype(jnp.float32).reshape(1, 1, Cin)
            rows = jnp.maximum(rows * scale + shift, 0.0)
        return rows

    row0 = pl.multiple_of(s * TH, TH)

    # Strip body + 1-row halos, activated in f32, stored bf16 (all stores sublane-aligned).
    xpad_ref[1:TH + 1, :, :] = act(x_ref[pl.ds(row0, TH), :, :]).astype(jnp.bfloat16)
    top_mask = jnp.where(s > 0, 1.0, 0.0)                       # zero halo at the image border
    bot_mask = jnp.where(s < n_strips - 1, 1.0, 0.0)
    top = act(x_ref[pl.ds(jnp.maximum(row0 - 1, 0), 1), :, :]) * top_mask
    bot = act(x_ref[pl.ds(jnp.minimum(row0 + TH, H - 1), 1), :, :]) * bot_mask
    xpad_ref[0:1, :, :] = top.astype(jnp.bfloat16)
    xpad_ref[TH + 1:TH + 2, :, :] = bot.astype(jnp.bfloat16)

    zcol = jnp.zeros((TH, 1, Cin), jnp.bfloat16)

    def dx_shifts(rows):
        """The three horizontal taps of a (TH, W, Cin) row block, zero at the W border."""
        left = jnp.concatenate([zcol, rows[:, :W - 1, :]], axis=1)   # x[., c-1]
        right = jnp.concatenate([rows[:, 1:, :], zcol], axis=1)      # x[., c+1]
        return (left, rows, right)

    if use_tap_loop:
        # Cin >= 128: keep the MXU fed with 9 accumulating matmuls; no materialized im2col slab.
        acc = jnp.zeros((TH * W, Cout_p), jnp.float32)
        for dy in range(3):
            shifted = dx_shifts(xpad_ref[dy:dy + TH, :, :])
            for dx in range(3):
                t = dy * 3 + dx
                lhs = shifted[dx].reshape(TH * W, Cin)
                acc = acc + jnp.dot(lhs, w_ref[t * Cin:(t + 1) * Cin, :],
                                    preferred_element_type=jnp.float32)
    else:
        # Tiny Cin (first block): one im2col matmul with contraction dim 9*Cin.
        # TODO(synk): fold (W, Cin) onto the lane axis so this gather is lane-dense when Cin<<128.
        taps = []
        for dy in range(3):
            taps.extend(dx_shifts(xpad_ref[dy:dy + TH, :, :]))
        patches = jnp.concatenate(taps, axis=-1).reshape(TH * W, 9 * Cin)
        acc = jnp.dot(patches, w_ref[...], preferred_element_type=jnp.float32)

    # Per-strip partial BN statistics (tree-reduced in f32 outside the kernel).
    sum_ref[...] = jnp.sum(acc, axis=0, keepdims=True)
    ssq_ref[...] = jnp.sum(acc * acc, axis=0, keepdims=True)
    o_ref[...] = acc.reshape(TH, W, Cout_p).astype(o_ref.dtype)


def conv_bn_stats(x_nhwc, w_hwio, in_scale, in_shift, *, apply_preact, strip_rows=None):
    """3x3 SAME conv (optionally fused input BN+ReLU) + per-strip BN-stat partials.

    Returns raw conv output (N, H, W, Cout_p) bf16 and (N, S, 1, Cout_p) f32 sum / sumsq partials.
    """
    N, H, W, Cin = x_nhwc.shape
    kh, kw, cin_w, Cout = w_hwio.shape
    Cout_p = _round_up(Cout, LANE)
    use_tap_loop = Cin >= LANE

    # Taps flattened dy-major / dx / channel-minor on the contraction axis; Cin padded up to the
    # (possibly lane-padded) activation channels, Cout padded to a lane multiple.
    w = jnp.pad(w_hwio, ((0, 0), (0, 0), (0, Cin - cin_w), (0, Cout_p - Cout)))
    w2d = w.reshape(kh * kw * Cin, Cout_p).astype(jnp.bfloat16)

    if strip_rows is None:
        fixed = 2 * H * W * Cin * 2 + 2 * w2d.size * 2 + (4 << 20)  # input/weight double-buffers
        budget = max(VMEM_LIMIT - fixed, 1 << 20)
        TH = _pick_strip_rows(H, W, Cin, Cout_p, use_tap_loop, budget)
    else:
        assert H % strip_rows == 0
        TH = strip_rows
    S = H // TH

    kernel = functools.partial(_conv_stats_kernel, apply_preact=apply_preact,
                               use_tap_loop=use_tap_loop)
    raw, ssum, ssq = pl.pallas_call(
        kernel,
        grid=(N, S),
        in_specs=[
            # Whole image per batch element: constant block index across the strip axis, so it is
            # DMA'd once per image; strip rows + halos are sliced from it in-kernel.
            pl.BlockSpec((None, H, W, Cin), lambda n, s: (n, 0, 0, 0)),
            # TODO(synk): pipeline_mode=pl.Buffered(1) (or a one-shot DMA) would drop the second
            # weight buffer; left at default double-buffering for compatibility.
            pl.BlockSpec((kh * kw * Cin, Cout_p), lambda n, s: (0, 0)),
            pl.BlockSpec((1, Cin), lambda n, s: (0, 0)),
            pl.BlockSpec((1, Cin), lambda n, s: (0, 0)),
        ],
        out_specs=(
            pl.BlockSpec((None, TH, W, Cout_p), lambda n, s: (n, s, 0, 0)),
            pl.BlockSpec((None, None, 1, Cout_p), lambda n, s: (n, s, 0, 0)),
            pl.BlockSpec((None, None, 1, Cout_p), lambda n, s: (n, s, 0, 0)),
        ),
        out_shape=(
            jax.ShapeDtypeStruct((N, H, W, Cout_p), jnp.bfloat16),
            jax.ShapeDtypeStruct((N, S, 1, Cout_p), jnp.float32),
            jax.ShapeDtypeStruct((N, S, 1, Cout_p), jnp.float32),
        ),
        scratch_shapes=[pltpu.VMEM((TH + 2, W, Cin), jnp.bfloat16)],
        compiler_params=pltpu.CompilerParams(
            # No resident accumulators -> both axes independent (megacore-splittable on v7x).
            dimension_semantics=("parallel", "parallel"),
            vmem_limit_bytes=VMEM_LIMIT,
        ),
    )(x_nhwc, w2d, in_scale, in_shift)
    return raw, ssum, ssq


# --------------------------------------------------------------------------------------
# Kernel B: final BN (per-channel affine from global batch stats) + ReLU, with the
#           Cout_p -> Cout crop fused in.
# --------------------------------------------------------------------------------------
def _bn_relu_kernel(y_ref, sc_ref, sh_ref, o_ref):
    cout = o_ref.shape[-1]
    scale = sc_ref[...].reshape(1, 1, cout)
    shift = sh_ref[...].reshape(1, 1, cout)
    y = y_ref[:, :, :cout].astype(jnp.float32)
    o_ref[...] = jnp.maximum(y * scale + shift, 0.0).astype(o_ref.dtype)


def bn_relu(y_padded, scale, shift, cout, *, strip_rows=None):
    N, H, W, Cp = y_padded.shape
    if strip_rows is None:
        budget = max(VMEM_LIMIT - (4 << 20), 1 << 20)
        TH = 1
        for th in range(1, H + 1):
            if H % th:
                continue
            if 2 * th * W * (Cp * 2 + cout * 4) + th * W * Cp * 4 <= budget:
                TH = th
    else:
        assert H % strip_rows == 0
        TH = strip_rows
    S = H // TH
    return pl.pallas_call(
        _bn_relu_kernel,
        grid=(N, S),
        in_specs=[
            pl.BlockSpec((None, TH, W, Cp), lambda n, s: (n, s, 0, 0)),
            pl.BlockSpec((1, cout), lambda n, s: (0, 0)),
            pl.BlockSpec((1, cout), lambda n, s: (0, 0)),
        ],
        out_specs=pl.BlockSpec((None, TH, W, cout), lambda n, s: (n, s, 0, 0)),
        out_shape=jax.ShapeDtypeStruct((N, H, W, cout), jnp.float32),
        compiler_params=pltpu.CompilerParams(
            dimension_semantics=("parallel", "parallel"),
            vmem_limit_bytes=VMEM_LIMIT,
        ),
    )(y_padded, scale, shift)


# --------------------------------------------------------------------------------------
# Wrapper: DoubleConv forward (NCHW in / NCHW out, matching the PyTorch module).
# --------------------------------------------------------------------------------------
def _bn_affine(sum_part, ssq_part, gamma, beta, count, cout_p):
    """Fold globally tree-reduced batch statistics + BN params into per-channel (scale, shift)."""
    s_tot = jnp.sum(sum_part, axis=(0, 1, 2))                      # (Cout_p,)
    q_tot = jnp.sum(ssq_part, axis=(0, 1, 2))
    mean = s_tot / count
    var = jnp.maximum(q_tot / count - mean * mean, 0.0)            # biased var (PyTorch train BN)
    g = jnp.pad(gamma.astype(jnp.float32), (0, cout_p - gamma.shape[0]))
    b = jnp.pad(beta.astype(jnp.float32), (0, cout_p - beta.shape[0]))
    scale = g * jax.lax.rsqrt(var + BN_EPS)
    shift = b - mean * scale
    return scale.reshape(1, cout_p), shift.reshape(1, cout_p)


def double_conv_nchw(x_nchw, params, *, strip_rows=None):
    """Matches DoubleConv.forward (train-mode BatchNorm statistics).  NCHW in / NCHW out."""
    w1, g1, b1, w2, g2, b2 = params
    N, cin, H, W = x_nchw.shape
    cout = w2.shape[-1]
    count = N * H * W

    # NCHW -> NHWC; conv operands are bf16 (f32 accumulation inside the kernels).
    x = jnp.transpose(x_nchw, (0, 2, 3, 1)).astype(jnp.bfloat16)

    # Block 1: conv + per-strip BN-stat partials (no fused input pre-activation).
    ident_s = jnp.ones((1, cin), jnp.float32)
    ident_h = jnp.zeros((1, cin), jnp.float32)
    raw1, s1, q1 = conv_bn_stats(x, w1, ident_s, ident_h, apply_preact=False,
                                 strip_rows=strip_rows)
    scale1, shift1 = _bn_affine(s1, q1, g1, b1, count, raw1.shape[-1])

    # Block 2: block-1's BN+ReLU fused into the conv input path (no activated HBM copy).
    raw2, s2, q2 = conv_bn_stats(raw1, w2, scale1, shift1, apply_preact=True,
                                 strip_rows=strip_rows)
    scale2, shift2 = _bn_affine(s2, q2, g2, b2, count, raw2.shape[-1])

    # Final BN + ReLU with the Cout crop fused into the kernel.
    y = bn_relu(raw2, scale2[:, :cout], shift2[:, :cout], cout, strip_rows=strip_rows)
    # TODO(synk): fuse this NHWC->NCHW transpose into the consumer to avoid one more HBM pass.
    return jnp.transpose(y, (0, 3, 1, 2))


def init_params(key, in_channels, out_channels, dtype=jnp.float32):
    """Deterministic synthetic init. Conv weights ~ N(0, 1/sqrt(fan_in)); BN weight=1, bias=0."""
    k1, k2 = jax.random.split(key)
    fan1 = in_channels * 9
    fan2 = out_channels * 9
    w1 = jax.random.normal(k1, (3, 3, in_channels, out_channels), dtype) / jnp.sqrt(fan1)
    w2 = jax.random.normal(k2, (3, 3, out_channels, out_channels), dtype) / jnp.sqrt(fan2)
    g1 = jnp.ones((out_channels,), dtype)
    b1 = jnp.zeros((out_channels,), dtype)
    g2 = jnp.ones((out_channels,), dtype)
    b2 = jnp.zeros((out_channels,), dtype)
    return (w1, g1, b1, w2, g2, b2)


def _reference_double_conv_nchw(x_nchw, params):
    """Pure-JAX reference mirroring the kernel numerics: bf16 conv operands, f32 accumulation,
    f32 batch-stat BN applied to the bf16-stored raw conv output, then ReLU."""
    w1, g1, b1, w2, g2, b2 = params
    dn = ("NHWC", "HWIO", "NHWC")

    def block(x, w, g, b):
        y = jax.lax.conv_general_dilated(
            x.astype(jnp.bfloat16), w.astype(jnp.bfloat16), (1, 1), "SAME",
            dimension_numbers=dn, preferred_element_type=jnp.float32)
        mean = jnp.mean(y, axis=(0, 1, 2), keepdims=True)
        var = jnp.mean((y - mean) ** 2, axis=(0, 1, 2), keepdims=True)
        yq = y.astype(jnp.bfloat16).astype(jnp.float32)   # kernel stores raw conv in bf16
        out = (yq - mean) * jax.lax.rsqrt(var + BN_EPS) * g + b
        return jnp.maximum(out, 0.0)

    x = jnp.transpose(x_nchw, (0, 2, 3, 1)).astype(jnp.float32)
    y = block(x, w1, g1, b1)
    y = block(y, w2, g2, b2)
    return jnp.transpose(y, (0, 3, 1, 2))


if __name__ == "__main__":
    key = jax.random.PRNGKey(0)
    kx, kp = jax.random.split(key)

    N, Cin, Cout, H, W = 2, 4, 8, 16, 16
    x = jax.random.normal(kx, (N, Cin, H, W), jnp.float32)        # PyTorch NCHW input
    params = init_params(kp, Cin, Cout)

    ref = _reference_double_conv_nchw(x, params)
    TOL = 5e-2   # bf16 matmul operands + bf16-stored intermediates

    # Default (heuristic) strip size.
    fwd = jax.jit(double_conv_nchw)
    out = jax.block_until_ready(fwd(x, params))
    assert out.shape == (N, Cout, H, W), out.shape
    err = float(jnp.max(jnp.abs(out - ref)))
    assert err < TOL, err

    # Force multiple H-strips to exercise the halo handling.
    fwd_strips = jax.jit(functools.partial(double_conv_nchw, strip_rows=4))
    out2 = jax.block_until_ready(fwd_strips(x, params))
    err2 = float(jnp.max(jnp.abs(out2 - ref)))
    assert err2 < TOL, err2

    print("KERNEL_OK")
</pallas_src>

<mosaic_0001>
module attributes {stable_mosaic.version = 11 : i64} {
  func.func @_conv_stats_kernel(%arg0: i32, %arg1: i32, %arg2: memref<1x16x16x4xbf16, #tpu.memory_space<vmem>>, %arg3: memref<36x128xbf16, #tpu.memory_space<vmem>>, %arg4: memref<1x4xf32, #tpu.memory_space<vmem>>, %arg5: memref<1x4xf32, #tpu.memory_space<vmem>>, %arg6: memref<1x16x16x128xbf16, #tpu.memory_space<vmem>>, %arg7: memref<1x1x1x128xf32, #tpu.memory_space<vmem>>, %arg8: memref<1x1x1x128xf32, #tpu.memory_space<vmem>>, %arg9: memref<18x16x4xbf16, #tpu.memory_space<vmem>>) attributes {dimension_semantics = [#tpu.dimension_semantics<parallel>, #tpu.dimension_semantics<parallel>], iteration_bounds = array<i64: 2, 1>, scalar_prefetch = 0 : i64, scratch_operands = 1 : i64, tpu.core_type = #tpu.core_type<tc>, window_params = [{transform_indices = @transform_0, window_bounds = array<i64: 1, 16, 16, 4>}, {pipeline_mode = #tpu.pipeline_mode<synchronous>, transform_indices = @transform_1, window_bounds = array<i64: 36, 128>}, {pipeline_mode = #tpu.pipeline_mode<synchronous>, transform_indices = @transform_2, window_bounds = array<i64: 1, 4>}, {pipeline_mode = #tpu.pipeline_mode<synchronous>, transform_indices = @transform_3, window_bounds = array<i64: 1, 4>}, {transform_indices = @transform_4, window_bounds = array<i64: 1, 16, 16, 128>}, {transform_indices = @transform_5, window_bounds = array<i64: 1, 1, 1, 128>}, {transform_indices = @transform_6, window_bounds = array<i64: 1, 1, 1, 128>}]} {
    %c16_i32 = arith.constant 16 : i32
    %0 = arith.muli %arg1, %c16_i32 : i32
    %1 = tpu.assume_multiple %0, 16 : i32
    %c0 = arith.constant 0 : index
    %2 = arith.index_cast %1 : i32 to index
    %c0_0 = arith.constant 0 : index
    %c0_1 = arith.constant 0 : index
    %3 = vector.load %arg2[%c0, %2, %c0_0, %c0_1] : memref<1x16x16x4xbf16, #tpu.memory_space<vmem>>, vector<1x16x16x4xbf16>
    %4 = vector.shape_cast %3 : vector<1x16x16x4xbf16> to vector<16x16x4xbf16>
    %5 = arith.extf %4 : vector<16x16x4xbf16> to vector<16x16x4xf32>
    %6 = arith.truncf %5 : vector<16x16x4xf32> to vector<16x16x4xbf16>
    %c1 = arith.constant 1 : index
    %c0_2 = arith.constant 0 : index
    %c0_3 = arith.constant 0 : index
    %7 = vector.load %arg9[%c1, %c0_2, %c0_3] : memref<18x16x4xbf16, #tpu.memory_space<vmem>>, vector<16x16x4xbf16>
    tpu.vector_store %arg9[%c1, %c0_2, %c0_3], %6 {strides = array<i32>} : memref<18x16x4xbf16, #tpu.memory_space<vmem>>, vector<16x16x4xbf16>,
    %c0_i32 = arith.constant 0 : i32
    %8 = arith.cmpi sgt, %arg1, %c0_i32 : i32
    %cst = arith.constant 1.000000e+00 : f32
    %cst_4 = arith.constant 0.000000e+00 : f32
    %9 = arith.select %8, %cst, %cst_4 : f32
    %c0_i32_5 = arith.constant 0 : i32
    %10 = arith.cmpi slt, %arg1, %c0_i32_5 : i32
    %cst_6 = arith.constant 1.000000e+00 : f32
    %cst_7 = arith.constant 0.000000e+00 : f32
    %11 = arith.select %10, %cst_6, %cst_7 : f32
    %c1_i32 = arith.constant 1 : i32
    %12 = arith.subi %1, %c1_i32 : i32
    %c0_i32_8 = arith.constant 0 : i32
    %13 = arith.maxsi %12, %c0_i32_8 : i32
    %c0_9 = arith.constant 0 : index
    %14 = arith.index_cast %13 : i32 to index
    %c0_10 = arith.constant 0 : index
    %c0_11 = arith.constant 0 : index
    %15 = vector.load %arg2[%c0_9, %14, %c0_10, %c0_11] : memref<1x16x16x4xbf16, #tpu.memory_space<vmem>>, vector<1x1x16x4xbf16>
    %16 = vector.shape_cast %15 : vector<1x1x16x4xbf16> to vector<1x16x4xbf16>
    %17 = arith.extf %16 : vector<1x16x4xbf16> to vector<1x16x4xf32>
    %18 = vector.broadcast %9 : f32 to vector<1x16x4xf32>
    %19 = arith.mulf %17, %18 : vector<1x16x4xf32>
    %c16_i32_12 = arith.constant 16 : i32
    %20 = arith.addi %1, %c16_i32_12 : i32
    %c15_i32 = arith.constant 15 : i32
    %21 = arith.minsi %20, %c15_i32 : i32
    %c0_13 = arith.constant 0 : index
    %22 = arith.index_cast %21 : i32 to index
    %c0_14 = arith.constant 0 : index
    %c0_15 = arith.constant 0 : index
    %23 = vector.load %arg2[%c0_13, %22, %c0_14, %c0_15] : memref<1x16x16x4xbf16, #tpu.memory_space<vmem>>, vector<1x1x16x4xbf16>
    %24 = vector.shape_cast %23 : vector<1x1x16x4xbf16> to vector<1x16x4xbf16>
    %25 = arith.extf %24 : vector<1x16x4xbf16> to vector<1x16x4xf32>
    %26 = vector.broadcast %11 : f32 to vector<1x16x4xf32>
    %27 = arith.mulf %25, %26 : vector<1x16x4xf32>
    %28 = arith.truncf %19 : vector<1x16x4xf32> to vector<1x16x4xbf16>
    %c0_16 = arith.constant 0 : index
    %c0_17 = arith.constant 0 : index
    %c0_18 = arith.constant 0 : index
    %29 = vector.load %arg9[%c0_16, %c0_17, %c0_18] : memref<18x16x4xbf16, #tpu.memory_space<vmem>>, vector<1x16x4xbf16>
    tpu.vector_store %arg9[%c0_16, %c0_17, %c0_18], %28 {strides = array<i32>} : memref<18x16x4xbf16, #tpu.memory_space<vmem>>, vector<1x16x4xbf16>,
    %30 = arith.truncf %27 : vector<1x16x4xf32> to vector<1x16x4xbf16>
    %c17 = arith.constant 17 : index
    %c0_19 = arith.constant 0 : index
    %c0_20 = arith.constant 0 : index
    %31 = vector.load %arg9[%c17, %c0_19, %c0_20] : memref<18x16x4xbf16, #tpu.memory_space<vmem>>, vector<1x16x4xbf16>
    tpu.vector_store %arg9[%c17, %c0_19, %c0_20], %30 {strides = array<i32>} : memref<18x16x4xbf16, #tpu.memory_space<vmem>>, vector<1x16x4xbf16>,
    %cst_21 = arith.constant 0.000000e+00 : bf16
    %32 = vector.broadcast %cst_21 : bf16 to vector<16x1x4xbf16>
    %c0_22 = arith.constant 0 : index
    %c0_23 = arith.constant 0 : index
    %c0_24 = arith.constant 0 : index
    %33 = vector.load %arg9[%c0_22, %c0_23, %c0_24] : memref<18x16x4xbf16, #tpu.memory_space<vmem>>, vector<16x16x4xbf16>
    %34 = vector.extract_strided_slice %33 {offsets = [0, 0, 0], sizes = [16, 15, 4], strides = [1, 1, 1]} : vector<16x16x4xbf16> to vector<16x15x4xbf16>
    %35 = tpu.concatenate %32, %34 in 1 : vector<16x1x4xbf16>, vector<16x15x4xbf16> -> vector<16x16x4xbf16>
    %36 = vector.extract_strided_slice %33 {offsets = [0, 1, 0], sizes = [16, 15, 4], strides = [1, 1, 1]} : vector<16x16x4xbf16> to vector<16x15x4xbf16>
    %37 = tpu.concatenate %36, %32 in 1 : vector<16x15x4xbf16>, vector<16x1x4xbf16> -> vector<16x16x4xbf16>
    %c1_25 = arith.constant 1 : index
    %c0_26 = arith.constant 0 : index
    %c0_27 = arith.constant 0 : index
    %38 = vector.load %arg9[%c1_25, %c0_26, %c0_27] : memref<18x16x4xbf16, #tpu.memory_space<vmem>>, vector<16x16x4xbf16>
    %39 = vector.extract_strided_slice %38 {offsets = [0, 0, 0], sizes = [16, 15, 4], strides = [1, 1, 1]} : vector<16x16x4xbf16> to vector<16x15x4xbf16>
    %40 = tpu.concatenate %32, %39 in 1 : vector<16x1x4xbf16>, vector<16x15x4xbf16> -> vector<16x16x4xbf16>
    %41 = vector.extract_strided_slice %38 {offsets = [0, 1, 0], sizes = [16, 15, 4], strides = [1, 1, 1]} : vector<16x16x4xbf16> to vector<16x15x4xbf16>
    %42 = tpu.concatenate %41, %32 in 1 : vector<16x15x4xbf16>, vector<16x1x4xbf16> -> vector<16x16x4xbf16>
    %c2 = arith.constant 2 : index
    %c0_28 = arith.constant 0 : index
    %c0_29 = arith.constant 0 : index
    %43 = vector.load %arg9[%c2, %c0_28, %c0_29] : memref<18x16x4xbf16, #tpu.memory_space<vmem>>, vector<16x16x4xbf16>
    %44 = vector.extract_strided_slice %43 {offsets = [0, 0, 0], sizes = [16, 15, 4], strides = [1, 1, 1]} : vector<16x16x4xbf16> to vector<16x15x4xbf16>
    %45 = tpu.concatenate %32, %44 in 1 : vector<16x1x4xbf16>, vector<16x15x4xbf16> -> vector<16x16x4xbf16>
    %46 = vector.extract_strided_slice %43 {offsets = [0, 1, 0], sizes = [16, 15, 4], strides = [1, 1, 1]} : vector<16x16x4xbf16> to vector<16x15x4xbf16>
    %47 = tpu.concatenate %46, %32 in 1 : vector<16x15x4xbf16>, vector<16x1x4xbf16> -> vector<16x16x4xbf16>
    %48 = tpu.concatenate %35, %33, %37, %40, %38, %42, %45, %43, %47 in 2 : vector<16x16x4xbf16>, vector<16x16x4xbf16>, vector<16x16x4xbf16>, vector<16x16x4xbf16>, vector<16x16x4xbf16>, vector<16x16x4xbf16>, vector<16x16x4xbf16>, vector<16x16x4xbf16>, vector<16x16x4xbf16> -> vector<16x16x36xbf16>
    %49 = vector.shape_cast %48 : vector<16x16x36xbf16> to vector<256x36xbf16>
    %c0_30 = arith.constant 0 : index
    %c0_31 = arith.constant 0 : index
    %50 = vector.load %arg3[%c0_30, %c0_31] : memref<36x128xbf16, #tpu.memory_space<vmem>>, vector<36x128xbf16>
    %cst_32 = arith.constant dense<0.000000e+00> : vector<256x128xf32>
    %51 = tpu.matmul %49, %50, %cst_32 {dimension_numbers = #tpu.dot_dimension_numbers<[1], [0], [0], [1], [0, 0, 1, 1], [], []>} : vector<256x36xbf16>, vector<36x128xbf16>, vector<256x128xf32> -> vector<256x128xf32>
    %cst_33 = arith.constant dense<0.000000e+00> : vector<128xf32>
    %52 = vector.multi_reduction <add>, %51, %cst_33 [0] : vector<256x128xf32> to vector<128xf32>
    %53 = vector.shape_cast %52 : vector<128xf32> to vector<1x128xf32>
    %c0_34 = arith.constant 0 : index
    %c0_35 = arith.constant 0 : index
    %c0_36 = arith.constant 0 : index
    %c0_37 = arith.constant 0 : index
    %54 = vector.load %arg7[%c0_34, %c0_35, %c0_36, %c0_37] : memref<1x1x1x128xf32, #tpu.memory_space<vmem>>, vector<1x1x1x128xf32>
    %55 = vector.shape_cast %54 : vector<1x1x1x128xf32> to vector<1x128xf32>
    %56 = vector.shape_cast %53 : vector<1x128xf32> to vector<1x1x1x128xf32>
    tpu.vector_store %arg7[%c0_34, %c0_35, %c0_36, %c0_37], %56 {strides = array<i32>} : memref<1x1x1x128xf32, #tpu.memory_space<vmem>>, vector<1x1x1x128xf32>,
    %57 = arith.mulf %51, %51 : vector<256x128xf32>
    %cst_38 = arith.constant dense<0.000000e+00> : vector<128xf32>
    %58 = vector.multi_reduction <add>, %57, %cst_38 [0] : vector<256x128xf32> to vector<128xf32>
    %59 = vector.shape_cast %58 : vector<128xf32> to vector<1x128xf32>
    %c0_39 = arith.constant 0 : index
    %c0_40 = arith.constant 0 : index
    %c0_41 = arith.constant 0 : index
    %c0_42 = arith.constant 0 : index
    %60 = vector.load %arg8[%c0_39, %c0_40, %c0_41, %c0_42] : memref<1x1x1x128xf32, #tpu.memory_space<vmem>>, vector<1x1x1x128xf32>
    %61 = vector.shape_cast %60 : vector<1x1x1x128xf32> to vector<1x128xf32>
    %62 = vector.shape_cast %59 : vector<1x128xf32> to vector<1x1x1x128xf32>
    tpu.vector_store %arg8[%c0_39, %c0_40, %c0_41, %c0_42], %62 {strides = array<i32>} : memref<1x1x1x128xf32, #tpu.memory_space<vmem>>, vector<1x1x1x128xf32>,
    %63 = vector.shape_cast %51 : vector<256x128xf32> to vector<16x16x128xf32>
    %64 = arith.truncf %63 : vector<16x16x128xf32> to vector<16x16x128xbf16>
    %c0_43 = arith.constant 0 : index
    %c0_44 = arith.constant 0 : index
    %c0_45 = arith.constant 0 : index
    %c0_46 = arith.constant 0 : index
    %65 = vector.load %arg6[%c0_43, %c0_44, %c0_45, %c0_46] : memref<1x16x16x128xbf16, #tpu.memory_space<vmem>>, vector<1x16x16x128xbf16>
    %66 = vector.shape_cast %65 : vector<1x16x16x128xbf16> to vector<16x16x128xbf16>
    %67 = vector.shape_cast %64 : vector<16x16x128xbf16> to vector<1x16x16x128xbf16>
    tpu.vector_store %arg6[%c0_43, %c0_44, %c0_45, %c0_46], %67 {strides = array<i32>} : memref<1x16x16x128xbf16, #tpu.memory_space<vmem>>, vector<1x16x16x128xbf16>,
    return
  }
  func.func @transform_0(%arg0: i32, %arg1: i32) -> (i32, i32, i32, i32) {
    %c0_i32 = arith.constant 0 : i32
    %c0_i32_0 = arith.constant 0 : i32
    %c0_i32_1 = arith.constant 0 : i32
    %c0_i32_2 = arith.constant 0 : i32
    return %arg0, %c0_i32, %c0_i32_0, %c0_i32_1 : i32, i32, i32, i32
  }
  func.func @transform_1(%arg0: i32, %arg1: i32) -> (i32, i32) {
    %c0_i32 = arith.constant 0 : i32
    %c0_i32_0 = arith.constant 0 : i32
    %c0_i32_1 = arith.constant 0 : i32
    return %c0_i32, %c0_i32_0 : i32, i32
  }
  func.func @transform_2(%arg0: i32, %arg1: i32) -> (i32, i32) {
    %c0_i32 = arith.constant 0 : i32
    %c0_i32_0 = arith.constant 0 : i32
    %c0_i32_1 = arith.constant 0 : i32
    return %c0_i32, %c0_i32_0 : i32, i32
  }
  func.func @transform_3(%arg0: i32, %arg1: i32) -> (i32, i32) {
    %c0_i32 = arith.constant 0 : i32
    %c0_i32_0 = arith.constant 0 : i32
    %c0_i32_1 = arith.constant 0 : i32
    return %c0_i32, %c0_i32_0 : i32, i32
  }
  func.func @transform_4(%arg0: i32, %arg1: i32) -> (i32, i32, i32, i32) {
    %c0_i32 = arith.constant 0 : i32
    %c0_i32_0 = arith.constant 0 : i32
    %c0_i32_1 = arith.constant 0 : i32
    return %arg0, %arg1, %c0_i32, %c0_i32_0 : i32, i32, i32, i32
  }
  func.func @transform_5(%arg0: i32, %arg1: i32) -> (i32, i32, i32, i32) {
    %c0_i32 = arith.constant 0 : i32
    %c0_i32_0 = arith.constant 0 : i32
    %c0_i32_1 = arith.constant 0 : i32
    return %arg0, %arg1, %c0_i32, %c0_i32_0 : i32, i32, i32, i32
  }
  func.func @transform_6(%arg0: i32, %arg1: i32) -> (i32, i32, i32, i32) {
    %c0_i32 = arith.constant 0 : i32
    %c0_i32_0 = arith.constant 0 : i32
    %c0_i32_1 = arith.constant 0 : i32
    return %arg0, %arg1, %c0_i32, %c0_i32_0 : i32, i32, i32, i32
  }
}

module attributes {stable_mosaic.version = 11 : i64} {
  func.func @_conv_stats_kernel(%arg0: i32, %arg1: i32, %arg2: memref<1x16x16x128xbf16, #tpu.memory_space<vmem>>, %arg3: memref<1152x128xbf16, #tpu.memory_space<vmem>>, %arg4: memref<1x128xf32, #tpu.memory_space<vmem>>, %arg5: memref<1x128xf32, #tpu.memory_space<vmem>>, %arg6: memref<1x16x16x128xbf16, #tpu.memory_space<vmem>>, %arg7: memref<1x1x1x128xf32, #tpu.memory_space<vmem>>, %arg8: memref<1x1x1x128xf32, #tpu.memory_space<vmem>>, %arg9: memref<18x16x128xbf16, #tpu.memory_space<vmem>>) attributes {dimension_semantics = [#tpu.dimension_semantics<parallel>, #tpu.dimension_semantics<parallel>], iteration_bounds = array<i64: 2, 1>, scalar_prefetch = 0 : i64, scratch_operands = 1 : i64, tpu.core_type = #tpu.core_type<tc>, window_params = [{transform_indices = @transform_0, window_bounds = array<i64: 1, 16, 16, 128>}, {pipeline_mode = #tpu.pipeline_mode<synchronous>, transform_indices = @transform_1, window_bounds = array<i64: 1152, 128>}, {pipeline_mode = #tpu.pipeline_mode<synchronous>, transform_indices = @transform_2, window_bounds = array<i64: 1, 128>}, {pipeline_mode = #tpu.pipeline_mode<synchronous>, transform_indices = @transform_3, window_bounds = array<i64: 1, 128>}, {transform_indices = @transform_4, window_bounds = array<i64: 1, 16, 16, 128>}, {transform_indices = @transform_5, window_bounds = array<i64: 1, 1, 1, 128>}, {transform_indices = @transform_6, window_bounds = array<i64: 1, 1, 1, 128>}]} {
    %c16_i32 = arith.constant 16 : i32
    %0 = arith.muli %arg1, %c16_i32 : i32
    %1 = tpu.assume_multiple %0, 16 : i32
    %c0 = arith.constant 0 : index
    %2 = arith.index_cast %1 : i32 to index
    %c0_0 = arith.constant 0 : index
    %c0_1 = arith.constant 0 : index
    %3 = vector.load %arg2[%c0, %2, %c0_0, %c0_1] : memref<1x16x16x128xbf16, #tpu.memory_space<vmem>>, vector<1x16x16x128xbf16>
    %4 = vector.shape_cast %3 : vector<1x16x16x128xbf16> to vector<16x16x128xbf16>
    %5 = arith.extf %4 : vector<16x16x128xbf16> to vector<16x16x128xf32>
    %c0_2 = arith.constant 0 : index
    %c0_3 = arith.constant 0 : index
    %6 = vector.load %arg4[%c0_2, %c0_3] : memref<1x128xf32, #tpu.memory_space<vmem>>, vector<1x128xf32>
    %7 = vector.shape_cast %6 : vector<1x128xf32> to vector<1x1x128xf32>
    %c0_4 = arith.constant 0 : index
    %c0_5 = arith.constant 0 : index
    %8 = vector.load %arg5[%c0_4, %c0_5] : memref<1x128xf32, #tpu.memory_space<vmem>>, vector<1x128xf32>
    %9 = vector.shape_cast %8 : vector<1x128xf32> to vector<1x1x128xf32>
    %10 = vector.broadcast %7 : vector<1x1x128xf32> to vector<16x16x128xf32>
    %11 = arith.mulf %5, %10 : vector<16x16x128xf32>
    %12 = vector.broadcast %9 : vector<1x1x128xf32> to vector<16x16x128xf32>
    %13 = arith.addf %11, %12 : vector<16x16x128xf32>
    %cst = arith.constant 0.000000e+00 : f32
    %14 = vector.broadcast %cst : f32 to vector<16x16x128xf32>
    %15 = arith.maximumf %13, %14 : vector<16x16x128xf32>
    %16 = arith.truncf %15 : vector<16x16x128xf32> to vector<16x16x128xbf16>
    %c1 = arith.constant 1 : index
    %c0_6 = arith.constant 0 : index
    %c0_7 = arith.constant 0 : index
    %17 = vector.load %arg9[%c1, %c0_6, %c0_7] : memref<18x16x128xbf16, #tpu.memory_space<vmem>>, vector<16x16x128xbf16>
    tpu.vector_store %arg9[%c1, %c0_6, %c0_7], %16 {strides = array<i32>} : memref<18x16x128xbf16, #tpu.memory_space<vmem>>, vector<16x16x128xbf16>,
    %c0_i32 = arith.constant 0 : i32
    %18 = arith.cmpi sgt, %arg1, %c0_i32 : i32
    %cst_8 = arith.constant 1.000000e+00 : f32
    %cst_9 = arith.constant 0.000000e+00 : f32
    %19 = arith.select %18, %cst_8, %cst_9 : f32
    %c0_i32_10 = arith.constant 0 : i32
    %20 = arith.cmpi slt, %arg1, %c0_i32_10 : i32
    %cst_11 = arith.constant 1.000000e+00 : f32
    %cst_12 = arith.constant 0.000000e+00 : f32
    %21 = arith.select %20, %cst_11, %cst_12 : f32
    %c1_i32 = arith.constant 1 : i32
    %22 = arith.subi %1, %c1_i32 : i32
    %c0_i32_13 = arith.constant 0 : i32
    %23 = arith.maxsi %22, %c0_i32_13 : i32
    %c0_14 = arith.constant 0 : index
    %24 = arith.index_cast %23 : i32 to index
    %c0_15 = arith.constant 0 : index
    %c0_16 = arith.constant 0 : index
    %25 = vector.load %arg2[%c0_14, %24, %c0_15, %c0_16] : memref<1x16x16x128xbf16, #tpu.memory_space<vmem>>, vector<1x1x16x128xbf16>
    %26 = vector.shape_cast %25 : vector<1x1x16x128xbf16> to vector<1x16x128xbf16>
    %27 = arith.extf %26 : vector<1x16x128xbf16> to vector<1x16x128xf32>
    %c0_17 = arith.constant 0 : index
    %c0_18 = arith.constant 0 : index
    %28 = vector.load %arg4[%c0_17, %c0_18] : memref<1x128xf32, #tpu.memory_space<vmem>>, vector<1x128xf32>
    %29 = vector.shape_cast %28 : vector<1x128xf32> to vector<1x1x128xf32>
    %c0_19 = arith.constant 0 : index
    %c0_20 = arith.constant 0 : index
    %30 = vector.load %arg5[%c0_19, %c0_20] : memref<1x128xf32, #tpu.memory_space<vmem>>, vector<1x128xf32>
    %31 = vector.shape_cast %30 : vector<1x128xf32> to vector<1x1x128xf32>
    %32 = vector.broadcast %29 : vector<1x1x128xf32> to vector<1x16x128xf32>
    %33 = arith.mulf %27, %32 : vector<1x16x128xf32>
    %34 = vector.broadcast %31 : vector<1x1x128xf32> to vector<1x16x128xf32>
    %35 = arith.addf %33, %34 : vector<1x16x128xf32>
    %cst_21 = arith.constant 0.000000e+00 : f32
    %36 = vector.broadcast %cst_21 : f32 to vector<1x16x128xf32>
    %37 = arith.maximumf %35, %36 : vector<1x16x128xf32>
    %38 = vector.broadcast %19 : f32 to vector<1x16x128xf32>
    %39 = arith.mulf %37, %38 : vector<1x16x128xf32>
    %c16_i32_22 = arith.constant 16 : i32
    %40 = arith.addi %1, %c16_i32_22 : i32
    %c15_i32 = arith.constant 15 : i32
    %41 = arith.minsi %40, %c15_i32 : i32
    %c0_23 = arith.constant 0 : index
    %42 = arith.index_cast %41 : i32 to index
    %c0_24 = arith.constant 0 : index
    %c0_25 = arith.constant 0 : index
    %43 = vector.load %arg2[%c0_23, %42, %c0_24, %c0_25] : memref<1x16x16x128xbf16, #tpu.memory_space<vmem>>, vector<1x1x16x128xbf16>
    %44 = vector.shape_cast %43 : vector<1x1x16x128xbf16> to vector<1x16x128xbf16>
    %45 = arith.extf %44 : vector<1x16x128xbf16> to vector<1x16x128xf32>
    %c0_26 = arith.constant 0 : index
    %c0_27 = arith.constant 0 : index
    %46 = vector.load %arg4[%c0_26, %c0_27] : memref<1x128xf32, #tpu.memory_space<vmem>>, vector<1x128xf32>
    %47 = vector.shape_cast %46 : vector<1x128xf32> to vector<1x1x128xf32>
    %c0_28 = arith.constant 0 : index
    %c0_29 = arith.constant 0 : index
    %48 = vector.load %arg5[%c0_28, %c0_29] : memref<1x128xf32, #tpu.memory_space<vmem>>, vector<1x128xf32>
    %49 = vector.shape_cast %48 : vector<1x128xf32> to vector<1x1x128xf32>
    %50 = vector.broadcast %47 : vector<1x1x128xf32> to vector<1x16x128xf32>
    %51 = arith.mulf %45, %50 : vector<1x16x128xf32>
    %52 = vector.broadcast %49 : vector<1x1x128xf32> to vector<1x16x128xf32>
    %53 = arith.addf %51, %52 : vector<1x16x128xf32>
    %cst_30 = arith.constant 0.000000e+00 : f32
    %54 = vector.broadcast %cst_30 : f32 to vector<1x16x128xf32>
    %55 = arith.maximumf %53, %54 : vector<1x16x128xf32>
    %56 = vector.broadcast %21 : f32 to vector<1x16x128xf32>
    %57 = arith.mulf %55, %56 : vector<1x16x128xf32>
    %58 = arith.truncf %39 : vector<1x16x128xf32> to vector<1x16x128xbf16>
    %c0_31 = arith.constant 0 : index
    %c0_32 = arith.constant 0 : index
    %c0_33 = arith.constant 0 : index
    %59 = vector.load %arg9[%c0_31, %c0_32, %c0_33] : memref<18x16x128xbf16, #tpu.memory_space<vmem>>, vector<1x16x128xbf16>
    tpu.vector_store %arg9[%c0_31, %c0_32, %c0_33], %58 {strides = array<i32>} : memref<18x16x128xbf16, #tpu.memory_space<vmem>>, vector<1x16x128xbf16>,
    %60 = arith.truncf %57 : vector<1x16x128xf32> to vector<1x16x128xbf16>
    %c17 = arith.constant 17 : index
    %c0_34 = arith.constant 0 : index
    %c0_35 = arith.constant 0 : index
    %61 = vector.load %arg9[%c17, %c0_34, %c0_35] : memref<18x16x128xbf16, #tpu.memory_space<vmem>>, vector<1x16x128xbf16>
    tpu.vector_store %arg9[%c17, %c0_34, %c0_35], %60 {strides = array<i32>} : memref<18x16x128xbf16, #tpu.memory_space<vmem>>, vector<1x16x128xbf16>,
    %cst_36 = arith.constant 0.000000e+00 : bf16
    %62 = vector.broadcast %cst_36 : bf16 to vector<16x1x128xbf16>
    %cst_37 = arith.constant 0.000000e+00 : f32
    %63 = vector.broadcast %cst_37 : f32 to vector<256x128xf32>
    %c0_38 = arith.constant 0 : index
    %c0_39 = arith.constant 0 : index
    %c0_40 = arith.constant 0 : index
    %64 = vector.load %arg9[%c0_38, %c0_39, %c0_40] : memref<18x16x128xbf16, #tpu.memory_space<vmem>>, vector<16x16x128xbf16>
    %65 = vector.extract_strided_slice %64 {offsets = [0, 0, 0], sizes = [16, 15, 128], strides = [1, 1, 1]} : vector<16x16x128xbf16> to vector<16x15x128xbf16>
    %66 = tpu.concatenate %62, %65 in 1 : vector<16x1x128xbf16>, vector<16x15x128xbf16> -> vector<16x16x128xbf16>
    %67 = vector.extract_strided_slice %64 {offsets = [0, 1, 0], sizes = [16, 15, 128], strides = [1, 1, 1]} : vector<16x16x128xbf16> to vector<16x15x128xbf16>
    %68 = tpu.concatenate %67, %62 in 1 : vector<16x15x128xbf16>, vector<16x1x128xbf16> -> vector<16x16x128xbf16>
    %69 = vector.shape_cast %66 : vector<16x16x128xbf16> to vector<256x128xbf16>
    %c0_41 = arith.constant 0 : index
    %c0_42 = arith.constant 0 : index
    %70 = vector.load %arg3[%c0_41, %c0_42] : memref<1152x128xbf16, #tpu.memory_space<vmem>>, vector<128x128xbf16>
    %cst_43 = arith.constant dense<0.000000e+00> : vector<256x128xf32>
    %71 = tpu.matmul %69, %70, %cst_43 {dimension_numbers = #tpu.dot_dimension_numbers<[1], [0], [0], [1], [0, 0, 1, 1], [], []>} : vector<256x128xbf16>, vector<128x128xbf16>, vector<256x128xf32> -> vector<256x128xf32>
    %72 = arith.addf %63, %71 : vector<256x128xf32>
    %73 = vector.shape_cast %64 : vector<16x16x128xbf16> to vector<256x128xbf16>
    %c128 = arith.constant 128 : index
    %c0_44 = arith.constant 0 : index
    %74 = vector.load %arg3[%c128, %c0_44] : memref<1152x128xbf16, #tpu.memory_space<vmem>>, vector<128x128xbf16>
    %cst_45 = arith.constant dense<0.000000e+00> : vector<256x128xf32>
    %75 = tpu.matmul %73, %74, %cst_45 {dimension_numbers = #tpu.dot_dimension_numbers<[1], [0], [0], [1], [0, 0, 1, 1], [], []>} : vector<256x128xbf16>, vector<128x128xbf16>, vector<256x128xf32> -> vector<256x128xf32>
    %76 = arith.addf %72, %75 : vector<256x128xf32>
    %77 = vector.shape_cast %68 : vector<16x16x128xbf16> to vector<256x128xbf16>
    %c256 = arith.constant 256 : index
    %c0_46 = arith.constant 0 : index
    %78 = vector.load %arg3[%c256, %c0_46] : memref<1152x128xbf16, #tpu.memory_space<vmem>>, vector<128x128xbf16>
    %cst_47 = arith.constant dense<0.000000e+00> : vector<256x128xf32>
    %79 = tpu.matmul %77, %78, %cst_47 {dimension_numbers = #tpu.dot_dimension_numbers<[1], [0], [0], [1], [0, 0, 1, 1], [], []>} : vector<256x128xbf16>, vector<128x128xbf16>, vector<256x128xf32> -> vector<256x128xf32>
    %80 = arith.addf %76, %79 : vector<256x128xf32>
    %c1_48 = arith.constant 1 : index
    %c0_49 = arith.constant 0 : index
    %c0_50 = arith.constant 0 : index
    %81 = vector.load %arg9[%c1_48, %c0_49, %c0_50] : memref<18x16x128xbf16, #tpu.memory_space<vmem>>, vector<16x16x128xbf16>
    %82 = vector.extract_strided_slice %81 {offsets = [0, 0, 0], sizes = [16, 15, 128], strides = [1, 1, 1]} : vector<16x16x128xbf16> to vector<16x15x128xbf16>
    %83 = tpu.concatenate %62, %82 in 1 : vector<16x1x128xbf16>, vector<16x15x128xbf16> -> vector<16x16x128xbf16>
    %84 = vector.extract_strided_slice %81 {offsets = [0, 1, 0], sizes = [16, 15, 128], strides = [1, 1, 1]} : vector<16x16x128xbf16> to vector<16x15x128xbf16>
    %85 = tpu.concatenate %84, %62 in 1 : vector<16x15x128xbf16>, vector<16x1x128xbf16> -> vector<16x16x128xbf16>
    %86 = vector.shape_cast %83 : vector<16x16x128xbf16> to vector<256x128xbf16>
    %c384 = arith.constant 384 : index
    %c0_51 = arith.constant 0 : index
    %87 = vector.load %arg3[%c384, %c0_51] : memref<1152x128xbf16, #tpu.memory_space<vmem>>, vector<128x128xbf16>
    %cst_52 = arith.constant dense<0.000000e+00> : vector<256x128xf32>
    %88 = tpu.matmul %86, %87, %cst_52 {dimension_numbers = #tpu.dot_dimension_numbers<[1], [0], [0], [1], [0, 0, 1, 1], [], []>} : vector<256x128xbf16>, vector<128x128xbf16>, vector<256x128xf32> -> vector<256x128xf32>
    %89 = arith.addf %80, %88 : vector<256x128xf32>
    %90 = vector.shape_cast %81 : vector<16x16x128xbf16> to vector<256x128xbf16>
    %c512 = arith.constant 512 : index
    %c0_53 = arith.constant 0 : index
    %91 = vector.load %arg3[%c512, %c0_53] : memref<1152x128xbf16, #tpu.memory_space<vmem>>, vector<128x128xbf16>
    %cst_54 = arith.constant dense<0.000000e+00> : vector<256x128xf32>
    %92 = tpu.matmul %90, %91, %cst_54 {dimension_numbers = #tpu.dot_dimension_numbers<[1], [0], [0], [1], [0, 0, 1, 1], [], []>} : vector<256x128xbf16>, vector<128x128xbf16>, vector<256x128xf32> -> vector<256x128xf32>
    %93 = arith.addf %89, %92 : vector<256x128xf32>
    %94 = vector.shape_cast %85 : vector<16x16x128xbf16> to vector<256x128xbf16>
    %c640 = arith.constant 640 : index
    %c0_55 = arith.constant 0 : index
    %95 = vector.load %arg3[%c640, %c0_55] : memref<1152x128xbf16, #tpu.memory_space<vmem>>, vector<128x128xbf16>
    %cst_56 = arith.constant dense<0.000000e+00> : vector<256x128xf32>
    %96 = tpu.matmul %94, %95, %cst_56 {dimension_numbers = #tpu.dot_dimension_numbers<[1], [0], [0], [1], [0, 0, 1, 1], [], []>} : vector<256x128xbf16>, vector<128x128xbf16>, vector<256x128xf32> -> vector<256x128xf32>
    %97 = arith.addf %93, %96 : vector<256x128xf32>
    %c2 = arith.constant 2 : index
    %c0_57 = arith.constant 0 : index
    %c0_58 = arith.constant 0 : index
    %98 = vector.load %arg9[%c2, %c0_57, %c0_58] : memref<18x16x128xbf16, #tpu.memory_space<vmem>>, vector<16x16x128xbf16>
    %99 = vector.extract_strided_slice %98 {offsets = [0, 0, 0], sizes = [16, 15, 128], strides = [1, 1, 1]} : vector<16x16x128xbf16> to vector<16x15x128xbf16>
    %100 = tpu.concatenate %62, %99 in 1 : vector<16x1x128xbf16>, vector<16x15x128xbf16> -> vector<16x16x128xbf16>
    %101 = vector.extract_strided_slice %98 {offsets = [0, 1, 0], sizes = [16, 15, 128], strides = [1, 1, 1]} : vector<16x16x128xbf16> to vector<16x15x128xbf16>
    %102 = tpu.concatenate %101, %62 in 1 : vector<16x15x128xbf16>, vector<16x1x128xbf16> -> vector<16x16x128xbf16>
    %103 = vector.shape_cast %100 : vector<16x16x128xbf16> to vector<256x128xbf16>
    %c768 = arith.constant 768 : index
    %c0_59 = arith.constant 0 : index
    %104 = vector.load %arg3[%c768, %c0_59] : memref<1152x128xbf16, #tpu.memory_space<vmem>>, vector<128x128xbf16>
    %cst_60 = arith.constant dense<0.000000e+00> : vector<256x128xf32>
    %105 = tpu.matmul %103, %104, %cst_60 {dimension_numbers = #tpu.dot_dimension_numbers<[1], [0], [0], [1], [0, 0, 1, 1], [], []>} : vector<256x128xbf16>, vector<128x128xbf16>, vector<256x128xf32> -> vector<256x128xf32>
    %106 = arith.addf %97, %105 : vector<256x128xf32>
    %107 = vector.shape_cast %98 : vector<16x16x128xbf16> to vector<256x128xbf16>
    %c896 = arith.constant 896 : index
    %c0_61 = arith.constant 0 : index
    %108 = vector.load %arg3[%c896, %c0_61] : memref<1152x128xbf16, #tpu.memory_space<vmem>>, vector<128x128xbf16>
    %cst_62 = arith.constant dense<0.000000e+00> : vector<256x128xf32>
    %109 = tpu.matmul %107, %108, %cst_62 {dimension_numbers = #tpu.dot_dimension_numbers<[1], [0], [0], [1], [0, 0, 1, 1], [], []>} : vector<256x128xbf16>, vector<128x128xbf16>, vector<256x128xf32> -> vector<256x128xf32>
    %110 = arith.addf %106, %109 : vector<256x128xf32>
    %111 = vector.shape_cast %102 : vector<16x16x128xbf16> to vector<256x128xbf16>
    %c1024 = arith.constant 1024 : index
    %c0_63 = arith.constant 0 : index
    %112 = vector.load %arg3[%c1024, %c0_63] : memref<1152x128xbf16, #tpu.memory_space<vmem>>, vector<128x128xbf16>
    %cst_64 = arith.constant dense<0.000000e+00> : vector<256x128xf32>
    %113 = tpu.matmul %111, %112, %cst_64 {dimension_numbers = #tpu.dot_dimension_numbers<[1], [0], [0], [1], [0, 0, 1, 1], [], []>} : vector<256x128xbf16>, vector<128x128xbf16>, vector<256x128xf32> -> vector<256x128xf32>
    %114 = arith.addf %110, %113 : vector<256x128xf32>
    %cst_65 = arith.constant dense<0.000000e+00> : vector<128xf32>
    %115 = vector.multi_reduction <add>, %114, %cst_65 [0] : vector<256x128xf32> to vector<128xf32>
    %116 = vector.shape_cast %115 : vector<128xf32> to vector<1x128xf32>
    %c0_66 = arith.constant 0 : index
    %c0_67 = arith.constant 0 : index
    %c0_68 = arith.constant 0 : index
    %c0_69 = arith.constant 0 : index
    %117 = vector.load %arg7[%c0_66, %c0_67, %c0_68, %c0_69] : memref<1x1x1x128xf32, #tpu.memory_space<vmem>>, vector<1x1x1x128xf32>
    %118 = vector.shape_cast %117 : vector<1x1x1x128xf32> to vector<1x128xf32>
    %119 = vector.shape_cast %116 : vector<1x128xf32> to vector<1x1x1x128xf32>
    tpu.vector_store %arg7[%c0_66, %c0_67, %c0_68, %c0_69], %119 {strides = array<i32>} : memref<1x1x1x128xf32, #tpu.memory_space<vmem>>, vector<1x1x1x128xf32>,
    %120 = arith.mulf %114, %114 : vector<256x128xf32>
    %cst_70 = arith.constant dense<0.000000e+00> : vector<128xf32>
    %121 = vector.multi_reduction <add>, %120, %cst_70 [0] : vector<256x128xf32> to vector<128xf32>
    %122 = vector.shape_cast %121 : vector<128xf32> to vector<1x128xf32>
    %c0_71 = arith.constant 0 : index
    %c0_72 = arith.constant 0 : index
    %c0_73 = arith.constant 0 : index
    %c0_74 = arith.constant 0 : index
    %123 = vector.load %arg8[%c0_71, %c0_72, %c0_73, %c0_74] : memref<1x1x1x128xf32, #tpu.memory_space<vmem>>, vector<1x1x1x128xf32>
    %124 = vector.shape_cast %123 : vector<1x1x1x128xf32> to vector<1x128xf32>
    %125 = vector.shape_cast %122 : vector<1x128xf32> to vector<1x1x1x128xf32>
    tpu.vector_store %arg8[%c0_71, %c0_72, %c0_73, %c0_74], %125 {strides = array<i32>} : memref<1x1x1x128xf32, #tpu.memory_space<vmem>>, vector<1x1x1x128xf32>,
    %126 = vector.shape_cast %114 : vector<256x128xf32> to vector<16x16x128xf32>
    %127 = arith.truncf %126 : vector<16x16x128xf32> to vector<16x16x128xbf16>
    %c0_75 = arith.constant 0 : index
    %c0_76 = arith.constant 0 : index
    %c0_77 = arith.constant 0 : index
    %c0_78 = arith.constant 0 : index
    %128 = vector.load %arg6[%c0_75, %c0_76, %c0_77, %c0_78] : memref<1x16x16x128xbf16, #tpu.memory_space<vmem>>, vector<1x16x16x128xbf16>
    %129 = vector.shape_cast %128 : vector<1x16x16x128xbf16> to vector<16x16x128xbf16>
    %130 = vector.shape_cast %127 : vector<16x16x128xbf16> to vector<1x16x16x128xbf16>
    tpu.vector_store %arg6[%c0_75, %c0_76, %c0_77, %c0_78], %130 {strides = array<i32>} : memref<1x16x16x128xbf16, #tpu.memory_space<vmem>>, vector<1x16x16x128xbf16>,
    return
  }
  func.func @transform_0(%arg0: i32, %arg1: i32) -> (i32, i32, i32, i32) {
    %c0_i32 = arith.constant 0 : i32
    %c0_i32_0 = arith.constant 0 : i32
    %c0_i32_1 = arith.constant 0 : i32
    %c0_i32_2 = arith.constant 0 : i32
    return %arg0, %c0_i32, %c0_i32_0, %c0_i32_1 : i32, i32, i32, i32
  }
  func.func @transform_1(%arg0: i32, %arg1: i32) -> (i32, i32) {
    %c0_i32 = arith.constant 0 : i32
    %c0_i32_0 = arith.constant 0 : i32
    %c0_i32_1 = arith.constant 0 : i32
    return %c0_i32, %c0_i32_0 : i32, i32
  }
  func.func @transform_2(%arg0: i32, %arg1: i32) -> (i32, i32) {
    %c0_i32 = arith.constant 0 : i32
    %c0_i32_0 = arith.constant 0 : i32
    %c0_i32_1 = arith.constant 0 : i32
    return %c0_i32, %c0_i32_0 : i32, i32
  }
  func.func @transform_3(%arg0: i32, %arg1: i32) -> (i32, i32) {
    %c0_i32 = arith.constant 0 : i32
    %c0_i32_0 = arith.constant 0 : i32
    %c0_i32_1 = arith.constant 0 : i32
    return %c0_i32, %c0_i32_0 : i32, i32
  }
  func.func @transform_4(%arg0: i32, %arg1: i32) -> (i32, i32, i32, i32) {
    %c0_i32 = arith.constant 0 : i32
    %c0_i32_0 = arith.constant 0 : i32
    %c0_i32_1 = arith.constant 0 : i32
    return %arg0, %arg1, %c0_i32, %c0_i32_0 : i32, i32, i32, i32
  }
  func.func @transform_5(%arg0: i32, %arg1: i32) -> (i32, i32, i32, i32) {
    %c0_i32 = arith.constant 0 : i32
    %c0_i32_0 = arith.constant 0 : i32
    %c0_i32_1 = arith.constant 0 : i32
    return %arg0, %arg1, %c0_i32, %c0_i32_0 : i32, i32, i32, i32
  }
  func.func @transform_6(%arg0: i32, %arg1: i32) -> (i32, i32, i32, i32) {
    %c0_i32 = arith.constant 0 : i32
    %c0_i32_0 = arith.constant 0 : i32
    %c0_i32_1 = arith.constant 0 : i32
    return %arg0, %arg1, %c0_i32, %c0_i32_0 : i32, i32, i32, i32
  }
}

module attributes {stable_mosaic.version = 11 : i64} {
  func.func @_bn_relu_kernel(%arg0: i32, %arg1: i32, %arg2: memref<1x16x16x128xbf16, #tpu.memory_space<vmem>>, %arg3: memref<1x8xf32, #tpu.memory_space<vmem>>, %arg4: memref<1x8xf32, #tpu.memory_space<vmem>>, %arg5: memref<1x16x16x8xf32, #tpu.memory_space<vmem>>) attributes {dimension_semantics = [#tpu.dimension_semantics<parallel>, #tpu.dimension_semantics<parallel>], iteration_bounds = array<i64: 2, 1>, scalar_prefetch = 0 : i64, scratch_operands = 0 : i64, tpu.core_type = #tpu.core_type<tc>, window_params = [{transform_indices = @transform_0, window_bounds = array<i64: 1, 16, 16, 128>}, {pipeline_mode = #tpu.pipeline_mode<synchronous>, transform_indices = @transform_1, window_bounds = array<i64: 1, 8>}, {pipeline_mode = #tpu.pipeline_mode<synchronous>, transform_indices = @transform_2, window_bounds = array<i64: 1, 8>}, {transform_indices = @transform_3, window_bounds = array<i64: 1, 16, 16, 8>}]} {
    %c0 = arith.constant 0 : index
    %c0_0 = arith.constant 0 : index
    %0 = vector.load %arg3[%c0, %c0_0] : memref<1x8xf32, #tpu.memory_space<vmem>>, vector<1x8xf32>
    %1 = vector.shape_cast %0 : vector<1x8xf32> to vector<1x1x8xf32>
    %c0_1 = arith.constant 0 : index
    %c0_2 = arith.constant 0 : index
    %2 = vector.load %arg4[%c0_1, %c0_2] : memref<1x8xf32, #tpu.memory_space<vmem>>, vector<1x8xf32>
    %3 = vector.shape_cast %2 : vector<1x8xf32> to vector<1x1x8xf32>
    %c0_3 = arith.constant 0 : index
    %c0_4 = arith.constant 0 : index
    %c0_5 = arith.constant 0 : index
    %c0_6 = arith.constant 0 : index
    %4 = vector.load %arg2[%c0_3, %c0_4, %c0_5, %c0_6] : memref<1x16x16x128xbf16, #tpu.memory_space<vmem>>, vector<1x16x16x8xbf16>
    %5 = vector.shape_cast %4 : vector<1x16x16x8xbf16> to vector<16x16x8xbf16>
    %6 = arith.extf %5 : vector<16x16x8xbf16> to vector<16x16x8xf32>
    %7 = vector.broadcast %1 : vector<1x1x8xf32> to vector<16x16x8xf32>
    %8 = arith.mulf %6, %7 : vector<16x16x8xf32>
    %9 = vector.broadcast %3 : vector<1x1x8xf32> to vector<16x16x8xf32>
    %10 = arith.addf %8, %9 : vector<16x16x8xf32>
    %cst = arith.constant 0.000000e+00 : f32
    %11 = vector.broadcast %cst : f32 to vector<16x16x8xf32>
    %12 = arith.maximumf %10, %11 : vector<16x16x8xf32>
    %c0_7 = arith.constant 0 : index
    %c0_8 = arith.constant 0 : index
    %c0_9 = arith.constant 0 : index
    %c0_10 = arith.constant 0 : index
    %13 = vector.load %arg5[%c0_7, %c0_8, %c0_9, %c0_10] : memref<1x16x16x8xf32, #tpu.memory_space<vmem>>, vector<1x16x16x8xf32>
    %14 = vector.shape_cast %13 : vector<1x16x16x8xf32> to vector<16x16x8xf32>
    %15 = vector.shape_cast %12 : vector<16x16x8xf32> to vector<1x16x16x8xf32>
    tpu.vector_store %arg5[%c0_7, %c0_8, %c0_9, %c0_10], %15 {strides = array<i32>} : memref<1x16x16x8xf32, #tpu.memory_space<vmem>>, vector<1x16x16x8xf32>,
    return
  }
  func.func @transform_0(%arg0: i32, %arg1: i32) -> (i32, i32, i32, i32) {
    %c0_i32 = arith.constant 0 : i32
    %c0_i32_0 = arith.constant 0 : i32
    %c0_i32_1 = arith.constant 0 : i32
    return %arg0, %arg1, %c0_i32, %c0_i32_0 : i32, i32, i32, i32
  }
  func.func @transform_1(%arg0: i32, %arg1: i32) -> (i32, i32) {
    %c0_i32 = arith.constant 0 : i32
    %c0_i32_0 = arith.constant 0 : i32
    %c0_i32_1 = arith.constant 0 : i32
    return %c0_i32, %c0_i32_0 : i32, i32
  }
  func.func @transform_2(%arg0: i32, %arg1: i32) -> (i32, i32) {
    %c0_i32 = arith.constant 0 : i32
    %c0_i32_0 = arith.constant 0 : i32
    %c0_i32_1 = arith.constant 0 : i32
    return %c0_i32, %c0_i32_0 : i32, i32
  }
  func.func @transform_3(%arg0: i32, %arg1: i32) -> (i32, i32, i32, i32) {
    %c0_i32 = arith.constant 0 : i32
    %c0_i32_0 = arith.constant 0 : i32
    %c0_i32_1 = arith.constant 0 : i32
    return %arg0, %arg1, %c0_i32, %c0_i32_0 : i32, i32, i32, i32
  }
}

</mosaic_0001>

<bundles_post_ra>
// kernel: double_conv_nchw.5
= control target key start
LH: loop header
LB: loop body
LE: loop exit
PB: predicated region body
PF: predicated region fallthrough
CT: control target
= control target key end

     0   :  { %s680_s12 = smov 0   ;;  %s682_s13 = smov 0   ;;  %s875_s0 = inlined_call_operand.vmem [shape: bf16[2,16,16,128], index: 0, kind: input, shape index: {}]   ;;  %s876_s1 = inlined_call_operand.vmem [shape: f32[1,8], index: 1, kind: input, shape index: {}]   ;;  %s877_s2 = inlined_call_operand.vmem [shape: f32[1,8], index: 2, kind: input, shape index: {}]   ;;  %s878_s3 = inlined_call_operand.vmem [shape: f32[2,16,16,8], index: 3, kind: output, shape index: {}]  }
   0x1   :  { %s684_s14 = smov 0  }
   0x2 LB: > { %s25_s15 = sadd.s32 1, %s654_s13  ;;  %p522_p0 = scmp.ge.s32.totalorder %s658_s14, 1  ;;  %s658_s14 = sphi %s684_s14, %s13_s14   ;;  %s654_s13 = sphi %s682_s13, %s880_s13   ;;  %s650_s12 = sphi %s680_s12, %s879_s12  }
   0x3   : > { %p27_p1 = scmp.ge.s32.totalorder %s25_s15, 2  ;;  %p159_p2 = scmp.lt.s32.totalorder %s658_s14, 3 }
   0x5   : > { %s882_s15 = smov (%p27_p1, %s25_s15), 0  ;;  %p160_p3 = pnand %p522_p0, %p159_p2 }
   0x6   : > { %p194_p4 = scmp.lt.s32.totalorder (!%p160_p3), %s650_s12, 1  ;;  %v709_v0 = vld [vmem:[%s876_s1] ss:$0 sm:$0xff] (!%p160_p3)  ;;  %vm389_vm0 = vcmask (!%p160_p3), 64512  }
   0x7   : > { %163 = sbr.rel (%p160_p3) target bundleno = 54 (0x36), region = 32  ;;  %v718_v9 = vld [vmem:[%s877_s2] ss:$0 sm:$0xff] (!%p160_p3) }
   0xe   : > { %s884_s12 = smov (!%p194_p4, %s650_s12), 1 }
   0xf   : > { %s531_s16 = sshll.u32 %s884_s12, 7  ;;  %s532_s24 = sshll.u32 %s884_s12, 8 }
  0x10   : > { %s704_s19 = scalar_lea.vmem %s875_s0, %s531_s16  ;;  %s736_s27 = scalar_lea.vmem %s878_s3, %s532_s24 }
  0x11   : > { %v534_v1 = vld [vmem:[%s704_s19] sm:$0xff]   ;;  %v597_v2 = vld [vmem:[%s704_s19 + $0x8] sm:$0xff]   ;;  %v598_v3 = vld [vmem:[%s704_s19 + $0x10] sm:$0xff]  }
  0x12   : > { %v535_v4 = vunpack.c.l.bf16 %v534_v1  ;;  %v536_v5 = vunpack.c.h.bf16 %v534_v1  ;;  %v539_v6 = vunpack.c.l.bf16 %v597_v2  ;;  %v540_v7 = vunpack.c.h.bf16 %v597_v2  ;;  %v599_v8 = vld [vmem:[%s704_s19 + $0x18] sm:$0xff]   ;;  %v600_v30 = vld [vmem:[%s704_s19 + $0x20] sm:$0xff]   ;;  %v601_v31 = vld [vmem:[%s704_s19 + $0x28] sm:$0xff]  }
  0x13   : > { %v543_v10 = vunpack.c.l.bf16 %v598_v3  ;;  %v544_v11 = vunpack.c.h.bf16 %v598_v3  ;;  %v547_v12 = vunpack.c.l.bf16 %v599_v8  ;;  %v548_v13 = vunpack.c.h.bf16 %v599_v8  ;;  %v602_v36 = vld [vmem:[%s704_s19 + $0x30] sm:$0xff]   ;;  %v603_v37 = vld [vmem:[%s704_s19 + $0x38] sm:$0xff]   ;;  %v604_v3 = vld [vmem:[%s704_s19 + $0x40] sm:$0xff]  }
  0x14   : > { %v287_v14 = vmul.f32 %v535_v4, %v709_v0  ;;  %v288_v15 = vmul.f32 %v536_v5, %v709_v0  ;;  %v289_v16 = vmul.f32 %v539_v6, %v709_v0  ;;  %v290_v17 = vmul.f32 %v540_v7, %v709_v0  ;;  %v605_v4 = vld [vmem:[%s704_s19 + $0x48] sm:$0xff]  }
  0x15   : > { %v291_v18 = vmul.f32 %v543_v10, %v709_v0  ;;  %v292_v19 = vmul.f32 %v544_v11, %v709_v0  ;;  %v293_v20 = vmul.f32 %v547_v12, %v709_v0  ;;  %v294_v21 = vmul.f32 %v548_v13, %v709_v0  ;;  %v606_v10 = vld [vmem:[%s704_s19 + $0x50] sm:$0xff]   ;;  %v607_v11 = vld [vmem:[%s704_s19 + $0x58] sm:$0xff]  }
  0x16   : > { %v325_v22 = vadd.f32 %v718_v9, %v287_v14  ;;  %v326_v23 = vadd.f32 %v718_v9, %v288_v15  ;;  %v327_v24 = vadd.f32 %v718_v9, %v289_v16  ;;  %v328_v25 = vadd.f32 %v718_v9, %v290_v17 }
  0x17   : > { %v329_v26 = vadd.f32 %v718_v9, %v291_v18  ;;  %v330_v27 = vadd.f32 %v718_v9, %v292_v19  ;;  %v331_v28 = vadd.f32 %v718_v9, %v293_v20  ;;  %v332_v29 = vadd.f32 %v718_v9, %v294_v21 }
  0x18   : > { %v357_v32 = vmax.f32 %v325_v22, 0.0  ;;  %v358_v33 = vmax.f32 %v326_v23, 0.0  ;;  %v359_v34 = vmax.f32 %v327_v24, 0.0  ;;  %v360_v35 = vmax.f32 %v328_v25, 0.0 }
  0x19   : > { %v361_v38 = vmax.f32 %v329_v26, 0.0  ;;  %v362_v39 = vmax.f32 %v330_v27, 0.0  ;;  %v363_v40 = vmax.f32 %v331_v28, 0.0  ;;  %v364_v41 = vmax.f32 %v332_v29, 0.0 }
  0x1a   : > { %390 = vst.msk [vmem:[%s736_s27] sm:$0xff] %vm389_vm0, %v357_v32  ;;  %391 = vst.msk [vmem:[%s736_s27 + $0x8] sm:$0xff] %vm389_vm0, %v358_v33  ;;  %v551_v42 = vunpack.c.l.bf16 %v600_v30  ;;  %v552_v43 = vunpack.c.h.bf16 %v600_v30  ;;  %v555_v44 = vunpack.c.l.bf16 %v601_v31  ;;  %v556_v45 = vunpack.c.h.bf16 %v601_v31 }
  0x1b   : > { %392 = vst.msk [vmem:[%s736_s27 + $0x10] sm:$0xff] %vm389_vm0, %v359_v34  ;;  %393 = vst.msk [vmem:[%s736_s27 + $0x18] sm:$0xff] %vm389_vm0, %v360_v35  ;;  %v559_v46 = vunpack.c.l.bf16 %v602_v36  ;;  %v560_v47 = vunpack.c.h.bf16 %v602_v36  ;;  %v563_v48 = vunpack.c.l.bf16 %v603_v37  ;;  %v564_v49 = vunpack.c.h.bf16 %v603_v37 }
  0x1c   : > { %394 = vst.msk [vmem:[%s736_s27 + $0x20] sm:$0xff] %vm389_vm0, %v361_v38  ;;  %395 = vst.msk [vmem:[%s736_s27 + $0x28] sm:$0xff] %vm389_vm0, %v362_v39  ;;  %v295_v50 = vmul.f32 %v551_v42, %v709_v0  ;;  %v296_v51 = vmul.f32 %v552_v43, %v709_v0  ;;  %v297_v52 = vmul.f32 %v555_v44, %v709_v0  ;;  %v567_v16 = vunpack.c.l.bf16 %v604_v3 }
  0x1d   : > { %396 = vst.msk [vmem:[%s736_s27 + $0x30] sm:$0xff] %vm389_vm0, %v363_v40  ;;  %397 = vst.msk [vmem:[%s736_s27 + $0x38] sm:$0xff] %vm389_vm0, %v364_v41  ;;  %v298_v53 = vmul.f32 %v556_v45, %v709_v0  ;;  %v299_v54 = vmul.f32 %v559_v46, %v709_v0  ;;  %v300_v55 = vmul.f32 %v560_v47, %v709_v0  ;;  %v568_v17 = vunpack.c.h.bf16 %v604_v3  ;;  %v608_v40 = vld [vmem:[%s704_s19 + $0x60] sm:$0xff]   ;;  %v609_v41 = vld [vmem:[%s704_s19 + $0x68] sm:$0xff]  }
  0x1e   : > { %v301_v56 = vmul.f32 %v563_v48, %v709_v0  ;;  %v302_v57 = vmul.f32 %v564_v49, %v709_v0  ;;  %v333_v58 = vadd.f32 %v718_v9, %v295_v50  ;;  %v334_v59 = vadd.f32 %v718_v9, %v296_v51  ;;  %v610_v46 = vld [vmem:[%s704_s19 + $0x70] sm:$0xff]   ;;  %v611_v47 = vld [vmem:[%s704_s19 + $0x78] sm:$0xff]  }
  0x1f   : > { %v335_v60 = vadd.f32 %v718_v9, %v297_v52  ;;  %v336_v61 = vadd.f32 %v718_v9, %v298_v53  ;;  %v337_v62 = vadd.f32 %v718_v9, %v299_v54  ;;  %v338_v63 = vadd.f32 %v718_v9, %v300_v55 }
  0x20   : > { %v339_v1 = vadd.f32 %v718_v9, %v301_v56  ;;  %v340_v2 = vadd.f32 %v718_v9, %v302_v57  ;;  %v365_v5 = vmax.f32 %v333_v58, 0.0  ;;  %v366_v6 = vmax.f32 %v334_v59, 0.0 }
  0x21   : > { %v367_v7 = vmax.f32 %v335_v60, 0.0  ;;  %v368_v8 = vmax.f32 %v336_v61, 0.0  ;;  %v369_v12 = vmax.f32 %v337_v62, 0.0  ;;  %v370_v13 = vmax.f32 %v338_v63, 0.0 }
  0x22   : > { %v371_v14 = vmax.f32 %v339_v1, 0.0  ;;  %v372_v15 = vmax.f32 %v340_v2, 0.0  ;;  %398 = vst.msk [vmem:[%s736_s27 + $0x40] sm:$0xff] %vm389_vm0, %v365_v5  ;;  %399 = vst.msk [vmem:[%s736_s27 + $0x48] sm:$0xff] %vm389_vm0, %v366_v6  ;;  %v571_v18 = vunpack.c.l.bf16 %v605_v4  ;;  %v572_v19 = vunpack.c.h.bf16 %v605_v4 }
  0x23   : > { %400 = vst.msk [vmem:[%s736_s27 + $0x50] sm:$0xff] %vm389_vm0, %v367_v7  ;;  %401 = vst.msk [vmem:[%s736_s27 + $0x58] sm:$0xff] %vm389_vm0, %v368_v8  ;;  %v575_v20 = vunpack.c.l.bf16 %v606_v10  ;;  %v576_v21 = vunpack.c.h.bf16 %v606_v10  ;;  %v579_v22 = vunpack.c.l.bf16 %v607_v11  ;;  %v580_v23 = vunpack.c.h.bf16 %v607_v11 }
  0x24   : > { %402 = vst.msk [vmem:[%s736_s27 + $0x60] sm:$0xff] %vm389_vm0, %v369_v12  ;;  %403 = vst.msk [vmem:[%s736_s27 + $0x68] sm:$0xff] %vm389_vm0, %v370_v13  ;;  %v303_v24 = vmul.f32 %v567_v16, %v709_v0  ;;  %v304_v25 = vmul.f32 %v568_v17, %v709_v0  ;;  %v305_v26 = vmul.f32 %v571_v18, %v709_v0  ;;  %v583_v52 = vunpack.c.l.bf16 %v608_v40 }
  0x25   : > { %404 = vst.msk [vmem:[%s736_s27 + $0x70] sm:$0xff] %vm389_vm0, %v371_v14  ;;  %405 = vst.msk [vmem:[%s736_s27 + $0x78] sm:$0xff] %vm389_vm0, %v372_v15  ;;  %v306_v27 = vmul.f32 %v572_v19, %v709_v0  ;;  %v307_v28 = vmul.f32 %v575_v20, %v709_v0  ;;  %v308_v29 = vmul.f32 %v576_v21, %v709_v0  ;;  %v584_v53 = vunpack.c.h.bf16 %v608_v40 }
  0x26   : > { %v309_v30 = vmul.f32 %v579_v22, %v709_v0  ;;  %v310_v31 = vmul.f32 %v580_v23, %v709_v0  ;;  %v341_v32 = vadd.f32 %v718_v9, %v303_v24  ;;  %v342_v33 = vadd.f32 %v718_v9, %v304_v25 }
  0x27   : > { %v343_v34 = vadd.f32 %v718_v9, %v305_v26  ;;  %v344_v35 = vadd.f32 %v718_v9, %v306_v27  ;;  %v345_v36 = vadd.f32 %v718_v9, %v307_v28  ;;  %v346_v37 = vadd.f32 %v718_v9, %v308_v29 }
  0x28   : > { %v347_v38 = vadd.f32 %v718_v9, %v309_v30  ;;  %v348_v39 = vadd.f32 %v718_v9, %v310_v31  ;;  %v373_v42 = vmax.f32 %v341_v32, 0.0  ;;  %v374_v43 = vmax.f32 %v342_v33, 0.0 }
  0x29   : > { %v375_v44 = vmax.f32 %v343_v34, 0.0  ;;  %v376_v45 = vmax.f32 %v344_v35, 0.0  ;;  %v377_v48 = vmax.f32 %v345_v36, 0.0  ;;  %v378_v49 = vmax.f32 %v346_v37, 0.0 }
  0x2a   : > { %v379_v50 = vmax.f32 %v347_v38, 0.0  ;;  %v380_v51 = vmax.f32 %v348_v39, 0.0  ;;  %406 = vst.msk [vmem:[%s736_s27 + $0x80] sm:$0xff] %vm389_vm0, %v373_v42  ;;  %407 = vst.msk [vmem:[%s736_s27 + $0x88] sm:$0xff] %vm389_vm0, %v374_v43  ;;  %v587_v54 = vunpack.c.l.bf16 %v609_v41  ;;  %v588_v55 = vunpack.c.h.bf16 %v609_v41 }
  0x2b   : > { %408 = vst.msk [vmem:[%s736_s27 + $0x90] sm:$0xff] %vm389_vm0, %v375_v44  ;;  %409 = vst.msk [vmem:[%s736_s27 + $0x98] sm:$0xff] %vm389_vm0, %v376_v45  ;;  %v591_v56 = vunpack.c.l.bf16 %v610_v46  ;;  %v592_v57 = vunpack.c.h.bf16 %v610_v46  ;;  %v595_v58 = vunpack.c.l.bf16 %v611_v47  ;;  %v596_v59 = vunpack.c.h.bf16 %v611_v47 }
  0x2c   : > { %410 = vst.msk [vmem:[%s736_s27 + $0xa0] sm:$0xff] %vm389_vm0, %v377_v48  ;;  %411 = vst.msk [vmem:[%s736_s27 + $0xa8] sm:$0xff] %vm389_vm0, %v378_v49  ;;  %v311_v60 = vmul.f32 %v583_v52, %v709_v0  ;;  %v312_v61 = vmul.f32 %v584_v53, %v709_v0  ;;  %v313_v62 = vmul.f32 %v587_v54, %v709_v0 }
  0x2d   : > { %412 = vst.msk [vmem:[%s736_s27 + $0xb0] sm:$0xff] %vm389_vm0, %v379_v50  ;;  %413 = vst.msk [vmem:[%s736_s27 + $0xb8] sm:$0xff] %vm389_vm0, %v380_v51  ;;  %v314_v63 = vmul.f32 %v588_v55, %v709_v0  ;;  %v315_v1 = vmul.f32 %v591_v56, %v709_v0  ;;  %v316_v2 = vmul.f32 %v592_v57, %v709_v0 }
  0x2e   : > { %v317_v3 = vmul.f32 %v595_v58, %v709_v0  ;;  %v318_v4 = vmul.f32 %v596_v59, %v709_v0  ;;  %v349_v5 = vadd.f32 %v718_v9, %v311_v60  ;;  %v350_v6 = vadd.f32 %v718_v9, %v312_v61 }
  0x2f   : > { %v351_v7 = vadd.f32 %v718_v9, %v313_v62  ;;  %v352_v8 = vadd.f32 %v718_v9, %v314_v63  ;;  %v353_v10 = vadd.f32 %v718_v9, %v315_v1  ;;  %v354_v11 = vadd.f32 %v718_v9, %v316_v2 }
  0x30   : > { %v355_v0 = vadd.f32 %v718_v9, %v317_v3  ;;  %v356_v12 = vadd.f32 %v718_v9, %v318_v4  ;;  %v381_v13 = vmax.f32 %v349_v5, 0.0  ;;  %v382_v14 = vmax.f32 %v350_v6, 0.0 }
  0x31   : > { %v383_v15 = vmax.f32 %v351_v7, 0.0  ;;  %v384_v16 = vmax.f32 %v352_v8, 0.0  ;;  %v385_v17 = vmax.f32 %v353_v10, 0.0  ;;  %v386_v18 = vmax.f32 %v354_v11, 0.0 }
  0x32   : > { %v387_v19 = vmax.f32 %v355_v0, 0.0  ;;  %v388_v20 = vmax.f32 %v356_v12, 0.0  ;;  %414 = vst.msk [vmem:[%s736_s27 + $0xc0] sm:$0xff] %vm389_vm0, %v381_v13  ;;  %415 = vst.msk [vmem:[%s736_s27 + $0xc8] sm:$0xff] %vm389_vm0, %v382_v14 }
  0x33   : > { %416 = vst.msk [vmem:[%s736_s27 + $0xd0] sm:$0xff] %vm389_vm0, %v383_v15  ;;  %417 = vst.msk [vmem:[%s736_s27 + $0xd8] sm:$0xff] %vm389_vm0, %v384_v16 }
  0x34   : > { %418 = vst.msk [vmem:[%s736_s27 + $0xe0] sm:$0xff] %vm389_vm0, %v385_v17  ;;  %419 = vst.msk [vmem:[%s736_s27 + $0xe8] sm:$0xff] %vm389_vm0, %v386_v18 }
  0x35   : > { %420 = vst.msk [vmem:[%s736_s27 + $0xf0] sm:$0xff] %vm389_vm0, %v387_v19  ;;  %421 = vst.msk [vmem:[%s736_s27 + $0xf8] sm:$0xff] %vm389_vm0, %v388_v20 }
  0x36 PF: > { %s13_s14 = sadd.s32 1, %s658_s14   ;;  %s879_s12 = smov %s654_s13 }
  0x37   : > { %p10_p5 = scmp.ge.s32.totalorder %s13_s14, 4   ;;  %s880_s13 = smov %s882_s15 }
  0x39   :  { %12 = sbr.rel (!%p10_p5) target bundleno = 2 (0x2), region = 62 }

// kernel: double_conv_nchw.3
= control target key start
LH: loop header
LB: loop body
LE: loop exit
PB: predicated region body
PF: predicated region fallthrough
CT: control target
= control target key end

     0   :  { %s2888_s21 = smov 0   ;;  %s2890_s22 = smov 0   ;;  %s3507_s0 = inlined_call_operand.vmem [shape: bf16[2,16,16,4], index: 0, kind: input, shape index: {}]   ;;  %s3508_s1 = inlined_call_operand.vmem [shape: bf16[36,128], index: 1, kind: input, shape index: {}]   ;;  %s3509_s2 = inlined_call_operand.vmem [shape: f32[1,4], index: 2, kind: input, shape index: {}]   ;;  %s3510_s3 = inlined_call_operand.vmem [shape: f32[1,4], index: 3, kind: input, shape index: {}]   ;;  %s3511_s4 = inlined_call_operand.vmem [shape: bf16[2,16,16,128], index: 4, kind: output, shape index: {0}]   ;;  %s3512_s5 = inlined_call_operand.vmem [shape: f32[2,1,1,128], index: 5, kind: output, shape index: {1}]   ;;  %s3513_s6 = inlined_call_operand.vmem [shape: f32[2,1,1,128], index: 6, kind: output, shape index: {2}]  }
   0x1   :  { %s2892_s23 = smov 0  }
   0x2 LB: > { %s29_s2 = sadd.s32 1, %s2839_s22  ;;  %p2491_p0 = scmp.ge.s32.totalorder %s2843_s23, 1  ;;  %s2843_s23 = sphi %s2892_s23, %s17_s23   ;;  %s2839_s22 = sphi %s2890_s22, %s3519_s22   ;;  %s2835_s21 = sphi %s2888_s21, %s3518_s21  }
   0x3   : > { %p31_p1 = scmp.ge.s32.totalorder %s29_s2, 2  ;;  %p235_p2 = scmp.lt.s32.totalorder %s2843_s23, 3 }
   0x5   : > { %s3521_s2 = smov (%p31_p1, %s29_s2), 0  ;;  %p236_p3 = pnand %p2491_p0, %p235_p2 }
   0x6   : > { %p282_p4 = scmp.lt.s32.totalorder (!%p236_p3), %s2835_s21, 1  ;;  %vm444_vm0 = vcmask (!%p236_p3), 31744   ;;  %vm707_vm1 = vcmask (!%p236_p3), 1047552   ;;  %vm708_vm2 = vsmask.f32 (!%p236_p3), 7424  ;;  %s2845_s27 = smov (!%p236_p3), 16  }
   0x7   : > { %239 = sbr.rel (%p236_p3) target bundleno = 632 (0x278), region = 36  ;;  %s2846_s28 = smov (!%p236_p3), 4   ;;  %vm640_vm3 = vcmask (!%p236_p3), 1040384   ;;  %vm641_vm4 = vsmask.f32 (!%p236_p3), 256  ;;  %vm2951_vm5 = vmand (!%p236_p3), %vm707_vm1, %vm708_vm2  ;;  %v2812_v40 = vld [vmem:[%s3508_s1] sm:$0xff] (!%p236_p3)  }
   0x8   : > { %s2847_s29 = smov (!%p236_p3), 28   ;;  %vm2958_vm6 = vmand (!%p236_p3), %vm640_vm3, %vm641_vm4  ;;  %s2848_s30 = smov (!%p236_p3), 8   ;;  %2724 = vmatprep.subr.bf16.mxu0 (!%p236_p3), %v2812_v40  ;;  %v2813_v47 = vld [vmem:[%s3508_s1 + $0x8] sm:$0xff] (!%p236_p3)   ;;  %2762 = vmatprep.subr.bf16.mxu1 (!%p236_p3), %v2812_v40  ;;  %v2814_v51 = vld [vmem:[%s3508_s1 + $0x10] ss:$0 sps:$4 sm:$0x33] (!%p236_p3)  }
   0x9   : > { %s2849_s9 = smov (!%p236_p3), 12   ;;  %2725 = vmatpush3.bf16.msra.mxu0 (!%p236_p3), %v2812_v40  ;;  %2765 = vmatpush3.bf16.msra.mxu1 (!%p236_p3), %v2812_v40  ;;  %s2850_s12 = smov (!%p236_p3), 20   ;;  %vm1891_vm7 = vcmask (!%p236_p3), 1041408   ;;  %vm1607_vm8 = vcmask (!%p236_p3), 64512   ;;  %vm1640_vm9 = vcmask (!%p236_p3), 97280   ;;  %vm1673_vm10 = vcmask (!%p236_p3), 130048  }
   0xa   : > { %2726 = vmatprep.subr.bf16.mxu0 (!%p236_p3), %v2813_v47  ;;  %2763 = vmatprep.subr.bf16.mxu1 (!%p236_p3), %v2813_v47  ;;  %s2851_s15 = smov (!%p236_p3), 24   ;;  %v1893_v55 = vsel (!%p236_p3), %vm1891_vm7, %v2814_v51, 0  ;;  %s2852_s16 = smov (!%p236_p3), 32   ;;  %vm1706_vm11 = vcmask (!%p236_p3), 162816   ;;  %vm1739_vm12 = vcmask (!%p236_p3), 195584   ;;  %vm1772_vm13 = vcmask (!%p236_p3), 228352  }
   0xb   : > { %vm1805_vm14 = vcmask (!%p236_p3), 261120   ;;  %vm1858_vm15 = vcmask (!%p236_p3), 293888  }
   0xd   : > { %2727 = vmatpush3.bf16.msra.mxu0 (!%p236_p3), %v2813_v47  ;;  %2766 = vmatpush3.bf16.msra.mxu1 (!%p236_p3), %v2813_v47 }
   0xe   : > { %s3523_s21 = smov (!%p282_p4, %s2835_s21), 1  ;;  %2768 = vmatprep.subr.msk.bf16.mxu0 %vm1891_vm7, %v2814_v51  ;;  %2769 = vmatprep.subr.msk.bf16.mxu1 %vm1891_vm7, %v2814_v51 }
   0xf   : > { %s2567_s3 = sshll.u32 %s3523_s21, 7  ;;  %s303_s24 = scalar_lea.vmem %s3512_s5, %s3523_s21 }
  0x10   : > { %s2914_s26 = scalar_lea.vmem %s3507_s0, %s2567_s3  ;;  %s3465_s19 = scalar_lea.vmem %s3511_s4, %s2567_s3 }
  0x11   : > { %v2802_v0 = vld [vmem:[%s2914_s26 + $0x8] sm:$0xff]   ;;  %v2803_v1 = vld [vmem:[%s2914_s26] sm:$0xff]   ;;  %v2804_v2 = vld [vmem:[%s2914_s26 + $0x10] sm:$0xff]   ;;  %2729 = vmatpush3.bf16.msra.mxu0 %v1893_v55  ;;  %2767 = vmatpush3.bf16.msra.mxu1 %v1893_v55 }
  0x12   : > { %446 = vst.msk [vmem:[#allocation2 + $0x10] sm:$0xff] %vm444_vm0, %v2802_v0  ;;  %445 = vst.msk [vmem:[#allocation2 + $0x8] sm:$0xff] %vm444_vm0, %v2803_v1  ;;  %v2602_v3 = vld [vmem:[%s2914_s26] sm:$0xff]   ;;  %v2805_v6 = vld [vmem:[%s2914_s26 + $0x18] sm:$0xff]  }
  0x13   : > { %447 = vst.msk [vmem:[#allocation2 + $0x18] sm:$0xff] %vm444_vm0, %v2804_v2  ;;  %v2603_v4 = vunpack.c.l.bf16 %v2602_v3  ;;  %v2604_v5 = vunpack.c.h.bf16 %v2602_v3  ;;  %v2806_v7 = vld [vmem:[%s2914_s26 + $0x20] sm:$0xff]   ;;  %448 = vst.msk [vmem:[#allocation2 + $0x20] sm:$0xff] %vm444_vm0, %v2805_v6  ;;  %v2807_v10 = vld [vmem:[%s2914_s26 + $0x28] sm:$0xff]  }
  0x14   : > { %v2808_v11 = vld [vmem:[%s2914_s26 + $0x30] sm:$0xff]   ;;  %449 = vst.msk [vmem:[#allocation2 + $0x28] sm:$0xff] %vm444_vm0, %v2806_v7  ;;  %450 = vst.msk [vmem:[#allocation2 + $0x30] sm:$0xff] %vm444_vm0, %v2807_v10  ;;  %v2809_v13 = vld [vmem:[%s2914_s26 + $0x38] sm:$0xff]  }
  0x15   : > { %v476_v8 = vmul.f32 0.0, %v2603_v4  ;;  %v477_v9 = vmul.f32 0.0, %v2604_v5  ;;  %451 = vst.msk [vmem:[#allocation2 + $0x38] sm:$0xff] %vm444_vm0, %v2808_v11  ;;  %v2810_v15 = vld [vmem:[%s2914_s26 + $0x40] sm:$0xff]   ;;  %452 = vst.msk [vmem:[#allocation2 + $0x40] sm:$0xff] %vm444_vm0, %v2809_v13  ;;  %v2811_v22 = vld [vmem:[%s2914_s26 + $0x48] sm:$0xff]  }
  0x16   : > { %453 = vst.msk [vmem:[#allocation2 + $0x48] sm:$0xff] %vm444_vm0, %v2810_v15  ;;  %454 = vst.msk [vmem:[#allocation2 + $0x50] sm:$0xff] %vm444_vm0, %v2811_v22  ;;  %v2815_v26 = vld [vmem:[%s2914_s26 + $0x50] sm:$0xff]   ;;  %v2816_v56 = vld [vmem:[%s2914_s26 + $0x58] sm:$0xff]  }
  0x17   : > { %v491_v12 = vpack.c.bf16 %v477_v9, %v476_v8  ;;  %455 = vst.msk [vmem:[#allocation2 + $0x58] sm:$0xff] %vm444_vm0, %v2815_v26  ;;  %456 = vst.msk [vmem:[#allocation2 + $0x60] sm:$0xff] %vm444_vm0, %v2816_v56  ;;  %v2817_v1 = vld [vmem:[%s2914_s26 + $0x60] sm:$0xff]   ;;  %v2818_v13 = vld [vmem:[%s2914_s26 + $0x68] sm:$0xff]  }
  0x18   : > { %457 = vst.msk [vmem:[#allocation2 + $0x68] sm:$0xff] %vm444_vm0, %v2817_v1  ;;  %458 = vst.msk [vmem:[#allocation2 + $0x70] sm:$0xff] %vm444_vm0, %v2818_v13 }
  0x19   : > { %v2932_v14 = vld [vmem:[#allocation2 + $0x10] sm:$0xff]  ;;  %v497_v18 = vld [vmem:[#allocation2 + $0x8] sm:$0xff]  ;;  %492 = vst.msk [vmem:[#allocation2] sm:$0xff] %vm444_vm0, %v491_v12 }
  0x1a   : > { %1337 = vrot.lane.b32.xlu1 %v2932_v14, %s2845_s27  ;;  %v750_v16 = vshrl.u32 %v2932_v14, 16  ;;  %v753_v17 = vshll.u32 %v2932_v14, 16  ;;  %1193 = vrot.lane.b32.xlu0 %v497_v18, %s2846_s28  ;;  %v520_v19 = vshrl.u32 %v497_v18, 16  ;;  %v523_v20 = vshll.u32 %v497_v18, 16  ;;  %v2942_v21 = vld [vmem:[#allocation2 + $0x18] sm:$0xff]  ;;  %v729_v54 = vld [vmem:[#allocation2 + $0x20] sm:$0xff] }
  0x1b   : > { %v975_v27 = vshrl.u32 %v2942_v21, 16  ;;  %v978_v34 = vshll.u32 %v2942_v21, 16  ;;  %v764_v58 = vshrl.u32 %v729_v54, 16  ;;  %v767_v61 = vshll.u32 %v729_v54, 16  ;;  %v954_v0 = vld [vmem:[#allocation2 + $0x28] sm:$0xff]  ;;  %v731_v12 = vld [vmem:[#allocation2 + $0x30] sm:$0xff] }
  0x1c   : > { %v752_v23 = vrot.slane %v750_v16, 7  ;;  %v661_v24 = vrot.slane %v523_v20, 1  ;;  %v888_v30 = vrot.slane %v753_v17, 1  ;;  %v522_v31 = vrot.slane %v520_v19, 7 }
  0x1d   : > { %v977_v37 = vrot.slane %v975_v27, 7  ;;  %v1113_v53 = vrot.slane %v978_v34, 1  ;;  %v766_v60 = vrot.slane %v764_v58, 7  ;;  %v892_v3 = vrot.slane %v767_v61, 1  ;;  %v3092_v47 = vld [vmem:[#allocation2 + $0x48] sm:$0xff] }
  0x1e   : > { %1481 = vrot.lane.b32.xlu1 %v2942_v21, %s2847_s29  ;;  %1335 = vrot.lane.b32.xlu0 %v497_v18, %s2845_s27  ;;  %v662_v28 = vor.u32 %v661_v24, %v520_v19  ;;  %v755_v29 = vor.u32 %v753_v17, %v752_v23  ;;  %v889_v36 = vor.u32 %v888_v30, %v750_v16  ;;  %v989_v4 = vshrl.u32 %v954_v0, 16 }
  0x1f   : > { %v748_v39 = vor.u32 %v523_v20, %v522_v31  ;;  %v980_v44 = vor.u32 %v978_v34, %v977_v37  ;;  %v1114_v59 = vor.u32 %v1113_v53, %v975_v27  ;;  %v769_v63 = vor.u32 %v767_v61, %v766_v60  ;;  %v956_v20 = vld [vmem:[#allocation2 + $0x38] sm:$0xff]  ;;  %v733_v34 = vld [vmem:[#allocation2 + $0x40] sm:$0xff] }
  0x20   : > { %v711_v33 = vsel %vm2951_vm5, %v662_v28, 0  ;;  %v2971_v35 = vsel %vm2958_vm6, 0, %v755_v29  ;;  %v496_v38 = vld [vmem:[#allocation2] sm:$0xff]  ;;  %v935_v43 = vsel %vm2951_vm5, %v889_v36, 0  ;;  %v893_v5 = vor.u32 %v892_v3, %v764_v58  ;;  %v2820_v36 = vld [vmem:[%s2914_s26 + $0x78] sm:$0xff]   ;;  %v3123_v3 = vld [vmem:[#allocation2 + $0x50] sm:$0xff] }
  0x21   : > { %v513_v41 = vshrl.u32 %v496_v38, 16  ;;  %v516_v42 = vshll.u32 %v496_v38, 16  ;;  %v2983_v46 = vsel %vm2958_vm6, 0, %v748_v39  ;;  %v2993_v48 = vsel %vm2958_vm6, 0, %v980_v44  ;;  %460 = vst.msk [vmem:[#allocation2 + $0x80] sm:$0xff] %vm444_vm0, %v2820_v36 }
  0x22   : > { %1241 = vrot.lane.b32.xlu1 %v711_v33, %s2848_s30  ;;  %1479 = vrot.lane.b32.xlu0 %v2932_v14, %s2847_s29  ;;  %v1160_v62 = vsel %vm2951_vm5, %v1114_v59, 0  ;;  %v3023_v2 = vsel %vm2958_vm6, 0, %v769_v63  ;;  %v991_v6 = vrot.slane %v989_v4, 7  ;;  %v992_v7 = vshll.u32 %v954_v0, 16 }
  0x23   : > { %v515_v45 = vrot.slane %v513_v41, 7  ;;  %v659_v49 = vrot.slane %v516_v42, 1  ;;  %v937_v8 = vsel %vm2951_vm5, %v893_v5, 0  ;;  %v781_v17 = vshll.u32 %v731_v12, 16 }
  0x24   : > { %v994_v9 = vor.u32 %v992_v7, %v991_v6  ;;  %v1117_v11 = vrot.slane %v992_v7, 1  ;;  %v1003_v24 = vshrl.u32 %v956_v20, 16  ;;  %v1006_v28 = vshll.u32 %v956_v20, 16 }
  0x25   : > { %v2995_v50 = vor.u32 %v516_v42, %v515_v45  ;;  %v660_v52 = vor.u32 %v659_v49, %v513_v41  ;;  %v896_v23 = vrot.slane %v781_v17, 1  ;;  %v792_v37 = vshrl.u32 %v733_v34, 16  ;;  %v2689_v42 = vld [vmem:[%s2914_s26 + $0x78] sm:$0xff]  }
  0x26   : > { %1289 = vrot.lane.b32.xlu1 %v2971_v35, %s2849_s9  ;;  %1191 = vrot.lane.b32.xlu0 %v496_v38, %s2846_s28  ;;  %v3039_v10 = vsel %vm2958_vm6, 0, %v994_v9  ;;  %v1118_v15 = vor.u32 %v1117_v11, %v989_v4  ;;  %v1005_v27 = vrot.slane %v1003_v24, 7  ;;  %v795_v40 = vshll.u32 %v733_v34, 16 }
  0x27   : > { %v710_v57 = vsel %vm2951_vm5, %v660_v52, 0  ;;  %v794_v39 = vrot.slane %v792_v37, 7  ;;  %v2608_v44 = vunpack.c.h.bf16 %v2689_v42  ;;  %v1017_v55 = vshrl.u32 %v3092_v47, 16 }
  0x28   : > { %v1162_v18 = vsel %vm2951_vm5, %v1118_v15, 0  ;;  %v1008_v30 = vor.u32 %v1006_v28, %v1005_v27  ;;  %v1020_v58 = vshll.u32 %v3092_v47, 16  ;;  %v806_v5 = vshrl.u32 %v3123_v3, 16 }
  0x29   : > { %v797_v45 = vor.u32 %v795_v40, %v794_v39  ;;  %v490_v51 = vmul.f32 0.0, %v2608_v44  ;;  %v809_v11 = vshll.u32 %v3123_v3, 16 }
  0x2a   : > { %1385 = vrot.lane.b32.xlu1 %v935_v43, %s2850_s12  ;;  %1287 = vrot.lane.b32.xlu0 %v2983_v46, %s2849_s9  ;;  %v3075_v31 = vsel %vm2958_vm6, 0, %v1008_v30  ;;  %v1125_v1 = vrot.slane %v1020_v58, 1  ;;  %v808_v9 = vrot.slane %v806_v5, 7 }
  0x2b   : > { %v3098_v53 = vsel %vm2958_vm6, 0, %v797_v45 }
  0x2c   : > { %v1126_v7 = vor.u32 %v1125_v1, %v1017_v55  ;;  %v811_v15 = vor.u32 %v809_v11, %v808_v9 }
  0x2e   : > { %1433 = vrot.lane.b32.xlu1 %v2993_v48, %s2851_s15  ;;  %1383 = vrot.lane.b32.xlu0 %v711_v33, %s2850_s12  ;;  %v1121_v33 = vrot.slane %v1006_v28, 1  ;;  %v1166_v13 = vsel %vm2951_vm5, %v1126_v7, 0 }
  0x30   : > { %v1122_v38 = vor.u32 %v1121_v33, %v1003_v24  ;;  %v643_v33 = vsel %vm2958_vm6, 0, %v2995_v50 }
  0x32   : > { %1195 = vrot.lane.b32.xlu1 %v2932_v14, %s2846_s28  ;;  %1431 = vrot.lane.b32.xlu0 %v2971_v35, %s2851_s15  ;;  %v778_v14 = vshrl.u32 %v731_v12, 16  ;;  %v1164_v41 = vsel %vm2951_vm5, %v1122_v38, 0 }
  0x34   : > { %v780_v16 = vrot.slane %v778_v14, 7  ;;  %v897_v26 = vor.u32 %v896_v23, %v778_v14 }
  0x36   : > { %1239 = vrot.lane.b32.xlu1 %v710_v57, %s2848_s30  ;;  %1527 = vrot.lane.b32.xlu0 %v935_v43, %s2852_s16  ;;  %v783_v19 = vor.u32 %v781_v17, %v780_v16  ;;  %v939_v29 = vsel %vm2951_vm5, %v897_v26, 0  ;;  %v1019_v57 = vrot.slane %v1017_v55, 7  ;;  %v3137_v17 = vld [vmem:[#allocation2 + $0x58] sm:$0xff] }
  0x37   : > { %v1034_v28 = vshll.u32 %v3137_v17, 16 }
  0x38   : > { %v3060_v22 = vsel %vm2958_vm6, 0, %v783_v19  ;;  %v1022_v60 = vor.u32 %v1020_v58, %v1019_v57  ;;  %v3143_v19 = vsel %vm2958_vm6, 0, %v811_v15  ;;  %v3208_v15 = vld [vmem:[#allocation2 + $0x68] sm:$0xff] }
  0x3a   : > { %1197 = vrot.lane.b32.xlu1 %v2942_v21, %s2846_s28  ;;  %1529 = vrot.lane.b32.xlu0 %v1160_v62, %s2852_s16  ;;  %v3115_v61 = vsel %vm2958_vm6, 0, %v1022_v60 }
  0x3e   : > { %1245 = vrot.lane.b32.xlu1 %v1160_v62, %s2848_s30  ;;  %1243 = vrot.lane.b32.xlu0 %v935_v43, %s2848_s30  ;;  %v2607_v43 = vunpack.c.l.bf16 %v2689_v42 }
  0x40   : > { %v489_v49 = vmul.f32 0.0, %v2607_v43 }
  0x42   : > { %1293 = vrot.lane.b32.xlu1 %v3023_v2, %s2849_s9  ;;  %1291 = vrot.lane.b32.xlu0 %v2993_v48, %s2849_s9  ;;  %v493_v52 = vpack.c.bf16 %v490_v51, %v489_v49 }
  0x44   : > { %495 = vst.msk [vmem:[#allocation2 + $0x88] sm:$0xff] %vm444_vm0, %v493_v52 }
  0x46   : > { %1341 = vrot.lane.b32.xlu1 %v729_v54, %s2845_s27  ;;  %1339 = vrot.lane.b32.xlu0 %v2942_v21, %s2845_s27  ;;  %v2819_v21 = vld [vmem:[%s2914_s26 + $0x70] sm:$0xff]  }
  0x47   : > { %459 = vst.msk [vmem:[#allocation2 + $0x78] sm:$0xff] %vm444_vm0, %v2819_v21  ;;  %v1031_v21 = vshrl.u32 %v3137_v17, 16 }
  0x49   : > { %v1033_v27 = vrot.slane %v1031_v21, 7 }
  0x4a   : > { %1389 = vrot.lane.b32.xlu1 %v937_v8, %s2850_s12  ;;  %1387 = vrot.lane.b32.xlu0 %v1160_v62, %s2850_s12 }
  0x4e   : > { %1437 = vrot.lane.b32.xlu1 %v3039_v10, %s2851_s15  ;;  %1435 = vrot.lane.b32.xlu0 %v3023_v2, %s2851_s15 }
  0x52   : > { %1485 = vrot.lane.b32.xlu1 %v954_v0, %s2847_s29  ;;  %1483 = vrot.lane.b32.xlu0 %v729_v54, %s2847_s29 }
  0x56   : > { %1199 = vrot.lane.b32.xlu1 %v729_v54, %s2846_s28  ;;  %1531 = vrot.lane.b32.xlu0 %v937_v8, %s2852_s16  ;;  %v900_v54 = vrot.slane %v795_v40, 1 }
  0x58   : > { %v901_v56 = vor.u32 %v900_v54, %v792_v37 }
  0x5a   : > { %1201 = vrot.lane.b32.xlu1 %v954_v0, %s2846_s28  ;;  %1533 = vrot.lane.b32.xlu0 %v1162_v18, %s2852_s16  ;;  %v941_v59 = vsel %vm2951_vm5, %v901_v56, 0 }
  0x5e   : > { %1249 = vrot.lane.b32.xlu1 %v1162_v18, %s2848_s30  ;;  %1247 = vrot.lane.b32.xlu0 %v937_v8, %s2848_s30 }
  0x62   : > { %1297 = vrot.lane.b32.xlu1 %v3060_v22, %s2849_s9  ;;  %1295 = vrot.lane.b32.xlu0 %v3039_v10, %s2849_s9 }
  0x66   : > { %1345 = vrot.lane.b32.xlu1 %v731_v12, %s2845_s27  ;;  %1343 = vrot.lane.b32.xlu0 %v954_v0, %s2845_s27 }
  0x6a   : > { %1393 = vrot.lane.b32.xlu1 %v939_v29, %s2850_s12  ;;  %1391 = vrot.lane.b32.xlu0 %v1162_v18, %s2850_s12 }
  0x6e   : > { %1441 = vrot.lane.b32.xlu1 %v3075_v31, %s2851_s15  ;;  %1439 = vrot.lane.b32.xlu0 %v3060_v22, %s2851_s15 }
  0x72   : > { %1489 = vrot.lane.b32.xlu1 %v956_v20, %s2847_s29  ;;  %1487 = vrot.lane.b32.xlu0 %v731_v12, %s2847_s29 }
  0x76   : > { %1203 = vrot.lane.b32.xlu1 %v731_v12, %s2846_s28  ;;  %1535 = vrot.lane.b32.xlu0 %v939_v29, %s2852_s16 }
  0x7a   : > { %1205 = vrot.lane.b32.xlu1 %v956_v20, %s2846_s28  ;;  %1537 = vrot.lane.b32.xlu0 %v1164_v41, %s2852_s16 }
  0x7e   : > { %1253 = vrot.lane.b32.xlu1 %v1164_v41, %s2848_s30  ;;  %1251 = vrot.lane.b32.xlu0 %v939_v29, %s2848_s30 }
  0x82   : > { %1301 = vrot.lane.b32.xlu1 %v3098_v53, %s2849_s9  ;;  %1299 = vrot.lane.b32.xlu0 %v3075_v31, %s2849_s9 }
  0x86   : > { %1349 = vrot.lane.b32.xlu1 %v733_v34, %s2845_s27  ;;  %1347 = vrot.lane.b32.xlu0 %v956_v20, %s2845_s27  ;;  %v904_v20 = vrot.slane %v809_v11, 1 }
  0x88   : > { %v905_v26 = vor.u32 %v904_v20, %v806_v5  ;;  %v1045_v20 = vshrl.u32 %v3208_v15, 16 }
  0x8a   : > { %1397 = vrot.lane.b32.xlu1 %v941_v59, %s2850_s12  ;;  %1395 = vrot.lane.b32.xlu0 %v1164_v41, %s2850_s12  ;;  %v943_v38 = vsel %vm2951_vm5, %v905_v26, 0 }
  0x8c   : > { %v1338_v62 = vpop.permute.xlu1 %1337  ;;  %v1194_v63 = vpop.permute.xlu0 %1193 }
  0x8d   : > { %v1564_v30 = vsel %vm444_vm0, %v2983_v46, %v1194_v63  ;;  %v1036_v46 = vor.u32 %v1034_v28, %v1033_v27  ;;  %v3191_v63 = vld [vmem:[#allocation2 + $0x60] sm:$0xff]  ;;  %v1047_v27 = vrot.slane %v1045_v20, 7 }
  0x8e   : > { %1445 = vrot.lane.b32.xlu1 %v3115_v61, %s2851_s15  ;;  %1443 = vrot.lane.b32.xlu0 %v3098_v53, %s2851_s15 }
  0x90   : > { %v3121_v0 = vpop.permute.xlu1 %1481  ;;  %v1336_v4 = vpop.permute.xlu0 %1335 }
  0x92   : > { %1493 = vrot.lane.b32.xlu1 %v3092_v47, %s2847_s29  ;;  %1491 = vrot.lane.b32.xlu0 %v733_v34, %s2847_s29 }
  0x94   : > { %v1242_v6 = vpop.permute.xlu1 %1241  ;;  %v1480_v8 = vpop.permute.xlu0 %1479 }
  0x95   : > { %v1611_v36 = vsel %vm1607_vm8, %v1564_v30, %v1242_v6 }
  0x96   : > { %1207 = vrot.lane.b32.xlu1 %v733_v34, %s2846_s28  ;;  %1539 = vrot.lane.b32.xlu0 %v941_v59, %s2852_s16 }
  0x98   : > { %v1290_v12 = vpop.permute.xlu1 %1289  ;;  %v1192_v14 = vpop.permute.xlu0 %1191 }
  0x99   : > { %v1644_v37 = vsel %vm1640_vm9, %v1611_v36, %v1290_v12  ;;  %v1561_v39 = vsel %vm444_vm0, %v643_v33, %v1192_v14 }
  0x9a   : > { %1209 = vrot.lane.b32.xlu1 %v3092_v47, %s2846_s28  ;;  %1541 = vrot.lane.b32.xlu0 %v1166_v13, %s2852_s16  ;;  %v1677_v42 = vsel %vm1673_vm10, %v1644_v37, %v1338_v62  ;;  %v1129_v62 = vrot.slane %v1034_v28, 1  ;;  %v1048_v28 = vshll.u32 %v3208_v15, 16 }
  0x9c   : > { %v1386_v16 = vpop.permute.xlu1 %1385  ;;  %v1288_v18 = vpop.permute.xlu0 %1287  ;;  %v1130_v5 = vor.u32 %v1129_v62, %v1031_v21 }
  0x9d   : > { %v1710_v44 = vsel %vm1706_vm11, %v1677_v42, %v1386_v16 }
  0x9e   : > { %1257 = vrot.lane.b32.xlu1 %v1166_v13, %s2848_s30  ;;  %1255 = vrot.lane.b32.xlu0 %v941_v59, %s2848_s30  ;;  %v1168_v11 = vsel %vm2951_vm5, %v1130_v5, 0 }
  0xa0   : > { %v1434_v23 = vpop.permute.xlu1 %1433  ;;  %v1384_v24 = vpop.permute.xlu0 %1383 }
  0xa1   : > { %v1743_v49 = vsel %vm1739_vm12, %v1710_v44, %v1434_v23 }
  0xa2   : > { %1305 = vrot.lane.b32.xlu1 %v3143_v19, %s2849_s9  ;;  %1303 = vrot.lane.b32.xlu0 %v3115_v61, %s2849_s9  ;;  %v1776_v57 = vsel %vm1772_vm13, %v1743_v49, %v3121_v0  ;;  %v820_v0 = vshrl.u32 %v3191_v63, 16 }
  0xa4   : > { %v3151_v29 = vpop.permute.xlu1 %1195  ;;  %v1432_v34 = vpop.permute.xlu0 %1431  ;;  %v822_v7 = vrot.slane %v820_v0, 7 }
  0xa6   : > { %1353 = vrot.lane.b32.xlu1 %v3123_v3, %s2845_s27  ;;  %1351 = vrot.lane.b32.xlu0 %v3092_v47, %s2845_s27  ;;  %v3176_v47 = vsel %vm2958_vm6, 0, %v1036_v46  ;;  %v1050_v46 = vor.u32 %v1048_v28, %v1047_v27 }
  0xa8   : > { %v1240_v50 = vpop.permute.xlu1 %1239  ;;  %v1528_v40 = vpop.permute.xlu0 %1527 }
  0xa9   : > { %v1609_v41 = vsel %vm1607_vm8, %v1561_v39, %v1240_v50 }
  0xaa   : > { %v1642_v43 = vsel %vm1640_vm9, %v1609_v41, %v1288_v18  ;;  %1401 = vrot.lane.b32.xlu1 %v943_v38, %s2850_s12  ;;  %1399 = vrot.lane.b32.xlu0 %v1166_v13, %s2850_s12 }
  0xab   : > { %v1675_v45 = vsel %vm1673_vm10, %v1642_v43, %v1336_v4 }
  0xac   : > { %v1198_v51 = vpop.permute.xlu1 %1197  ;;  %v1708_v52 = vsel %vm1706_vm11, %v1675_v45, %v1384_v24  ;;  %v1530_v54 = vpop.permute.xlu0 %1529  ;;  %v1567_v24 = vsel %vm444_vm0, %v2971_v35, %v3151_v29  ;;  %v3249_v45 = vsel %vm2958_vm6, 0, %v1050_v46 }
  0xad   : > { %v1741_v55 = vsel %vm1739_vm12, %v1708_v52, %v1432_v34  ;;  %v1809_v59 = vsel %vm1805_vm14, %v1776_v57, %v1530_v54  ;;  %v1570_v35 = vsel %vm444_vm0, %v2993_v48, %v1198_v51  ;;  %v1133_v57 = vrot.slane %v1048_v28, 1 }
  0xae   : > { %1449 = vrot.lane.b32.xlu1 %v3176_v47, %s2851_s15  ;;  %v1774_v56 = vsel %vm1772_vm13, %v1741_v55, %v1480_v8  ;;  %1447 = vrot.lane.b32.xlu0 %v3143_v19, %s2851_s15  ;;  %v823_v8 = vshll.u32 %v3191_v63, 16 }
  0xaf   : > { %v1807_v58 = vsel %vm1805_vm14, %v1774_v56, %v1528_v40 }
  0xb0   : > { %2730 = vmatprep.mubr.msk.bf16.mxu0 %vm1858_vm15, %v1807_v58  ;;  %v1246_v60 = vpop.permute.xlu1 %1245  ;;  %v1244_v1 = vpop.permute.xlu0 %1243  ;;  %v825_v13 = vor.u32 %v823_v8, %v822_v7  ;;  %v908_v18 = vrot.slane %v823_v8, 1  ;;  %v3259_v58 = vld [vmem:[#allocation2 + $0x70] sm:$0xff] }
  0xb1   : > { %2731 = vmatmul.mubr.msk.bf16.vlgmr.msra.gmra.mrb[0].mxu0 %vm1858_vm15, %v1809_v59  ;;  %v1613_v30 = vsel %vm1607_vm8, %v1567_v24, %v1244_v1  ;;  %v1615_v39 = vsel %vm1607_vm8, %v1570_v35, %v1246_v60  ;;  %v834_v60 = vshrl.u32 %v3259_v58, 16  ;;  %v1134_v1 = vor.u32 %v1133_v57, %v1045_v20 }
  0xb2   : > { %1497 = vrot.lane.b32.xlu1 %v3137_v17, %s2847_s29  ;;  %1495 = vrot.lane.b32.xlu0 %v3123_v3, %s2847_s29  ;;  %v3214_v16 = vsel %vm2958_vm6, 0, %v825_v13  ;;  %v909_v26 = vor.u32 %v908_v18, %v820_v0  ;;  %v837_v5 = vshll.u32 %v3259_v58, 16 }
  0xb3   : > { %v1170_v7 = vsel %vm2951_vm5, %v1134_v1, 0 }
  0xb4   : > { %v1294_v4 = vpop.permute.xlu1 %1293  ;;  %v1292_v6 = vpop.permute.xlu0 %1291 }
  0xb5   : > { %v1646_v34 = vsel %vm1640_vm9, %v1613_v30, %v1292_v6  ;;  %v1648_v41 = vsel %vm1640_vm9, %v1615_v39, %v1294_v4  ;;  %v836_v4 = vrot.slane %v834_v60, 7 }
  0xb6   : > { %1211 = vrot.lane.b32.xlu1 %v3123_v3, %s2846_s28  ;;  %1543 = vrot.lane.b32.xlu0 %v943_v38, %s2852_s16 }
  0xb8   : > { %v1342_v9 = vpop.permute.xlu1 %1341  ;;  %v1340_v12 = vpop.permute.xlu0 %1339 }
  0xb9   : > { %v1679_v37 = vsel %vm1673_vm10, %v1646_v34, %v1340_v12  ;;  %v1681_v48 = vsel %vm1673_vm10, %v1648_v41, %v1342_v9  ;;  %v839_v9 = vor.u32 %v837_v5, %v836_v4  ;;  %v3275_v12 = vld [vmem:[#allocation2 + $0x78] sm:$0xff] }
  0xba   : > { %1213 = vrot.lane.b32.xlu1 %v3137_v17, %s2846_s28  ;;  %1545 = vrot.lane.b32.xlu0 %v1168_v11, %s2852_s16 }
  0xbb   : > { %v3281_v13 = vsel %vm2958_vm6, 0, %v839_v9 }
  0xbc   : > { %v1390_v14 = vpop.permute.xlu1 %1389  ;;  %v1388_v3 = vpop.permute.xlu0 %1387 }
  0xbd   : > { %v1712_v29 = vsel %vm1706_vm11, %v1679_v37, %v1388_v3  ;;  %v1059_v3 = vshrl.u32 %v3275_v12, 16 }
  0xbe   : > { %1261 = vrot.lane.b32.xlu1 %v1168_v11, %s2848_s30  ;;  %1259 = vrot.lane.b32.xlu0 %v943_v38, %s2848_s30  ;;  %v945_v38 = vsel %vm2951_vm5, %v909_v26, 0  ;;  %v1062_v26 = vshll.u32 %v3275_v12, 16 }
  0xbf   : > { %v1061_v24 = vrot.slane %v1059_v3, 7 }
  0xc0   : > { %v1438_v21 = vpop.permute.xlu1 %1437  ;;  %v1436_v23 = vpop.permute.xlu0 %1435 }
  0xc1   : > { %v1745_v50 = vsel %vm1739_vm12, %v1712_v29, %v1436_v23  ;;  %v1064_v35 = vor.u32 %v1062_v26, %v1061_v24 }
  0xc2   : > { %1309 = vrot.lane.b32.xlu1 %v3214_v16, %s2849_s9  ;;  %1307 = vrot.lane.b32.xlu0 %v3176_v47, %s2849_s9 }
  0xc4   : > { %v1486_v33 = vpop.permute.xlu1 %1485  ;;  %v1484_v36 = vpop.permute.xlu0 %1483 }
  0xc5   : > { %v1778_v42 = vsel %vm1772_vm13, %v1745_v50, %v1484_v36 }
  0xc6   : > { %1357 = vrot.lane.b32.xlu1 %v3191_v63, %s2845_s27  ;;  %1355 = vrot.lane.b32.xlu0 %v3137_v17, %s2845_s27  ;;  %v1714_v17 = vsel %vm1706_vm11, %v1681_v48, %v1390_v14  ;;  %v912_v14 = vrot.slane %v837_v5, 1 }
  0xc7   : > { %v1747_v49 = vsel %vm1739_vm12, %v1714_v17, %v1438_v21 }
  0xc8   : > { %v1200_v40 = vpop.permute.xlu1 %1199  ;;  %v1532_v43 = vpop.permute.xlu0 %1531  ;;  %v1780_v52 = vsel %vm1772_vm13, %v1747_v49, %v1486_v33  ;;  %v913_v23 = vor.u32 %v912_v14, %v834_v60 }
  0xc9   : > { %v1811_v44 = vsel %vm1805_vm14, %v1778_v42, %v1532_v43  ;;  %v1573_v21 = vsel %vm444_vm0, %v3023_v2, %v1200_v40  ;;  %v3315_v42 = vsel %vm2958_vm6, 0, %v1064_v35 }
  0xca   : > { %1405 = vrot.lane.b32.xlu1 %v945_v38, %s2850_s12  ;;  %1403 = vrot.lane.b32.xlu0 %v1168_v11, %s2850_s12  ;;  %v947_v37 = vsel %vm2951_vm5, %v913_v23, 0 }
  0xcb   : > { %2734 = vmatprep.mubr.msk.bf16.mxu0 %vm1858_vm15, %v1811_v44 }
  0xcc   : > { %v1202_v51 = vpop.permute.xlu1 %1201  ;;  %v1534_v54 = vpop.permute.xlu0 %1533 }
  0xcd   : > { %v1813_v55 = vsel %vm1805_vm14, %v1780_v52, %v1534_v54  ;;  %v1576_v2 = vsel %vm444_vm0, %v3039_v10, %v1202_v51  ;;  %v1137_v52 = vrot.slane %v1062_v26, 1  ;;  %v3325_v54 = vld [vmem:[#allocation2 + $0x80] sm:$0xff] }
  0xce   : > { %1453 = vrot.lane.b32.xlu1 %v3249_v45, %s2851_s15  ;;  %1451 = vrot.lane.b32.xlu0 %v3214_v16, %s2851_s15  ;;  %v851_v1 = vshll.u32 %v3325_v54, 16 }
  0xcf   : > { %2735 = vmatmul.mubr.msk.bf16.gmra.mrb[4].mxu0 %vm1858_vm15, %v1813_v55 }
  0xd0   : > { %v1250_v56 = vpop.permute.xlu1 %1249  ;;  %v1248_v59 = vpop.permute.xlu0 %1247 }
  0xd1   : > { %v1617_v27 = vsel %vm1607_vm8, %v1573_v21, %v1248_v59  ;;  %v1619_v29 = vsel %vm1607_vm8, %v1576_v2, %v1250_v56  ;;  %v848_v56 = vshrl.u32 %v3325_v54, 16  ;;  %v1138_v59 = vor.u32 %v1137_v52, %v1059_v3 }
  0xd2   : > { %1501 = vrot.lane.b32.xlu1 %v3208_v15, %s2847_s29  ;;  %1499 = vrot.lane.b32.xlu0 %v3191_v63, %s2847_s29 }
  0xd3   : > { %v1172_v4 = vsel %vm2951_vm5, %v1138_v59, 0 }
  0xd4   : > { %v1298_v62 = vpop.permute.xlu1 %1297  ;;  %v1296_v0 = vpop.permute.xlu0 %1295 }
  0xd5   : > { %v1650_v30 = vsel %vm1640_vm9, %v1617_v27, %v1296_v0  ;;  %v1652_v39 = vsel %vm1640_vm9, %v1619_v29, %v1298_v62  ;;  %v850_v62 = vrot.slane %v848_v56, 7 }
  0xd6   : > { %1215 = vrot.lane.b32.xlu1 %v3191_v63, %s2846_s28  ;;  %1547 = vrot.lane.b32.xlu0 %v945_v38, %s2852_s16 }
  0xd8   : > { %v1346_v6 = vpop.permute.xlu1 %1345  ;;  %v1344_v8 = vpop.permute.xlu0 %1343 }
  0xd9   : > { %v1683_v34 = vsel %vm1673_vm10, %v1650_v30, %v1344_v8  ;;  %v1685_v10 = vsel %vm1673_vm10, %v1652_v39, %v1346_v6  ;;  %v853_v6 = vor.u32 %v851_v1, %v850_v62  ;;  %v966_v8 = vld [vmem:[#allocation2 + $0x88] sm:$0xff] }
  0xda   : > { %1217 = vrot.lane.b32.xlu1 %v3208_v15, %s2846_s28  ;;  %1549 = vrot.lane.b32.xlu0 %v1170_v7, %s2852_s16  ;;  %v1076_v23 = vshll.u32 %v966_v8, 16 }
  0xdc   : > { %v1394_v11 = vpop.permute.xlu1 %1393  ;;  %v1392_v63 = vpop.permute.xlu0 %1391 }
  0xdd   : > { %v1716_v36 = vsel %vm1706_vm11, %v1683_v34, %v1392_v63  ;;  %v1073_v63 = vshrl.u32 %v966_v8, 16 }
  0xde   : > { %1265 = vrot.lane.b32.xlu1 %v1170_v7, %s2848_s30  ;;  %1263 = vrot.lane.b32.xlu0 %v945_v38, %s2848_s30 }
  0xdf   : > { %v1075_v21 = vrot.slane %v1073_v63, 7 }
  0xe0   : > { %v1442_v18 = vpop.permute.xlu1 %1441  ;;  %v1440_v20 = vpop.permute.xlu0 %1439 }
  0xe1   : > { %v1749_v38 = vsel %vm1739_vm12, %v1716_v36, %v1440_v20  ;;  %v1078_v2 = vor.u32 %v1076_v23, %v1075_v21 }
  0xe2   : > { %1313 = vrot.lane.b32.xlu1 %v3281_v13, %s2849_s9  ;;  %1311 = vrot.lane.b32.xlu0 %v3249_v45, %s2849_s9 }
  0xe4   : > { %v1490_v28 = vpop.permute.xlu1 %1489  ;;  %v1488_v33 = vpop.permute.xlu0 %1487 }
  0xe5   : > { %v1782_v50 = vsel %vm1772_vm13, %v1749_v38, %v1488_v33 }
  0xe6   : > { %1361 = vrot.lane.b32.xlu1 %v3259_v58, %s2845_s27  ;;  %1359 = vrot.lane.b32.xlu0 %v3208_v15, %s2845_s27  ;;  %v1718_v15 = vsel %vm1706_vm11, %v1685_v10, %v1394_v11  ;;  %v916_v11 = vrot.slane %v851_v1, 1 }
  0xe7   : > { %v1751_v43 = vsel %vm1739_vm12, %v1718_v15, %v1442_v18 }
  0xe8   : > { %v1204_v46 = vpop.permute.xlu1 %1203  ;;  %v1536_v40 = vpop.permute.xlu0 %1535  ;;  %v1784_v44 = vsel %vm1772_vm13, %v1751_v43, %v1490_v28  ;;  %v917_v20 = vor.u32 %v916_v11, %v848_v56 }
  0xe9   : > { %v1815_v41 = vsel %vm1805_vm14, %v1782_v50, %v1536_v40  ;;  %v1579_v18 = vsel %vm444_vm0, %v3060_v22, %v1204_v46  ;;  %v1110_v50 = vsel %vm2958_vm6, 0, %v1078_v2  ;;  %v1141_v40 = vrot.slane %v1076_v23, 1 }
  0xea   : > { %1409 = vrot.lane.b32.xlu1 %v947_v37, %s2850_s12  ;;  %1407 = vrot.lane.b32.xlu0 %v1170_v7, %s2850_s12  ;;  %v949_v34 = vsel %vm2951_vm5, %v917_v20, 0 }
  0xeb   : > { %2738 = vmatprep.mubr.msk.bf16.mxu0 %vm1858_vm15, %v1815_v41 }
  0xec   : > { %v1206_v48 = vpop.permute.xlu1 %1205  ;;  %v1538_v17 = vpop.permute.xlu0 %1537 }
  0xed   : > { %v1817_v49 = vsel %vm1805_vm14, %v1784_v44, %v1538_v17  ;;  %v1582_v22 = vsel %vm444_vm0, %v3075_v31, %v1206_v48  ;;  %v1142_v44 = vor.u32 %v1141_v40, %v1073_v63 }
  0xee   : > { %1457 = vrot.lane.b32.xlu1 %v3315_v42, %s2851_s15  ;;  %1455 = vrot.lane.b32.xlu0 %v3281_v13, %s2851_s15 }
  0xef   : > { %2739 = vmatmul.mubr.msk.bf16.gmra.mrb[8].mxu0 %vm1858_vm15, %v1817_v49  ;;  %v1174_v32 = vsel %vm2951_vm5, %v1142_v44, 0 }
  0xf0   : > { %v1254_v51 = vpop.permute.xlu1 %1253  ;;  %v1252_v55 = vpop.permute.xlu0 %1251 }
  0xf1   : > { %v1621_v24 = vsel %vm1607_vm8, %v1579_v18, %v1252_v55  ;;  %v1623_v36 = vsel %vm1607_vm8, %v1582_v22, %v1254_v51 }
  0xf2   : > { %1505 = vrot.lane.b32.xlu1 %v3275_v12, %s2847_s29  ;;  %1503 = vrot.lane.b32.xlu0 %v3259_v58, %s2847_s29 }
  0xf4   : > { %v1302_v57 = vpop.permute.xlu1 %1301  ;;  %v1300_v60 = vpop.permute.xlu0 %1299 }
  0xf5   : > { %v1654_v27 = vsel %vm1640_vm9, %v1621_v24, %v1300_v60  ;;  %v1656_v29 = vsel %vm1640_vm9, %v1623_v36, %v1302_v57 }
  0xf6   : > { %1219 = vrot.lane.b32.xlu1 %v3259_v58, %s2846_s28  ;;  %1551 = vrot.lane.b32.xlu0 %v947_v37, %s2852_s16  ;;  %v885_v58 = vsel %vm2958_vm6, 0, %v853_v6 }
  0xf8   : > { %v1350_v0 = vpop.permute.xlu1 %1349  ;;  %v1348_v5 = vpop.permute.xlu0 %1347 }
  0xf9   : > { %v1687_v30 = vsel %vm1673_vm10, %v1654_v27, %v1348_v5  ;;  %v1689_v31 = vsel %vm1673_vm10, %v1656_v29, %v1350_v0 }
  0xfa   : > { %1221 = vrot.lane.b32.xlu1 %v3275_v12, %s2846_s28  ;;  %1553 = vrot.lane.b32.xlu0 %v1172_v4, %s2852_s16 }
  0xfc   : > { %v1398_v7 = vpop.permute.xlu1 %1397  ;;  %v1396_v9 = vpop.permute.xlu0 %1395 }
  0xfd   : > { %v1720_v33 = vsel %vm1706_vm11, %v1687_v30, %v1396_v9 }
  0xfe   : > { %1269 = vrot.lane.b32.xlu1 %v1172_v4, %s2848_s30  ;;  %1267 = vrot.lane.b32.xlu0 %v947_v37, %s2848_s30 }
 0x100   : > { %v1446_v14 = vpop.permute.xlu1 %1445  ;;  %v1444_v3 = vpop.permute.xlu0 %1443 }
 0x101   : > { %v1753_v37 = vsel %vm1739_vm12, %v1720_v33, %v1444_v3 }
 0x102   : > { %1317 = vrot.lane.b32.xlu1 %v885_v58, %s2849_s9  ;;  %1315 = vrot.lane.b32.xlu0 %v3315_v42, %s2849_s9 }
 0x104   : > { %v1494_v26 = vpop.permute.xlu1 %1493  ;;  %v1492_v28 = vpop.permute.xlu0 %1491 }
 0x105   : > { %v1786_v38 = vsel %vm1772_vm13, %v1753_v37, %v1492_v28 }
 0x106   : > { %1365 = vrot.lane.b32.xlu1 %v3325_v54, %s2845_s27  ;;  %1363 = vrot.lane.b32.xlu0 %v3275_v12, %s2845_s27  ;;  %v1722_v12 = vsel %vm1706_vm11, %v1689_v31, %v1398_v7  ;;  %s309_s27 = scalar_lea.vmem %s3513_s6, %s3523_s21 }
 0x107   : > { %v1755_v10 = vsel %vm1739_vm12, %v1722_v12, %v1446_v14 }
 0x108   : > { %v1208_v35 = vpop.permute.xlu1 %1207  ;;  %v1540_v46 = vpop.permute.xlu0 %1539  ;;  %v1788_v15 = vsel %vm1772_vm13, %v1755_v10, %v1494_v26 }
 0x109   : > { %v1819_v39 = vsel %vm1805_vm14, %v1786_v38, %v1540_v46  ;;  %v1585_v1 = vsel %vm444_vm0, %v3098_v53, %v1208_v35 }
 0x10a   : > { %1413 = vrot.lane.b32.xlu1 %v949_v34, %s2850_s12  ;;  %1411 = vrot.lane.b32.xlu0 %v1172_v4, %s2850_s12 }
 0x10b   : > { %2742 = vmatprep.mubr.msk.bf16.mxu0 %vm1858_vm15, %v1819_v39 }
 0x10c   : > { %v1210_v41 = vpop.permute.xlu1 %1209  ;;  %v1542_v43 = vpop.permute.xlu0 %1541 }
 0x10d   : > { %v1821_v48 = vsel %vm1805_vm14, %v1788_v15, %v1542_v43  ;;  %v1588_v6 = vsel %vm444_vm0, %v3115_v61, %v1210_v41 }
 0x10e   : > { %1461 = vrot.lane.b32.xlu1 %v1110_v50, %s2851_s15  ;;  %1459 = vrot.lane.b32.xlu0 %v885_v58, %s2851_s15 }
 0x10f   : > { %2743 = vmatmul.mubr.msk.bf16.gmra.mrb[12].mxu0 %vm1858_vm15, %v1821_v48 }
 0x110   : > { %v1258_v17 = vpop.permute.xlu1 %1257  ;;  %v1256_v49 = vpop.permute.xlu0 %1255 }
 0x112   : > { %1509 = vrot.lane.b32.xlu1 %v966_v8, %s2847_s29  ;;  %1507 = vrot.lane.b32.xlu0 %v3325_v54, %s2847_s29  ;;  %v1625_v54 = vsel %vm1607_vm8, %v1585_v1, %v1256_v49  ;;  %v1627_v8 = vsel %vm1607_vm8, %v1588_v6, %v1258_v17 }
 0x114   : > { %v1306_v51 = vpop.permute.xlu1 %1305  ;;  %v1304_v52 = vpop.permute.xlu0 %1303 }
 0x115   : > { %v1658_v25 = vsel %vm1640_vm9, %v1625_v54, %v1304_v52  ;;  %v1660_v53 = vsel %vm1640_vm9, %v1627_v8, %v1306_v51 }
 0x116   : > { %1557 = vrot.lane.b32.xlu1 %v1174_v32, %s2852_s16  ;;  %1555 = vrot.lane.b32.xlu0 %v949_v34, %s2852_s16 }
 0x118   : > { %v1354_v55 = vpop.permute.xlu1 %1353  ;;  %v1352_v56 = vpop.permute.xlu0 %1351 }
 0x119   : > { %v1691_v5 = vsel %vm1673_vm10, %v1658_v25, %v1352_v56  ;;  %v1693_v14 = vsel %vm1673_vm10, %v1660_v53, %v1354_v55 }
 0x11c   : > { %v1402_v57 = vpop.permute.xlu1 %1401  ;;  %v1400_v59 = vpop.permute.xlu0 %1399 }
 0x11d   : > { %v1724_v7 = vsel %vm1706_vm11, %v1691_v5, %v1400_v59  ;;  %v1726_v18 = vsel %vm1706_vm11, %v1693_v14, %v1402_v57 }
 0x120   : > { %v1450_v60 = vpop.permute.xlu1 %1449  ;;  %v1448_v62 = vpop.permute.xlu0 %1447 }
 0x121   : > { %v1757_v9 = vsel %vm1739_vm12, %v1724_v7, %v1448_v62  ;;  %v1759_v61 = vsel %vm1739_vm12, %v1726_v18, %v1450_v60 }
 0x124   : > { %v1498_v0 = vpop.permute.xlu1 %1497  ;;  %v1496_v4 = vpop.permute.xlu0 %1495 }
 0x125   : > { %v1790_v11 = vsel %vm1772_vm13, %v1757_v9, %v1496_v4  ;;  %v1792_v21 = vsel %vm1772_vm13, %v1759_v61, %v1498_v0 }
 0x128   : > { %v1212_v58 = vpop.permute.xlu1 %1211  ;;  %v1544_v63 = vpop.permute.xlu0 %1543 }
 0x129   : > { %v1823_v3 = vsel %vm1805_vm14, %v1790_v11, %v1544_v63  ;;  %v1591_v35 = vsel %vm444_vm0, %v3143_v19, %v1212_v58 }
 0x12a   : > { %2746 = vmatprep.mubr.msk.bf16.mxu1 %vm1858_vm15, %v1823_v3 }
 0x12c   : > { %v1214_v20 = vpop.permute.xlu1 %1213  ;;  %v1546_v23 = vpop.permute.xlu0 %1545 }
 0x12d   : > { %v1825_v24 = vsel %vm1805_vm14, %v1792_v21, %v1546_v23  ;;  %v1594_v12 = vsel %vm444_vm0, %v3176_v47, %v1214_v20 }
 0x12e   : > { %2747 = vmatmul.mubr.msk.bf16.vlgmr.msra.gmra.mrb[0].mxu1 %vm1858_vm15, %v1825_v24 }
 0x130   : > { %v1262_v26 = vpop.permute.xlu1 %1261  ;;  %v1260_v27 = vpop.permute.xlu0 %1259 }
 0x131   : > { %v1629_v29 = vsel %vm1607_vm8, %v1591_v35, %v1260_v27  ;;  %v1631_v40 = vsel %vm1607_vm8, %v1594_v12, %v1262_v26 }
 0x134   : > { %v1310_v28 = vpop.permute.xlu1 %1309  ;;  %v1308_v30 = vpop.permute.xlu0 %1307 }
 0x135   : > { %v1662_v46 = vsel %vm1640_vm9, %v1629_v29, %v1308_v30  ;;  %v1664_v19 = vsel %vm1640_vm9, %v1631_v40, %v1310_v28 }
 0x138   : > { %v1358_v22 = vpop.permute.xlu1 %1357  ;;  %v1356_v33 = vpop.permute.xlu0 %1355 }
 0x139   : > { %v1695_v39 = vsel %vm1673_vm10, %v1662_v46, %v1356_v33  ;;  %v1697_v48 = vsel %vm1673_vm10, %v1664_v19, %v1358_v22 }
 0x13c   : > { %v1406_v34 = vpop.permute.xlu1 %1405  ;;  %v1404_v2 = vpop.permute.xlu0 %1403 }
 0x13d   : > { %v1728_v50 = vsel %vm1706_vm11, %v1695_v39, %v1404_v2  ;;  %v1730_v17 = vsel %vm1706_vm11, %v1697_v48, %v1406_v34 }
 0x140   : > { %v1454_v36 = vpop.permute.xlu1 %1453  ;;  %v1452_v37 = vpop.permute.xlu0 %1451 }
 0x141   : > { %v1761_v10 = vsel %vm1739_vm12, %v1728_v50, %v1452_v37  ;;  %v1763_v47 = vsel %vm1739_vm12, %v1730_v17, %v1454_v36 }
 0x144   : > { %v1502_v38 = vpop.permute.xlu1 %1501  ;;  %v1500_v31 = vpop.permute.xlu0 %1499 }
 0x145   : > { %v1794_v15 = vsel %vm1772_vm13, %v1761_v10, %v1500_v31  ;;  %v1796_v32 = vsel %vm1772_vm13, %v1763_v47, %v1502_v38 }
 0x148   : > { %v1216_v41 = vpop.permute.xlu1 %1215  ;;  %v1548_v43 = vpop.permute.xlu0 %1547 }
 0x149   : > { %v1827_v44 = vsel %vm1805_vm14, %v1794_v15, %v1548_v43  ;;  %v1597_v4 = vsel %vm444_vm0, %v3214_v16, %v1216_v41 }
 0x14a   : > { %2750 = vmatprep.mubr.msk.bf16.mxu1 %vm1858_vm15, %v1827_v44 }
 0x14c   : > { %v1218_v49 = vpop.permute.xlu1 %1217  ;;  %v1550_v51 = vpop.permute.xlu0 %1549 }
 0x14d   : > { %v1829_v52 = vsel %vm1805_vm14, %v1796_v32, %v1550_v51  ;;  %v1600_v58 = vsel %vm444_vm0, %v3249_v45, %v1218_v49 }
 0x14e   : > { %2751 = vmatmul.mubr.msk.bf16.gmra.mrb[4].mxu1 %vm1858_vm15, %v1829_v52 }
 0x150   : > { %v1266_v55 = vpop.permute.xlu1 %1265  ;;  %v1264_v56 = vpop.permute.xlu0 %1263 }
 0x151   : > { %v1633_v5 = vsel %vm1607_vm8, %v1597_v4, %v1264_v56  ;;  %v1635_v11 = vsel %vm1607_vm8, %v1600_v58, %v1266_v55 }
 0x154   : > { %v1314_v57 = vpop.permute.xlu1 %1313  ;;  %v1312_v59 = vpop.permute.xlu0 %1311 }
 0x155   : > { %v1666_v7 = vsel %vm1640_vm9, %v1633_v5, %v1312_v59  ;;  %v1668_v16 = vsel %vm1640_vm9, %v1635_v11, %v1314_v57 }
 0x158   : > { %v1362_v60 = vpop.permute.xlu1 %1361  ;;  %v1360_v62 = vpop.permute.xlu0 %1359 }
 0x159   : > { %v1699_v9 = vsel %vm1673_vm10, %v1666_v7, %v1360_v62  ;;  %v1701_v61 = vsel %vm1673_vm10, %v1668_v16, %v1362_v60 }
 0x15c   : > { %v1410_v1 = vpop.permute.xlu1 %1409  ;;  %v1408_v54 = vpop.permute.xlu0 %1407 }
 0x15d   : > { %v1732_v53 = vsel %vm1706_vm11, %v1699_v9, %v1408_v54  ;;  %v1734_v21 = vsel %vm1706_vm11, %v1701_v61, %v1410_v1 }
 0x160   : > { %v1458_v0 = vpop.permute.xlu1 %1457  ;;  %v1456_v25 = vpop.permute.xlu0 %1455 }
 0x161   : > { %v1765_v63 = vsel %vm1739_vm12, %v1732_v53, %v1456_v25  ;;  %v1767_v45 = vsel %vm1739_vm12, %v1734_v21, %v1458_v0 }
 0x164   : > { %v1506_v6 = vpop.permute.xlu1 %1505  ;;  %v1504_v8 = vpop.permute.xlu0 %1503 }
 0x165   : > { %v1798_v3 = vsel %vm1772_vm13, %v1765_v63, %v1504_v8  ;;  %v1800_v24 = vsel %vm1772_vm13, %v1767_v45, %v1506_v6 }
 0x168   : > { %v1220_v14 = vpop.permute.xlu1 %1219  ;;  %v1552_v18 = vpop.permute.xlu0 %1551 }
 0x169   : > { %v1831_v20 = vsel %vm1805_vm14, %v1798_v3, %v1552_v18  ;;  %v1603_v46 = vsel %vm444_vm0, %v3281_v13, %v1220_v14 }
 0x16a   : > { %2754 = vmatprep.mubr.msk.bf16.mxu1 %vm1858_vm15, %v1831_v20 }
 0x16c   : > { %v1222_v23 = vpop.permute.xlu1 %1221  ;;  %v1554_v26 = vpop.permute.xlu0 %1553 }
 0x16d   : > { %v1833_v27 = vsel %vm1805_vm14, %v1800_v24, %v1554_v26  ;;  %v1606_v29 = vsel %vm444_vm0, %v3315_v42, %v1222_v23 }
 0x16e   : > { %2755 = vmatmul.mubr.msk.bf16.gmra.mrb[8].mxu1 %vm1858_vm15, %v1833_v27 }
 0x170   : > { %v1270_v28 = vpop.permute.xlu1 %1269  ;;  %v1268_v30 = vpop.permute.xlu0 %1267 }
 0x171   : > { %v1639_v31 = vsel %vm1607_vm8, %v1606_v29, %v1270_v28  ;;  %v1637_v39 = vsel %vm1607_vm8, %v1603_v46, %v1268_v30 }
 0x174   : > { %v1318_v22 = vpop.permute.xlu1 %1317  ;;  %v1316_v33 = vpop.permute.xlu0 %1315 }
 0x175   : > { %v1672_v12 = vsel %vm1640_vm9, %v1639_v31, %v1318_v22  ;;  %v1670_v50 = vsel %vm1640_vm9, %v1637_v39, %v1316_v33 }
 0x178   : > { %v1366_v34 = vpop.permute.xlu1 %1365  ;;  %v1364_v2 = vpop.permute.xlu0 %1363 }
 0x179   : > { %v1705_v40 = vsel %vm1673_vm10, %v1672_v12, %v1366_v34  ;;  %v1703_v19 = vsel %vm1673_vm10, %v1670_v50, %v1364_v2 }
 0x17c   : > { %v1414_v36 = vpop.permute.xlu1 %1413  ;;  %v1412_v37 = vpop.permute.xlu0 %1411 }
 0x17d   : > { %v1738_v42 = vsel %vm1706_vm11, %v1705_v40, %v1414_v36  ;;  %v1736_v13 = vsel %vm1706_vm11, %v1703_v19, %v1412_v37 }
 0x180   : > { %v1462_v35 = vpop.permute.xlu1 %1461  ;;  %v1460_v38 = vpop.permute.xlu0 %1459 }
 0x181   : > { %v1771_v48 = vsel %vm1739_vm12, %v1738_v42, %v1462_v35  ;;  %v1769_v17 = vsel %vm1739_vm12, %v1736_v13, %v1460_v38 }
 0x184   : > { %v1510_v10 = vpop.permute.xlu1 %1509  ;;  %v2732_v41 = vpop.f32.mrb[0].mxu0 }
 0x185   : > { %v1508_v15 = vpop.permute.xlu0 %1507  ;;  %v1929_v43 = vpop.f32.mrb[1].mxu0  ;;  %v1804_v47 = vsel %vm1772_vm13, %v1771_v48, %v1510_v10  ;;  %v2096_v1 = vmul.f32 %v2732_v41, %v2732_v41 }
 0x186   : > { %v2733_v44 = vpop.f32.mrb[2].mxu0  ;;  %v2094_v51 = vmul.f32 %v1929_v43, %v1929_v43  ;;  %v1802_v59 = vsel %vm1772_vm13, %v1769_v17, %v1508_v15 }
 0x187   : > { %v2617_v49 = vpack.c.bf16 %v2733_v44, %v2732_v41  ;;  %v1932_v32 = vpop.f32.mrb[3].mxu0  ;;  %v2097_v4 = vmul.f32 %v2733_v44, %v2733_v44 }
 0x188   : > { %v2056_v52 = vadd.f32 %v1932_v32, %v1929_v43  ;;  %v2095_v55 = vmul.f32 %v1932_v32, %v1932_v32  ;;  %v2612_v56 = vpack.c.bf16 %v1932_v32, %v1929_v43  ;;  %v1558_v57 = vpop.permute.xlu1 %1557 }
 0x189   : > { %2690 = vst [vmem:[%s3465_s19 + $0x8] sm:$0xff] %v2617_v49   ;;  %v1556_v60 = vpop.permute.xlu0 %1555  ;;  %v1837_v62 = vsel %vm1805_vm14, %v1804_v47, %v1558_v57 }
 0x18a   : > { %v2057_v54 = vadd.f32 %v2732_v41, %v2056_v52  ;;  %v2126_v0 = vadd.f32 %v2095_v55, %v2094_v51  ;;  %2613 = vst [vmem:[%s3465_s19] sm:$0xff] %v2612_v56   ;;  %v1835_v25 = vsel %vm1805_vm14, %v1802_v59, %v1556_v60 }
 0x18b   : > { %2758 = vmatprep.mubr.msk.bf16.mxu1 %vm1858_vm15, %v1835_v25 }
 0x18c   : > { %v2127_v5 = vadd.f32 %v2126_v0, %v2096_v1  ;;  %2759 = vmatmul.mubr.msk.bf16.gmra.mrb[12].mxu1 %vm1858_vm15, %v1837_v62  ;;  %v2058_v6 = vadd.f32 %v2733_v44, %v2057_v54 }
 0x18e   : > { %v2128_v7 = vadd.f32 %v2127_v5, %v2097_v4 }
 0x1a2   : > { %v2736_v8 = vpop.f32.mrb[4].mxu0 }
 0x1a3   : > { %v1945_v9 = vpop.f32.mrb[5].mxu0  ;;  %v2100_v20 = vmul.f32 %v2736_v8, %v2736_v8 }
 0x1a4   : > { %v2059_v58 = vadd.f32 %v2058_v6, %v1945_v9  ;;  %v2098_v53 = vmul.f32 %v1945_v9, %v1945_v9  ;;  %v2737_v11 = vpop.f32.mrb[6].mxu0 }
 0x1a5   : > { %v2627_v63 = vpack.c.bf16 %v2737_v11, %v2736_v8  ;;  %v1948_v14 = vpop.f32.mrb[7].mxu0  ;;  %v2101_v23 = vmul.f32 %v2737_v11, %v2737_v11 }
 0x1a6   : > { %v2129_v16 = vadd.f32 %v2128_v7, %v2098_v53  ;;  %v2060_v3 = vadd.f32 %v2059_v58, %v1948_v14  ;;  %v2099_v18 = vmul.f32 %v1948_v14, %v1948_v14  ;;  %v2622_v61 = vpack.c.bf16 %v1948_v14, %v1945_v9 }
 0x1a7   : > { %2692 = vst [vmem:[%s3465_s19 + $0x18] sm:$0xff] %v2627_v63  }
 0x1a8   : > { %v2061_v21 = vadd.f32 %v2736_v8, %v2060_v3  ;;  %v2130_v45 = vadd.f32 %v2129_v16, %v2099_v18  ;;  %2691 = vst [vmem:[%s3465_s19 + $0x10] sm:$0xff] %v2622_v61  }
 0x1aa   : > { %v2131_v24 = vadd.f32 %v2130_v45, %v2100_v20  ;;  %v2062_v26 = vadd.f32 %v2737_v11, %v2061_v21 }
 0x1ac   : > { %v2132_v27 = vadd.f32 %v2131_v24, %v2101_v23 }
 0x1c2   : > { %v2740_v28 = vpop.f32.mrb[8].mxu0 }
 0x1c3   : > { %v1961_v30 = vpop.f32.mrb[9].mxu0  ;;  %v2104_v46 = vmul.f32 %v2740_v28, %v2740_v28 }
 0x1c4   : > { %v2063_v22 = vadd.f32 %v2062_v26, %v1961_v30  ;;  %v2102_v33 = vmul.f32 %v1961_v30, %v1961_v30  ;;  %v2741_v34 = vpop.f32.mrb[10].mxu0 }
 0x1c5   : > { %v2637_v2 = vpack.c.bf16 %v2741_v34, %v2740_v28  ;;  %v1964_v36 = vpop.f32.mrb[11].mxu0  ;;  %v2105_v12 = vmul.f32 %v2741_v34, %v2741_v34 }
 0x1c6   : > { %v2133_v37 = vadd.f32 %v2132_v27, %v2102_v33  ;;  %v2064_v35 = vadd.f32 %v2063_v22, %v1964_v36  ;;  %v2103_v29 = vmul.f32 %v1964_v36, %v1964_v36  ;;  %v2632_v38 = vpack.c.bf16 %v1964_v36, %v1961_v30 }
 0x1c7   : > { %2694 = vst [vmem:[%s3465_s19 + $0x28] sm:$0xff] %v2637_v2  }
 0x1c8   : > { %v2065_v31 = vadd.f32 %v2740_v28, %v2064_v35  ;;  %v2134_v39 = vadd.f32 %v2133_v37, %v2103_v29  ;;  %2693 = vst [vmem:[%s3465_s19 + $0x20] sm:$0xff] %v2632_v38  }
 0x1ca   : > { %v2135_v50 = vadd.f32 %v2134_v39, %v2104_v46  ;;  %v2066_v40 = vadd.f32 %v2741_v34, %v2065_v31 }
 0x1cc   : > { %v2136_v10 = vadd.f32 %v2135_v50, %v2105_v12 }
 0x1e2   : > { %v2744_v41 = vpop.f32.mrb[12].mxu0 }
 0x1e3   : > { %v1977_v19 = vpop.f32.mrb[13].mxu0  ;;  %v2108_v32 = vmul.f32 %v2744_v41, %v2744_v41 }
 0x1e4   : > { %v2067_v42 = vadd.f32 %v2066_v40, %v1977_v19  ;;  %v2106_v15 = vmul.f32 %v1977_v19, %v1977_v19  ;;  %v2745_v43 = vpop.f32.mrb[14].mxu0 }
 0x1e5   : > { %v2647_v13 = vpack.c.bf16 %v2745_v43, %v2744_v41  ;;  %v1980_v48 = vpop.f32.mrb[15].mxu0  ;;  %v2109_v55 = vmul.f32 %v2745_v43, %v2745_v43 }
 0x1e6   : > { %v2137_v44 = vadd.f32 %v2136_v10, %v2106_v15  ;;  %v2068_v17 = vadd.f32 %v2067_v42, %v1980_v48  ;;  %v2107_v47 = vmul.f32 %v1980_v48, %v1980_v48  ;;  %v2642_v49 = vpack.c.bf16 %v1980_v48, %v1977_v19 }
 0x1e7   : > { %2696 = vst [vmem:[%s3465_s19 + $0x38] sm:$0xff] %v2647_v13  }
 0x1e8   : > { %v2069_v51 = vadd.f32 %v2744_v41, %v2068_v17  ;;  %v2138_v52 = vadd.f32 %v2137_v44, %v2107_v47  ;;  %2695 = vst [vmem:[%s3465_s19 + $0x30] sm:$0xff] %v2642_v49  }
 0x1ea   : > { %v2139_v56 = vadd.f32 %v2138_v52, %v2108_v32  ;;  %v2070_v57 = vadd.f32 %v2745_v43, %v2069_v51 }
 0x1ec   : > { %v2140_v59 = vadd.f32 %v2139_v56, %v2109_v55 }
 0x201   : > { %v2748_v60 = vpop.f32.mrb[0].mxu1 }
 0x202   : > { %v1993_v62 = vpop.f32.mrb[1].mxu1  ;;  %v2112_v9 = vmul.f32 %v2748_v60, %v2748_v60 }
 0x203   : > { %v2071_v1 = vadd.f32 %v2070_v57, %v1993_v62  ;;  %v2110_v54 = vmul.f32 %v1993_v62, %v1993_v62  ;;  %v2749_v0 = vpop.f32.mrb[2].mxu1 }
 0x204   : > { %v2657_v25 = vpack.c.bf16 %v2749_v0, %v2748_v60  ;;  %v1996_v4 = vpop.f32.mrb[3].mxu1  ;;  %v2113_v11 = vmul.f32 %v2749_v0, %v2749_v0 }
 0x205   : > { %v2141_v5 = vadd.f32 %v2140_v59, %v2110_v54  ;;  %v2072_v6 = vadd.f32 %v2071_v1, %v1996_v4  ;;  %v2111_v7 = vmul.f32 %v1996_v4, %v1996_v4  ;;  %v2652_v8 = vpack.c.bf16 %v1996_v4, %v1993_v62 }
 0x206   : > { %2698 = vst [vmem:[%s3465_s19 + $0x48] sm:$0xff] %v2657_v25  }
 0x207   : > { %v2073_v58 = vadd.f32 %v2748_v60, %v2072_v6  ;;  %v2142_v53 = vadd.f32 %v2141_v5, %v2111_v7  ;;  %2697 = vst [vmem:[%s3465_s19 + $0x40] sm:$0xff] %v2652_v8  }
 0x209   : > { %v2143_v63 = vadd.f32 %v2142_v53, %v2112_v9  ;;  %v2074_v14 = vadd.f32 %v2749_v0, %v2073_v58 }
 0x20b   : > { %v2144_v16 = vadd.f32 %v2143_v63, %v2113_v11 }
 0x221   : > { %v2752_v3 = vpop.f32.mrb[4].mxu1 }
 0x222   : > { %v2009_v18 = vpop.f32.mrb[5].mxu1  ;;  %v2116_v30 = vmul.f32 %v2752_v3, %v2752_v3 }
 0x223   : > { %v2075_v61 = vadd.f32 %v2074_v14, %v2009_v18  ;;  %v2114_v20 = vmul.f32 %v2009_v18, %v2009_v18  ;;  %v2753_v21 = vpop.f32.mrb[6].mxu1 }
 0x224   : > { %v2667_v45 = vpack.c.bf16 %v2753_v21, %v2752_v3  ;;  %v2012_v23 = vpop.f32.mrb[7].mxu1  ;;  %v2117_v34 = vmul.f32 %v2753_v21, %v2753_v21 }
 0x225   : > { %v2145_v24 = vadd.f32 %v2144_v16, %v2114_v20  ;;  %v2076_v26 = vadd.f32 %v2075_v61, %v2012_v23  ;;  %v2115_v27 = vmul.f32 %v2012_v23, %v2012_v23  ;;  %v2662_v28 = vpack.c.bf16 %v2012_v23, %v2009_v18 }
 0x226   : > { %2700 = vst [vmem:[%s3465_s19 + $0x58] sm:$0xff] %v2667_v45  }
 0x227   : > { %v2077_v22 = vadd.f32 %v2752_v3, %v2076_v26  ;;  %v2146_v33 = vadd.f32 %v2145_v24, %v2115_v27  ;;  %2699 = vst [vmem:[%s3465_s19 + $0x50] sm:$0xff] %v2662_v28  }
 0x229   : > { %v2147_v2 = vadd.f32 %v2146_v33, %v2116_v30  ;;  %v2078_v36 = vadd.f32 %v2753_v21, %v2077_v22 }
 0x22b   : > { %v2148_v37 = vadd.f32 %v2147_v2, %v2117_v34 }
 0x241   : > { %v2756_v35 = vpop.f32.mrb[8].mxu1 }
 0x242   : > { %v2025_v29 = vpop.f32.mrb[9].mxu1  ;;  %v2120_v19 = vmul.f32 %v2756_v35, %v2756_v35 }
 0x243   : > { %v2079_v38 = vadd.f32 %v2078_v36, %v2025_v29  ;;  %v2118_v46 = vmul.f32 %v2025_v29, %v2025_v29  ;;  %v2757_v31 = vpop.f32.mrb[10].mxu1 }
 0x244   : > { %v2677_v39 = vpack.c.bf16 %v2757_v31, %v2756_v35  ;;  %v2028_v12 = vpop.f32.mrb[11].mxu1  ;;  %v2121_v43 = vmul.f32 %v2757_v31, %v2757_v31 }
 0x245   : > { %v2149_v50 = vadd.f32 %v2148_v37, %v2118_v46  ;;  %v2080_v40 = vadd.f32 %v2079_v38, %v2028_v12  ;;  %v2119_v10 = vmul.f32 %v2028_v12, %v2028_v12  ;;  %v2672_v41 = vpack.c.bf16 %v2028_v12, %v2025_v29 }
 0x246   : > { %2702 = vst [vmem:[%s3465_s19 + $0x68] sm:$0xff] %v2677_v39  }
 0x247   : > { %v2081_v42 = vadd.f32 %v2756_v35, %v2080_v40  ;;  %v2150_v15 = vadd.f32 %v2149_v50, %v2119_v10  ;;  %2701 = vst [vmem:[%s3465_s19 + $0x60] sm:$0xff] %v2672_v41  }
 0x249   : > { %v2151_v13 = vadd.f32 %v2150_v15, %v2120_v19  ;;  %v2082_v48 = vadd.f32 %v2757_v31, %v2081_v42 }
 0x24b   : > { %v2152_v44 = vadd.f32 %v2151_v13, %v2121_v43 }
 0x25f   : > { %v2760_v17 = vpop.f32.mrb[12].mxu1 }
 0x260   : > { %v2041_v47 = vpop.f32.mrb[13].mxu1  ;;  %v2124_v62 = vmul.f32 %v2760_v17, %v2760_v17 }
 0x261   : > { %v2083_v49 = vadd.f32 %v2082_v48, %v2041_v47  ;;  %v2122_v32 = vmul.f32 %v2041_v47, %v2041_v47  ;;  %v2761_v51 = vpop.f32.mrb[14].mxu1 }
 0x262   : > { %v2687_v52 = vpack.c.bf16 %v2761_v51, %v2760_v17  ;;  %v2044_v55 = vpop.f32.mrb[15].mxu1  ;;  %v2125_v0 = vmul.f32 %v2761_v51, %v2761_v51 }
 0x263   : > { %v2153_v56 = vadd.f32 %v2152_v44, %v2122_v32  ;;  %v2084_v57 = vadd.f32 %v2083_v49, %v2044_v55  ;;  %v2123_v59 = vmul.f32 %v2044_v55, %v2044_v55  ;;  %v2682_v60 = vpack.c.bf16 %v2044_v55, %v2041_v47 }
 0x264   : > { %2704 = vst [vmem:[%s3465_s19 + $0x78] sm:$0xff] %v2687_v52  }
 0x265   : > { %v2085_v1 = vadd.f32 %v2760_v17, %v2084_v57  ;;  %v2154_v54 = vadd.f32 %v2153_v56, %v2123_v59  ;;  %2703 = vst [vmem:[%s3465_s19 + $0x70] sm:$0xff] %v2682_v60  }
 0x267   : > { %v2086_v25 = vadd.f32 %v2761_v51, %v2085_v1  ;;  %v2155_v4 = vadd.f32 %v2154_v54, %v2124_v62 }
 0x269   : > { %v2087_v5 = vrot.slane %v2086_v25, 4  ;;  %v2156_v6 = vadd.f32 %v2155_v4, %v2125_v0 }
 0x26b   : > { %v2088_v7 = vadd.f32 %v2087_v5, %v2086_v25  ;;  %v2157_v8 = vrot.slane %v2156_v6, 4 }
 0x26d   : > { %v2089_v9 = vrot.slane %v2088_v7, 2  ;;  %v2158_v58 = vadd.f32 %v2157_v8, %v2156_v6 }
 0x26f   : > { %v2090_v53 = vadd.f32 %v2089_v9, %v2088_v7  ;;  %v2159_v11 = vrot.slane %v2158_v58, 2 }
 0x271   : > { %v2091_v63 = vrot.slane %v2090_v53, 1  ;;  %v2160_v14 = vadd.f32 %v2159_v11, %v2158_v58 }
 0x273   : > { %v2092_v16 = vadd.f32 %v2091_v63, %v2090_v53  ;;  %v2161_v3 = vrot.slane %v2160_v14, 1 }
 0x275   : > { %2093 = vst [vmem:[%s303_s24] sm:$0x1] %v2092_v16  ;;  %v2162_v18 = vadd.f32 %v2161_v3, %v2160_v14 }
 0x277   : > { %2163 = vst [vmem:[%s309_s27] sm:$0x1] %v2162_v18 }
 0x278 PF: > { %s17_s23 = sadd.s32 1, %s2843_s23   ;;  %s3518_s21 = smov %s2839_s22 }
 0x279   : > { %p14_p5 = scmp.ge.s32.totalorder %s17_s23, 4   ;;  %s3519_s22 = smov %s3521_s2 }
 0x27b   :  { %16 = sbr.rel (!%p14_p5) target bundleno = 2 (0x2), region = 96 }

// kernel: double_conv_nchw.4
= control target key start
LH: loop header
LB: loop body
LE: loop exit
PB: predicated region body
PF: predicated region fallthrough
CT: control target
= control target key end

     0   :  { %s5363_s21 = smov 0   ;;  %s5365_s22 = smov 0   ;;  %s6289_s0 = inlined_call_operand.vmem [shape: bf16[2,16,16,128], index: 0, kind: input, shape index: {}]   ;;  %s6290_s1 = inlined_call_operand.vmem [shape: bf16[1152,128], index: 1, kind: input, shape index: {}]   ;;  %s6291_s2 = inlined_call_operand.vmem [shape: f32[1,128], index: 2, kind: input, shape index: {}]   ;;  %s6292_s3 = inlined_call_operand.vmem [shape: f32[1,128], index: 3, kind: input, shape index: {}]   ;;  %s6293_s4 = inlined_call_operand.vmem [shape: bf16[2,16,16,128], index: 4, kind: output, shape index: {0}]   ;;  %s6294_s5 = inlined_call_operand.vmem [shape: f32[2,1,1,128], index: 5, kind: output, shape index: {1}]   ;;  %s6295_s6 = inlined_call_operand.vmem [shape: f32[2,1,1,128], index: 6, kind: output, shape index: {2}]  }
   0x1   :  { %s5367_s23 = smov 0  }
   0x2 LB: > { %s29_s24 = sadd.s32 1, %s5322_s22  ;;  %p3946_p0 = scmp.ge.s32.totalorder %s5326_s23, 1  ;;  %s5326_s23 = sphi %s5367_s23, %s17_s23   ;;  %s5322_s22 = sphi %s5365_s22, %s6315_s22   ;;  %s5318_s21 = sphi %s5363_s21, %s6314_s21  }
   0x3   : > { %p31_p1 = scmp.ge.s32.totalorder %s29_s24, 2  ;;  %p235_p2 = scmp.lt.s32.totalorder %s5326_s23, 3 }
   0x5   : > { %s6317_s24 = smov (%p31_p1, %s29_s24), 0  ;;  %p236_p3 = pnand %p3946_p0, %p235_p2 }
   0x6   : > { %v5224_v0 = vld [vmem:[%s6290_s1 + $0x40] sm:$0xff] (!%p236_p3)   ;;  %v5226_v2 = vld [vmem:[%s6290_s1 + $0x48] sm:$0xff] (!%p236_p3)   ;;  %p282_p4 = scmp.lt.s32.totalorder (!%p236_p3), %s5318_s21, 1  ;;  %v5228_v4 = vld [vmem:[%s6290_s1 + $0x50] sm:$0xff] (!%p236_p3)   ;;  %vm795_vm0 = vsmask.f32 (!%p236_p3), 7424 }
   0x7   : > { %239 = sbr.rel (%p236_p3) target bundleno = 558 (0x22e), region = 36  ;;  %v5225_v1 = vld [vmem:[%s6290_s1 + $0x100] sm:$0xff] (!%p236_p3)   ;;  %4496 = vmatprep.subr.bf16.mxu1 (!%p236_p3), %v5224_v0  ;;  %v5227_v3 = vld [vmem:[%s6290_s1 + $0x108] sm:$0xff] (!%p236_p3)   ;;  %v5229_v5 = vld [vmem:[%s6290_s1 + $0x110] sm:$0xff] (!%p236_p3)   ;;  %vm794_vm1 = vcmask (!%p236_p3), 1047552   ;;  %vm727_vm3 = vcmask (!%p236_p3), 1040384  }
   0x8   : > { %4688 = vmatprep.subr.bf16.mxu0 (!%p236_p3), %v5225_v1  ;;  %4497 = vmatpush3.bf16.msra.mxu1 (!%p236_p3), %v5224_v0  ;;  %v5230_v6 = vld [vmem:[%s6290_s1 + $0x58] sm:$0xff] (!%p236_p3)   ;;  %v5232_v8 = vld [vmem:[%s6290_s1 + $0x60] sm:$0xff] (!%p236_p3)   ;;  %v5234_v10 = vld [vmem:[%s6290_s1 + $0x68] sm:$0xff] (!%p236_p3)   ;;  %vm728_vm4 = vsmask.f32 (!%p236_p3), 256 }
   0x9   : > { %4689 = vmatpush3.bf16.msra.mxu0 (!%p236_p3), %v5225_v1  ;;  %4498 = vmatprep.subr.bf16.mxu1 (!%p236_p3), %v5226_v2  ;;  %v5231_v7 = vld [vmem:[%s6290_s1 + $0x118] sm:$0xff] (!%p236_p3)   ;;  %v5233_v9 = vld [vmem:[%s6290_s1 + $0x120] sm:$0xff] (!%p236_p3)   ;;  %v5235_v11 = vld [vmem:[%s6290_s1 + $0x128] sm:$0xff] (!%p236_p3)  }
   0xa   : > { %4690 = vmatprep.subr.bf16.mxu0 (!%p236_p3), %v5227_v3  ;;  %v5431_v13 = vld [vmem:[%s6291_s2] ss:$0 sm:$0xff] (!%p236_p3)  ;;  %v5236_v22 = vld [vmem:[%s6290_s1 + $0x70] sm:$0xff] (!%p236_p3)   ;;  %v5238_v38 = vld [vmem:[%s6290_s1 + $0x78] sm:$0xff] (!%p236_p3)  }
   0xb   : > { %v5436_v16 = vld [vmem:[%s6292_s3] ss:$0 sm:$0xff] (!%p236_p3)  ;;  %v5237_v24 = vld [vmem:[%s6290_s1 + $0x130] sm:$0xff] (!%p236_p3)   ;;  %v5239_v42 = vld [vmem:[%s6290_s1 + $0x138] sm:$0xff] (!%p236_p3)  }
   0xc   : > { %4499 = vmatpush3.bf16.msra.mxu1 (!%p236_p3), %v5226_v2  ;;  %v5240_v52 = vld [vmem:[%s6290_s1] sm:$0xff] (!%p236_p3)   ;;  %vm5571_vm2 = vmand (!%p236_p3), %vm794_vm1, %vm795_vm0 }
   0xd   : > { %4691 = vmatpush3.bf16.msra.mxu0 (!%p236_p3), %v5227_v3  ;;  %4500 = vmatprep.subr.bf16.mxu1 (!%p236_p3), %v5228_v4  ;;  %v5241_v58 = vld [vmem:[%s6290_s1 + $0x140] sm:$0xff] (!%p236_p3)   ;;  %vm5755_vm5 = vmand (!%p236_p3), %vm727_vm3, %vm728_vm4 }
   0xe   : > { %s6319_s21 = smov (!%p282_p4, %s5318_s21), 1  ;;  %4692 = vmatprep.subr.bf16.mxu0 %v5229_v5 }
   0xf   : > { %s4063_s17 = sshll.u32 %s6319_s21, 7  ;;  %s303_s27 = scalar_lea.vmem %s6294_s5, %s6319_s21 }
  0x10   : > { %4501 = vmatpush3.bf16.msra.mxu1 %v5228_v4  ;;  %s5419_s28 = scalar_lea.vmem %s6289_s0, %s4063_s17  ;;  %s6250_s25 = scalar_lea.vmem %s6293_s4, %s4063_s17 }
  0x11   : > { %4693 = vmatpush3.bf16.msra.mxu0 %v5229_v5  ;;  %4502 = vmatprep.subr.bf16.mxu1 %v5230_v6  ;;  %v4162_v12 = vld [vmem:[%s5419_s28] sm:$0xff]   ;;  %v4249_v17 = vld [vmem:[%s5419_s28 + $0x8] sm:$0xff]   ;;  %v4250_v23 = vld [vmem:[%s5419_s28 + $0x10] sm:$0xff]   ;;  %s309_s7 = scalar_lea.vmem %s6295_s6, %s6319_s21 }
  0x12   : > { %4694 = vmatprep.subr.bf16.mxu0 %v5231_v7  ;;  %v4163_v14 = vunpack.c.l.bf16 %v4162_v12  ;;  %v4164_v15 = vunpack.c.h.bf16 %v4162_v12  ;;  %v4103_v20 = vunpack.c.l.bf16 %v4249_v17  ;;  %v4104_v21 = vunpack.c.h.bf16 %v4249_v17  ;;  %v4251_v29 = vld [vmem:[%s5419_s28 + $0x18] sm:$0xff]   ;;  %v4252_v41 = vld [vmem:[%s5419_s28 + $0x20] sm:$0xff]   ;;  %v4253_v56 = vld [vmem:[%s5419_s28 + $0x28] sm:$0xff]  }
  0x13   : > { %v4107_v30 = vunpack.c.l.bf16 %v4250_v23  ;;  %v4108_v31 = vunpack.c.h.bf16 %v4250_v23  ;;  %v4111_v32 = vunpack.c.l.bf16 %v4251_v29  ;;  %v4112_v33 = vunpack.c.h.bf16 %v4251_v29  ;;  %v4254_v57 = vld [vmem:[%s5419_s28 + $0x30] sm:$0xff]  }
  0x14   : > { %4503 = vmatpush3.bf16.msra.mxu1 %v5230_v6  ;;  %v544_v18 = vmul.f32 %v4163_v14, %v5431_v13  ;;  %v545_v19 = vmul.f32 %v4164_v15, %v5431_v13  ;;  %v389_v27 = vmul.f32 %v4103_v20, %v5431_v13  ;;  %v390_v28 = vmul.f32 %v4104_v21, %v5431_v13  ;;  %v5246_v21 = vld [vmem:[%s6290_s1 + $0x10] sm:$0xff]  }
  0x15   : > { %4695 = vmatpush3.bf16.msra.mxu0 %v5231_v7  ;;  %4504 = vmatprep.subr.bf16.mxu1 %v5232_v8  ;;  %v391_v39 = vmul.f32 %v4107_v30, %v5431_v13  ;;  %v392_v40 = vmul.f32 %v4108_v31, %v5431_v13  ;;  %v393_v46 = vmul.f32 %v4111_v32, %v5431_v13  ;;  %v4115_v54 = vunpack.c.l.bf16 %v4252_v41  ;;  %v5244_v23 = vld [vmem:[%s6290_s1 + $0x150] sm:$0xff]   ;;  %v5245_v30 = vld [vmem:[%s6290_s1 + $0x158] sm:$0xff]  }
  0x16   : > { %4696 = vmatprep.subr.bf16.mxu0 %v5233_v9  ;;  %v552_v25 = vadd.f32 %v5436_v16, %v544_v18  ;;  %v553_v26 = vadd.f32 %v5436_v16, %v545_v19  ;;  %v427_v36 = vadd.f32 %v5436_v16, %v389_v27  ;;  %v428_v37 = vadd.f32 %v5436_v16, %v390_v28  ;;  %v4255_v18 = vld [vmem:[%s5419_s28 + $0x38] sm:$0xff]  }
  0x17   : > { %v429_v48 = vadd.f32 %v5436_v16, %v391_v39  ;;  %v430_v49 = vadd.f32 %v5436_v16, %v392_v40  ;;  %v394_v50 = vmul.f32 %v4112_v33, %v5431_v13  ;;  %v4116_v55 = vunpack.c.h.bf16 %v4252_v41  ;;  %v5249_v33 = vld [vmem:[%s6290_s1 + $0x18] sm:$0xff]   ;;  %v4257_v40 = vld [vmem:[%s5419_s28 + $0x48] sm:$0xff]  }
  0x18   : > { %4505 = vmatpush3.bf16.msra.mxu1 %v5232_v8  ;;  %v554_v34 = vmax.f32 %v552_v25, 0.0  ;;  %v555_v35 = vmax.f32 %v553_v26, 0.0  ;;  %v459_v47 = vmax.f32 %v427_v36, 0.0  ;;  %v460_v53 = vmax.f32 %v428_v37, 0.0  ;;  %v5242_v8 = vld [vmem:[%s6290_s1 + $0x148] sm:$0xff]  }
  0x19   : > { %4697 = vmatpush3.bf16.msra.mxu0 %v5233_v9  ;;  %4506 = vmatprep.subr.bf16.mxu1 %v5234_v10  ;;  %v461_v59 = vmax.f32 %v429_v48, 0.0  ;;  %v462_v60 = vmax.f32 %v430_v49, 0.0  ;;  %v395_v61 = vmul.f32 %v4115_v54, %v5431_v13  ;;  %v396_v62 = vmul.f32 %v4116_v55, %v5431_v13 }
  0x1a   : > { %4698 = vmatprep.subr.bf16.mxu0 %v5235_v11  ;;  %v557_v43 = vmul.f32 0.0, %v554_v34  ;;  %v558_v44 = vmul.f32 0.0, %v555_v35  ;;  %v5464_v45 = vpack.c.bf16 %v555_v35, %v554_v34  ;;  %v431_v63 = vadd.f32 %v5436_v16, %v393_v46  ;;  %v4256_v35 = vld [vmem:[%s5419_s28 + $0x40] sm:$0xff]  }
  0x1b   : > { %v432_v0 = vadd.f32 %v5436_v16, %v394_v50  ;;  %v5486_v1 = vpack.c.bf16 %v460_v53, %v459_v47  ;;  %v4119_v2 = vunpack.c.l.bf16 %v4253_v56  ;;  %v4120_v3 = vunpack.c.h.bf16 %v4253_v56  ;;  %v5252_v47 = vld [vmem:[%s6290_s1 + $0x20] sm:$0xff]  }
  0x1c   : > { %4507 = vmatpush3.bf16.msra.mxu1 %v5234_v10  ;;  %v5470_v51 = vpack.c.bf16 %v558_v44, %v557_v43  ;;  %4704 = vmatprep.mubr.bf16.mxu0 %v5464_v45  ;;  %v4123_v4 = vunpack.c.l.bf16 %v4254_v57  ;;  %v433_v5 = vadd.f32 %v5436_v16, %v395_v61  ;;  %v434_v6 = vadd.f32 %v5436_v16, %v396_v62  ;;  %v5243_v10 = vld [vmem:[%s6290_s1 + $0x8] sm:$0xff]   ;;  %v5247_v43 = vld [vmem:[%s6290_s1 + $0x160] sm:$0xff]  }
  0x1d   : > { %4699 = vmatpush3.bf16.msra.mxu0 %v5235_v11  ;;  %4508 = vmatprep.subr.bf16.mxu1 %v5236_v22  ;;  %v4124_v7 = vunpack.c.h.bf16 %v4254_v57  ;;  %v5493_v9 = vpack.c.bf16 %v462_v60, %v461_v59  ;;  %v463_v11 = vmax.f32 %v431_v63, 0.0  ;;  %v464_v12 = vmax.f32 %v432_v0, 0.0  ;;  %v4258_v60 = vld [vmem:[%s5419_s28 + $0x50] sm:$0xff]   ;;  %v5254_v0 = vld [vmem:[%s6290_s1 + $0x28] sm:$0xff]  }
  0x1e   : > { %4700 = vmatprep.subr.bf16.mxu0 %v5237_v24  ;;  %4512 = vmatprep.mubr.bf16.mxu1 %v5470_v51  ;;  %v397_v14 = vmul.f32 %v4119_v2, %v5431_v13  ;;  %v398_v15 = vmul.f32 %v4120_v3, %v5431_v13  ;;  %v399_v17 = vmul.f32 %v4123_v4, %v5431_v13  ;;  %v465_v19 = vmax.f32 %v433_v5, 0.0 }
  0x1f   : > { %v466_v20 = vmax.f32 %v434_v6, 0.0  ;;  %v4127_v25 = vunpack.c.l.bf16 %v4255_v18  ;;  %v4128_v29 = vunpack.c.h.bf16 %v4255_v18  ;;  %v4131_v44 = vunpack.c.l.bf16 %v4256_v35 }
  0x20   : > { %4509 = vmatpush3.bf16.msra.mxu1 %v5236_v22  ;;  %v400_v22 = vmul.f32 %v4124_v7, %v5431_v13  ;;  %v435_v26 = vadd.f32 %v5436_v16, %v397_v14  ;;  %v436_v27 = vadd.f32 %v5436_v16, %v398_v15  ;;  %v437_v28 = vadd.f32 %v5436_v16, %v399_v17 }
  0x21   : > { %4701 = vmatpush3.bf16.msra.mxu0 %v5237_v24  ;;  %4510 = vmatprep.subr.bf16.mxu1 %v5238_v38  ;;  %v5513_v24 = vpack.c.bf16 %v464_v12, %v463_v11  ;;  %v5521_v31 = vpack.c.bf16 %v466_v20, %v465_v19  ;;  %v401_v34 = vmul.f32 %v4127_v25, %v5431_v13  ;;  %v4132_v46 = vunpack.c.h.bf16 %v4256_v35  ;;  %v5256_v20 = vld [vmem:[%s6290_s1 + $0x30] sm:$0xff]  }
  0x22   : > { %4702 = vmatprep.subr.bf16.mxu0 %v5239_v42  ;;  %v438_v32 = vadd.f32 %v5436_v16, %v400_v22  ;;  %v467_v36 = vmax.f32 %v435_v26, 0.0  ;;  %v468_v37 = vmax.f32 %v436_v27, 0.0  ;;  %v402_v39 = vmul.f32 %v4128_v29, %v5431_v13  ;;  %v5251_v22 = vld [vmem:[%s6290_s1 + $0x178] sm:$0xff]  }
  0x23   : > { %v4135_v48 = vunpack.c.l.bf16 %v4257_v40  ;;  %v4136_v49 = vunpack.c.h.bf16 %v4257_v40  ;;  %v439_v53 = vadd.f32 %v5436_v16, %v401_v34  ;;  %v607_v56 = vshrl.u32 %v5464_v45, 16  ;;  %v4260_v40 = vld [vmem:[%s5419_s28 + $0x60] sm:$0xff]  }
  0x24   : > { %4511 = vmatpush3.bf16.msra.mxu1 %v5238_v38  ;;  %v469_v38 = vmax.f32 %v437_v28, 0.0  ;;  %v470_v41 = vmax.f32 %v438_v32, 0.0  ;;  %v5542_v50 = vpack.c.bf16 %v468_v37, %v467_v36  ;;  %v440_v54 = vadd.f32 %v5436_v16, %v402_v39 }
  0x25   : > { %4703 = vmatpush3.bf16.msra.mxu0 %v5239_v42  ;;  %4544 = vmatprep.subr.bf16.mxu1 %v5240_v52  ;;  %v610_v42 = vshll.u32 %v5464_v45, 16  ;;  %v404_v59 = vmul.f32 %v4132_v46, %v5431_v13  ;;  %v617_v61 = vshll.u32 %v5486_v1, 16  ;;  %v405_v62 = vmul.f32 %v4135_v48, %v5431_v13  ;;  %v4261_v46 = vld [vmem:[%s5419_s28 + $0x68] sm:$0xff]   ;;  %v5253_v48 = vld [vmem:[%s6290_s1 + $0x180] sm:$0xff]  }
  0x26   : > { %4736 = vmatprep.subr.bf16.mxu0 %v5241_v58  ;;  %v5549_v55 = vpack.c.bf16 %v470_v41, %v469_v38  ;;  %v406_v63 = vmul.f32 %v4136_v49, %v5431_v13  ;;  %v471_v2 = vmax.f32 %v439_v53, 0.0  ;;  %v472_v3 = vmax.f32 %v440_v54, 0.0 }
  0x27   : > { %4513 = vmatmul.mubr.bf16.vlgmr.msra.gmra.mrb[0].mxu1 %v5464_v45  ;;  %v748_v57 = vrot.slane %v610_v42, 1  ;;  %v624_v6 = vshll.u32 %v5493_v9, 16  ;;  %v4139_v7 = vunpack.c.l.bf16 %v4258_v60  ;;  %v442_v12 = vadd.f32 %v5436_v16, %v404_v59  ;;  %v5811_v45 = vld [vmem:[%s6290_s1 + $0x1c0] sm:$0xff]  }
  0x28   : > { %4705 = vmatmul.mubr.bf16.vlgmr.msra.gmra.mrb[0].mxu0 %v5486_v1  ;;  %4545 = vmatpush3.bf16.msra.mxu1 %v5240_v52  ;;  %v5248_v52 = vld [vmem:[%s6290_s1 + $0x168] sm:$0xff]   ;;  %v4140_v14 = vunpack.c.h.bf16 %v4258_v60  ;;  %v614_v15 = vshrl.u32 %v5486_v1, 16  ;;  %v750_v17 = vrot.slane %v617_v61, 1  ;;  %v443_v18 = vadd.f32 %v5436_v16, %v405_v62  ;;  %v5638_v60 = vld [vmem:[%s6290_s1 + $0x80] sm:$0xff]  }
  0x29   : > { %4737 = vmatpush3.bf16.msra.mxu0 %v5241_v58  ;;  %4516 = vmatprep.mubr.bf16.mxu1 %v5486_v1  ;;  %v403_v58 = vmul.f32 %v4131_v44, %v5431_v13  ;;  %v749_v4 = vor.u32 %v748_v57, %v607_v56  ;;  %v444_v19 = vadd.f32 %v5436_v16, %v406_v63  ;;  %v621_v27 = vshrl.u32 %v5493_v9, 16  ;;  %v5255_v62 = vld [vmem:[%s6290_s1 + $0x188] sm:$0xff]  }
  0x2a   : > { %4738 = vmatprep.subr.bf16.mxu0 %v5242_v8  ;;  %4708 = vmatprep.mubr.bf16.mxu0 %v5493_v9  ;;  %v752_v28 = vrot.slane %v624_v6, 1  ;;  %v407_v29 = vmul.f32 %v4139_v7, %v5431_v13  ;;  %v408_v34 = vmul.f32 %v4140_v14, %v5431_v13  ;;  %v751_v35 = vor.u32 %v750_v17, %v614_v15 }
  0x2b   : > { %4546 = vmatprep.subr.bf16.mxu1 %v5243_v10  ;;  %v441_v11 = vadd.f32 %v5436_v16, %v403_v58  ;;  %v5597_v26 = vsel %vm5571_vm2, %v749_v4, 0  ;;  %v475_v36 = vmax.f32 %v443_v18, 0.0  ;;  %v476_v37 = vmax.f32 %v444_v19, 0.0 }
  0x2c   : > { %4547 = vmatpush3.bf16.msra.mxu1 %v5243_v10  ;;  %v5250_v10 = vld [vmem:[%s6290_s1 + $0x170] sm:$0xff]   ;;  %v753_v41 = vor.u32 %v752_v28, %v621_v27  ;;  %v631_v44 = vshll.u32 %v5513_v24, 16  ;;  %v446_v49 = vadd.f32 %v5436_v16, %v408_v34  ;;  %v638_v53 = vshll.u32 %v5521_v31, 16 }
  0x2d   : > { %4739 = vmatpush3.bf16.msra.mxu0 %v5242_v8  ;;  %4548 = vmatprep.subr.bf16.mxu1 %v5246_v21  ;;  %v4259_v8 = vld [vmem:[%s5419_s28 + $0x58] sm:$0xff]   ;;  %v473_v32 = vmax.f32 %v441_v11, 0.0  ;;  %v5631_v54 = vsel %vm5571_vm2, %v751_v35, 0  ;;  %v5633_v57 = vpack.c.bf16 %v476_v37, %v475_v36  ;;  %v4147_v58 = vunpack.c.l.bf16 %v4260_v40 }
  0x2e   : > { %4740 = vmatprep.subr.bf16.mxu0 %v5244_v23  ;;  %v4144_v25 = vunpack.c.h.bf16 %v4259_v8  ;;  %v4148_v59 = vunpack.c.h.bf16 %v4260_v40  ;;  %v5647_v4 = vsel %vm5571_vm2, %v753_v41, 0  ;;  %v478_v11 = vmax.f32 %v446_v49, 0.0 }
  0x2f   : > { %4517 = vmatmul.mubr.bf16.gmra.mrb[4].mxu1 %v5493_v9  ;;  %v411_v14 = vmul.f32 %v4147_v58, %v5431_v13  ;;  %v645_v28 = vshll.u32 %v5542_v50, 16  ;;  %v649_v49 = vshrl.u32 %v5549_v55, 16 }
  0x30   : > { %4709 = vmatmul.mubr.bf16.gmra.mrb[4].mxu0 %v5513_v24  ;;  %4520 = vmatprep.mubr.bf16.mxu1 %v5513_v24  ;;  %v410_v39 = vmul.f32 %v4144_v25, %v5431_v13  ;;  %v412_v17 = vmul.f32 %v4148_v59, %v5431_v13  ;;  %v5259_v59 = vld [vmem:[%s6290_s1 + $0x198] sm:$0xff]  }
  0x31   : > { %4741 = vmatpush3.bf16.msra.mxu0 %v5244_v23  ;;  %4712 = vmatprep.mubr.bf16.mxu0 %v5521_v31  ;;  %v4143_v23 = vunpack.c.l.bf16 %v4259_v8  ;;  %v754_v8 = vrot.slane %v631_v44, 1  ;;  %v449_v34 = vadd.f32 %v5436_v16, %v411_v14  ;;  %v6296_v14 = vshrl.u32 %v5470_v51, 16 }
  0x32   : > { %4742 = vmatprep.subr.bf16.mxu0 %v5245_v30  ;;  %4549 = vmatpush3.bf16.msra.mxu1 %v5246_v21  ;;  %v5590_v21 = vpack.c.bf16 %v472_v3, %v471_v2  ;;  %v4151_v2 = vunpack.c.l.bf16 %v4261_v46  ;;  %v4152_v3 = vunpack.c.h.bf16 %v4261_v46  ;;  %v450_v35 = vadd.f32 %v5436_v16, %v412_v17 }
  0x33   : > { %4550 = vmatprep.subr.bf16.mxu1 %v5249_v33  ;;  %v409_v38 = vmul.f32 %v4143_v23, %v5431_v13  ;;  %v4262_v23 = vld [vmem:[%s5419_s28 + $0x70] sm:$0xff]   ;;  %v758_v46 = vrot.slane %v645_v28, 1 }
  0x34   : > { %v4155_v36 = vunpack.c.l.bf16 %v4262_v23  ;;  %v4156_v37 = vunpack.c.h.bf16 %v4262_v23 }
  0x35   : > { %4743 = vmatpush3.bf16.msra.mxu0 %v5245_v30  ;;  %v5258_v30 = vld [vmem:[%s6290_s1 + $0x38] sm:$0xff]   ;;  %v447_v63 = vadd.f32 %v5436_v16, %v409_v38 }
  0x36   : > { %4744 = vmatprep.subr.bf16.mxu0 %v5247_v43  ;;  %4551 = vmatpush3.bf16.msra.mxu1 %v5249_v33  ;;  %v474_v33 = vmax.f32 %v442_v12, 0.0  ;;  %v756_v12 = vrot.slane %v638_v53, 1 }
  0x37   : > { %4521 = vmatmul.mubr.bf16.gmra.mrb[8].mxu1 %v5521_v31  ;;  %4552 = vmatprep.subr.bf16.mxu1 %v5252_v47  ;;  %v479_v18 = vmax.f32 %v447_v63, 0.0  ;;  %v482_v63 = vmax.f32 %v450_v35, 0.0 }
  0x38   : > { %4713 = vmatmul.mubr.bf16.gmra.mrb[8].mxu0 %v5542_v50  ;;  %4524 = vmatprep.mubr.bf16.mxu1 %v5542_v50 }
  0x39   : > { %4745 = vmatpush3.bf16.msra.mxu0 %v5247_v43  ;;  %4716 = vmatprep.mubr.bf16.mxu0 %v5549_v55  ;;  %v445_v43 = vadd.f32 %v5436_v16, %v407_v29 }
  0x3a   : > { %4746 = vmatprep.subr.bf16.mxu0 %v5248_v52  ;;  %4553 = vmatpush3.bf16.msra.mxu1 %v5252_v47  ;;  %v5621_v47 = vpack.c.bf16 %v474_v33, %v473_v32  ;;  %v5257_v32 = vld [vmem:[%s6290_s1 + $0x190] sm:$0xff]   ;;  %v652_v33 = vshll.u32 %v5549_v55, 16 }
  0x3b   : > { %4554 = vmatprep.subr.bf16.mxu1 %v5254_v0  ;;  %v477_v7 = vmax.f32 %v445_v43, 0.0  ;;  %v642_v43 = vshrl.u32 %v5542_v50, 16 }
  0x3c   : > { %v760_v58 = vrot.slane %v652_v33, 1 }
  0x3d   : > { %4747 = vmatpush3.bf16.msra.mxu0 %v5248_v52  ;;  %v628_v52 = vshrl.u32 %v5513_v24, 16  ;;  %v5667_v29 = vpack.c.bf16 %v478_v11, %v477_v7  ;;  %v659_v11 = vshll.u32 %v5590_v21, 16 }
  0x3e   : > { %4748 = vmatprep.subr.bf16.mxu0 %v5250_v10  ;;  %4555 = vmatpush3.bf16.msra.mxu1 %v5254_v0  ;;  %v448_v0 = vadd.f32 %v5436_v16, %v410_v39  ;;  %v761_v17 = vor.u32 %v760_v58, %v649_v49  ;;  %v6297_v58 = vshll.u32 %v5470_v51, 16 }
  0x3f   : > { %4525 = vmatmul.mubr.bf16.gmra.mrb[12].mxu1 %v5549_v55  ;;  %4556 = vmatprep.subr.bf16.mxu1 %v5256_v20  ;;  %v755_v25 = vor.u32 %v754_v8, %v628_v52  ;;  %v762_v35 = vrot.slane %v659_v11, 1 }
  0x40   : > { %4717 = vmatmul.mubr.bf16.gmra.mrb[12].mxu0 %v5590_v21  ;;  %4528 = vmatprep.mubr.bf16.mxu1 %v5590_v21  ;;  %v480_v19 = vmax.f32 %v448_v0, 0.0  ;;  %v415_v0 = vmul.f32 %v4155_v36, %v5431_v13  ;;  %v5263_v36 = vld [vmem:[%s6290_s1 + $0x1a8] sm:$0xff]  }
  0x41   : > { %4749 = vmatpush3.bf16.msra.mxu0 %v5250_v10  ;;  %4752 = vmatprep.mubr.bf16.mxu0 %v5597_v26  ;;  %v635_v10 = vshrl.u32 %v5521_v31, 16  ;;  %v5683_v41 = vsel %vm5571_vm2, %v755_v25, 0 }
  0x42   : > { %4750 = vmatprep.subr.bf16.mxu0 %v5251_v22  ;;  %4557 = vmatpush3.bf16.msra.mxu1 %v5256_v20  ;;  %v413_v20 = vmul.f32 %v4151_v2, %v5431_v13  ;;  %v5677_v38 = vpack.c.bf16 %v480_v19, %v479_v18  ;;  %v416_v2 = vmul.f32 %v4156_v37, %v5431_v13  ;;  %v666_v18 = vshll.u32 %v5621_v47, 16  ;;  %v5261_v19 = vld [vmem:[%s6290_s1 + $0x1a0] sm:$0xff]  }
  0x43   : > { %4558 = vmatprep.subr.bf16.mxu1 %v5258_v30  ;;  %v453_v25 = vadd.f32 %v5436_v16, %v415_v0 }
  0x44   : > { %v451_v39 = vadd.f32 %v5436_v16, %v413_v20  ;;  %v764_v0 = vrot.slane %v666_v18, 1 }
  0x45   : > { %4751 = vmatpush3.bf16.msra.mxu0 %v5251_v22  ;;  %v414_v22 = vmul.f32 %v4152_v3, %v5431_v13  ;;  %v4263_v3 = vld [vmem:[%s5419_s28 + $0x78] sm:$0xff]  }
  0x46   : > { %4784 = vmatprep.subr.bf16.mxu0 %v5253_v48  ;;  %4559 = vmatpush3.bf16.msra.mxu1 %v5258_v30  ;;  %v757_v30 = vor.u32 %v756_v12, %v635_v10  ;;  %v483_v7 = vmax.f32 %v451_v39, 0.0  ;;  %v759_v12 = vor.u32 %v758_v46, %v642_v43  ;;  %v4159_v20 = vunpack.c.l.bf16 %v4263_v3 }
  0x47   : > { %4529 = vmatmul.mubr.bf16.gmra.mrb[16].mxu1 %v5621_v47  ;;  %4592 = vmatprep.subr.bf16.mxu1 %v5638_v60  ;;  %v452_v40 = vadd.f32 %v5436_v16, %v414_v22  ;;  %v4160_v22 = vunpack.c.h.bf16 %v4263_v3  ;;  %v602_v46 = vrot.slane %v6296_v14, 7  ;;  %v677_v14 = vshrl.u32 %v5667_v29, 16 }
  0x48   : > { %4753 = vmatmul.mubr.bf16.vlgmr.msra.gmra.mrb[0].mxu0 %v5631_v54  ;;  %4532 = vmatprep.mubr.bf16.mxu1 %v5633_v57  ;;  %v417_v37 = vmul.f32 %v4159_v20, %v5431_v13  ;;  %v673_v20 = vshll.u32 %v5633_v57, 16 }
  0x49   : > { %4785 = vmatpush3.bf16.msra.mxu0 %v5253_v48  ;;  %4756 = vmatprep.mubr.bf16.mxu0 %v5647_v4  ;;  %v5690_v48 = vsel %vm5571_vm2, %v757_v30, 0  ;;  %v484_v8 = vmax.f32 %v452_v40, 0.0  ;;  %v454_v30 = vadd.f32 %v5436_v16, %v416_v2  ;;  %v418_v39 = vmul.f32 %v4160_v22, %v5431_v13 }
  0x4a   : > { %4786 = vmatprep.subr.bf16.mxu0 %v5255_v62  ;;  %v5731_v40 = vsel %vm5571_vm2, %v759_v12, 0  ;;  %v455_v13 = vadd.f32 %v5436_v16, %v417_v37 }
  0x4b   : > { %v456_v2 = vadd.f32 %v5436_v16, %v418_v39  ;;  %v486_v3 = vmax.f32 %v454_v30, 0.0  ;;  %v5265_v30 = vld [vmem:[%s6290_s1 + $0x1b0] sm:$0xff]   ;;  %v609_v39 = vrot.slane %v607_v56, 7  ;;  %v5287_v16 = vld [vmem:[%s6290_s1 + $0x208] sm:$0xff]  }
  0x4d   : > { %4787 = vmatpush3.bf16.msra.mxu0 %v5255_v62  ;;  %v481_v62 = vmax.f32 %v449_v34, 0.0  ;;  %v5720_v34 = vpack.c.bf16 %v484_v8, %v483_v7  ;;  %v487_v8 = vmax.f32 %v455_v13, 0.0  ;;  %v488_v12 = vmax.f32 %v456_v2, 0.0 }
  0x4e   : > { %4788 = vmatprep.subr.bf16.mxu0 %v5257_v32  ;;  %v766_v2 = vrot.slane %v673_v20, 1 }
  0x4f   : > { %4533 = vmatmul.mubr.bf16.gmra.mrb[20].mxu1 %v5667_v29  ;;  %v5715_v23 = vpack.c.bf16 %v482_v63, %v481_v62  ;;  %v663_v62 = vshrl.u32 %v5621_v47, 16  ;;  %v5739_v63 = vsel %vm5571_vm2, %v761_v17, 0  ;;  %v605_v17 = vor.u32 %v6297_v58, %v602_v46 }
  0x50   : > { %4757 = vmatmul.mubr.bf16.gmra.mrb[4].mxu0 %v5683_v41  ;;  %4536 = vmatprep.mubr.bf16.mxu1 %v5677_v38  ;;  %v670_v46 = vshrl.u32 %v5633_v57, 16 }
  0x51   : > { %4760 = vmatprep.mubr.bf16.mxu0 %v5690_v48  ;;  %4789 = vmatpush3.bf16.msra.mxu0 %v5257_v32  ;;  %v656_v32 = vshrl.u32 %v5590_v21, 16  ;;  %v765_v22 = vor.u32 %v764_v0, %v663_v62  ;;  %v5267_v0 = vld [vmem:[%s6290_s1 + $0x1b8] sm:$0xff]   ;;  %v730_v13 = vsel %vm5755_vm5, 0, %v605_v17 }
  0x52   : > { %4790 = vmatprep.subr.bf16.mxu0 %v5259_v59 }
  0x53   : > { %v763_v7 = vor.u32 %v762_v35, %v656_v32  ;;  %v5766_v35 = vpack.c.bf16 %v488_v12, %v487_v8  ;;  %v5786_v56 = vsel %vm5571_vm2, %v765_v22, 0 }
  0x55   : > { %4791 = vmatpush3.bf16.msra.mxu0 %v5259_v59  ;;  %v485_v59 = vmax.f32 %v453_v25, 0.0  ;;  %v680_v25 = vshll.u32 %v5667_v29, 16 }
  0x56   : > { %4792 = vmatprep.subr.bf16.mxu0 %v5261_v19 }
  0x57   : > { %4537 = vmatmul.mubr.bf16.gmra.mrb[24].mxu1 %v5715_v23  ;;  %v5768_v37 = vpack.c.bf16 %v486_v3, %v485_v59  ;;  %v576_v59 = vmul.f32 0.0, %v487_v8  ;;  %v577_v3 = vmul.f32 0.0, %v488_v12  ;;  %v768_v58 = vrot.slane %v680_v25, 1 }
  0x58   : > { %4761 = vmatmul.mubr.bf16.gmra.mrb[8].mxu0 %v5731_v40  ;;  %4540 = vmatprep.mubr.bf16.mxu1 %v5720_v34  ;;  %v6302_v8 = vshll.u32 %v5677_v38, 16 }
  0x59   : > { %4764 = vmatprep.mubr.bf16.mxu0 %v5739_v63  ;;  %4793 = vmatpush3.bf16.msra.mxu0 %v5261_v19  ;;  %v5774_v19 = vsel %vm5571_vm2, %v763_v7, 0  ;;  %v616_v7 = vrot.slane %v614_v15, 7  ;;  %v5794_v17 = vpack.c.bf16 %v577_v3, %v576_v59  ;;  %v767_v15 = vor.u32 %v766_v2, %v670_v46 }
  0x5a   : > { %4794 = vmatprep.subr.bf16.mxu0 %v5263_v36  ;;  %v769_v22 = vor.u32 %v768_v58, %v677_v14  ;;  %v6298_v59 = vshll.u32 %v5715_v23, 16  ;;  %v6301_v3 = vshrl.u32 %v5715_v23, 16 }
  0x5b   : > { %v619_v12 = vor.u32 %v617_v61, %v616_v7  ;;  %v630_v61 = vrot.slane %v628_v52, 7  ;;  %v5823_v58 = vsel %vm5571_vm2, %v767_v15, 0  ;;  %v5262_v52 = vld [vmem:[%s6290_s1 + $0x88] sm:$0xff]  }
  0x5c   : > { %v772_v7 = vrot.slane %v6298_v59, 1 }
  0x5d   : > { %4795 = vmatpush3.bf16.msra.mxu0 %v5263_v36  ;;  %v612_v36 = vor.u32 %v610_v42, %v609_v39  ;;  %v684_v39 = vshrl.u32 %v5677_v38, 16  ;;  %v5830_v2 = vsel %vm5755_vm5, 0, %v619_v12  ;;  %v5264_v12 = vld [vmem:[%s6290_s1 + $0x90] sm:$0xff]  }
  0x5e   : > { %4796 = vmatprep.subr.bf16.mxu0 %v5265_v30 }
  0x5f   : > { %4541 = vmatmul.mubr.bf16.gmra.mrb[28].mxu1 %v5768_v37  ;;  %v5815_v42 = vsel %vm5755_vm5, 0, %v612_v36  ;;  %v633_v36 = vor.u32 %v631_v44, %v630_v61  ;;  %v637_v61 = vrot.slane %v635_v10, 7 }
  0x60   : > { %4765 = vmatmul.mubr.bf16.gmra.mrb[12].mxu0 %v5774_v19  ;;  %4560 = vmatprep.mubr.bf16.mxu1 %v730_v13  ;;  %v770_v13 = vrot.slane %v6302_v8, 1  ;;  %v5268_v8 = vld [vmem:[%s6290_s1 + $0xa0] sm:$0xff]  }
  0x61   : > { %4768 = vmatprep.mubr.bf16.mxu0 %v5786_v56  ;;  %4797 = vmatpush3.bf16.msra.mxu0 %v5265_v30  ;;  %v623_v30 = vrot.slane %v621_v27, 7  ;;  %v5834_v27 = vsel %vm5571_vm2, %v769_v22, 0  ;;  %v6300_v22 = vshll.u32 %v5720_v34, 16 }
  0x62   : > { %4798 = vmatprep.subr.bf16.mxu0 %v5267_v0  ;;  %v771_v15 = vor.u32 %v770_v13, %v684_v39 }
  0x63   : > { %v774_v59 = vrot.slane %v6300_v22, 1  ;;  %v1645_v22 = vshll.u32 %v5766_v35, 16 }
  0x64   : > { %v5873_v13 = vsel %vm5571_vm2, %v771_v15, 0  ;;  %v5266_v15 = vld [vmem:[%s6290_s1 + $0x98] sm:$0xff]  }
  0x65   : > { %4799 = vmatpush3.bf16.msra.mxu0 %v5267_v0  ;;  %v626_v0 = vor.u32 %v624_v6, %v623_v30  ;;  %v773_v6 = vor.u32 %v772_v7, %v6301_v3  ;;  %v5867_v30 = vsel %vm5755_vm5, 0, %v633_v36  ;;  %v698_v7 = vshrl.u32 %v5720_v34, 16 }
  0x66   : > { %4832 = vmatprep.subr.bf16.mxu0 %v5811_v45  ;;  %v705_v36 = vshrl.u32 %v5768_v37, 16 }
  0x67   : > { %4561 = vmatmul.mubr.bf16.vlgmr.msra.gmra.mrb[0].mxu1 %v5815_v42  ;;  %v5863_v44 = vsel %vm5755_vm5, 0, %v626_v0  ;;  %v5882_v0 = vsel %vm5571_vm2, %v773_v6, 0  ;;  %v775_v6 = vor.u32 %v774_v59, %v698_v7  ;;  %v651_v59 = vrot.slane %v649_v49, 7 }
  0x68   : > { %4769 = vmatmul.mubr.bf16.gmra.mrb[16].mxu0 %v5823_v58  ;;  %4593 = vmatpush3.bf16.msra.mxu1 %v5638_v60  ;;  %v6299_v60 = vshll.u32 %v5768_v37, 16 }
  0x69   : > { %4564 = vmatprep.mubr.bf16.mxu1 %v5830_v2  ;;  %4772 = vmatprep.mubr.bf16.mxu0 %v5834_v27 }
  0x6a   : > { %4594 = vmatprep.subr.bf16.mxu1 %v5262_v52  ;;  %v776_v10 = vrot.slane %v6299_v60, 1 }
  0x6c   : > { %4595 = vmatpush3.bf16.msra.mxu1 %v5262_v52  ;;  %v644_v52 = vrot.slane %v642_v43, 7  ;;  %v640_v43 = vor.u32 %v638_v53, %v637_v61  ;;  %v777_v3 = vor.u32 %v776_v10, %v705_v36  ;;  %v1710_v10 = vrot.slane %v1645_v22, 1 }
  0x6d   : > { %4596 = vmatprep.subr.bf16.mxu1 %v5264_v12 }
  0x6e   : > { %v647_v60 = vor.u32 %v645_v28, %v644_v52  ;;  %v5908_v53 = vsel %vm5755_vm5, 0, %v640_v43  ;;  %v658_v28 = vrot.slane %v656_v32, 7  ;;  %v1642_v52 = vshrl.u32 %v5766_v35, 16  ;;  %v5270_v32 = vld [vmem:[%s6290_s1 + $0xa8] sm:$0xff]   ;;  %v5272_v43 = vld [vmem:[%s6290_s1 + $0xb0] sm:$0xff]  }
  0x6f   : > { %4565 = vmatmul.mubr.bf16.gmra.mrb[4].mxu1 %v5863_v44  ;;  %v5927_v49 = vsel %vm5571_vm2, %v777_v3, 0 }
  0x70   : > { %4773 = vmatmul.mubr.bf16.gmra.mrb[20].mxu0 %v5873_v13  ;;  %4568 = vmatprep.mubr.bf16.mxu1 %v5867_v30  ;;  %v5920_v61 = vsel %vm5755_vm5, 0, %v647_v60  ;;  %v654_v60 = vor.u32 %v652_v33, %v651_v59  ;;  %v1711_v3 = vor.u32 %v1710_v10, %v1642_v52  ;;  %v665_v33 = vrot.slane %v663_v62, 7  ;;  %v5975_v10 = vld [vmem:[%s6290_s1 + $0xc0] sm:$0xff]  }
  0x71   : > { %4776 = vmatprep.mubr.bf16.mxu0 %v5882_v0  ;;  %4597 = vmatpush3.bf16.msra.mxu1 %v5264_v12  ;;  %v5916_v12 = vsel %vm5571_vm2, %v775_v6, 0 }
  0x72   : > { %4598 = vmatprep.subr.bf16.mxu1 %v5266_v15  ;;  %v5947_v6 = vsel %vm5755_vm5, 0, %v654_v60  ;;  %v5953_v59 = vsel %vm5571_vm2, %v1711_v3, 0  ;;  %v668_v62 = vor.u32 %v666_v18, %v665_v33  ;;  %v679_v60 = vrot.slane %v677_v14, 7  ;;  %v5271_v3 = vld [vmem:[%s6290_s1 + $0x1c8] sm:$0xff]  }
  0x74   : > { %v682_v14 = vor.u32 %v680_v25, %v679_v60 }
  0x75   : > { %4599 = vmatpush3.bf16.msra.mxu1 %v5266_v15  ;;  %v661_v15 = vor.u32 %v659_v11, %v658_v28  ;;  %v5274_v28 = vld [vmem:[%s6290_s1 + $0xb8] sm:$0xff]  }
  0x76   : > { %4600 = vmatprep.subr.bf16.mxu1 %v5268_v8  ;;  %v6007_v33 = vsel %vm5755_vm5, 0, %v682_v14 }
  0x77   : > { %4569 = vmatmul.mubr.bf16.gmra.mrb[8].mxu1 %v5908_v53  ;;  %v5957_v11 = vsel %vm5755_vm5, 0, %v661_v15 }
  0x78   : > { %4777 = vmatmul.mubr.bf16.gmra.mrb[24].mxu0 %v5916_v12  ;;  %4572 = vmatprep.mubr.bf16.mxu1 %v5920_v61 }
  0x79   : > { %4780 = vmatprep.mubr.bf16.mxu0 %v5927_v49  ;;  %4601 = vmatpush3.bf16.msra.mxu1 %v5268_v8  ;;  %v672_v8 = vrot.slane %v670_v46, 7 }
  0x7a   : > { %4602 = vmatprep.subr.bf16.mxu1 %v5270_v32 }
  0x7b   : > { %v675_v46 = vor.u32 %v673_v20, %v672_v8  ;;  %v686_v20 = vrot.slane %v684_v39, 7  ;;  %v6307_v39 = vshll.u32 %v5677_v38, 16  ;;  %v6308_v8 = vshrl.u32 %v5715_v23, 16 }
  0x7d   : > { %4603 = vmatpush3.bf16.msra.mxu1 %v5270_v32  ;;  %v5979_v32 = vsel %vm5755_vm5, 0, %v668_v62  ;;  %v5985_v18 = vsel %vm5755_vm5, 0, %v675_v46  ;;  %v689_v15 = vor.u32 %v6307_v39, %v686_v20  ;;  %v5275_v62 = vld [vmem:[%s6290_s1 + $0x1d8] sm:$0xff]   ;;  %v6309_v46 = vshll.u32 %v5715_v23, 16 }
  0x7e   : > { %4604 = vmatprep.subr.bf16.mxu1 %v5272_v43  ;;  %v6310_v20 = vshll.u32 %v5720_v34, 16  ;;  %v707_v39 = vrot.slane %v705_v36, 7  ;;  %v6312_v36 = vshll.u32 %v5768_v37, 16 }
  0x7f   : > { %4573 = vmatmul.mubr.bf16.gmra.mrb[12].mxu1 %v5947_v6  ;;  %v6013_v25 = vsel %vm5755_vm5, 0, %v689_v15 }
  0x80   : > { %4781 = vmatmul.mubr.bf16.gmra.mrb[28].mxu0 %v5953_v59  ;;  %4576 = vmatprep.mubr.bf16.mxu1 %v5957_v11 }
  0x81   : > { %4800 = vmatprep.mubr.bf16.mxu0 %v5830_v2  ;;  %4605 = vmatpush3.bf16.msra.mxu1 %v5272_v43  ;;  %v5273_v43 = vld [vmem:[%s6290_s1 + $0x1d0] sm:$0xff]  }
  0x82   : > { %4606 = vmatprep.subr.bf16.mxu1 %v5274_v28 }
  0x85   : > { %4607 = vmatpush3.bf16.msra.mxu1 %v5274_v28  ;;  %v693_v28 = vrot.slane %v6308_v8, 7 }
  0x86   : > { %4640 = vmatprep.subr.bf16.mxu1 %v5975_v10 }
  0x87   : > { %4577 = vmatmul.mubr.bf16.gmra.mrb[16].mxu1 %v5979_v32  ;;  %v696_v60 = vor.u32 %v6309_v46, %v693_v28  ;;  %v5279_v28 = vld [vmem:[%s6290_s1 + $0x1e8] sm:$0xff]  }
  0x88   : > { %4801 = vmatmul.mubr.bf16.vlgmr.msra.gmra.mrb[0].mxu0 %v5863_v44  ;;  %4580 = vmatprep.mubr.bf16.mxu1 %v5985_v18 }
  0x89   : > { %4833 = vmatpush3.bf16.msra.mxu0 %v5811_v45  ;;  %4804 = vmatprep.mubr.bf16.mxu0 %v5867_v30  ;;  %v700_v45 = vrot.slane %v698_v7, 7  ;;  %v6033_v14 = vsel %vm5755_vm5, 0, %v696_v60  ;;  %v5281_v60 = vld [vmem:[%s6290_s1 + $0x1f0] sm:$0xff]  }
  0x8a   : > { %4834 = vmatprep.subr.bf16.mxu0 %v5271_v3 }
  0x8b   : > { %v703_v7 = vor.u32 %v6310_v20, %v700_v45  ;;  %v710_v45 = vor.u32 %v6312_v36, %v707_v39  ;;  %v5278_v39 = vld [vmem:[%s6290_s1 + $0xc8] sm:$0xff]  }
  0x8d   : > { %4835 = vmatpush3.bf16.msra.mxu0 %v5271_v3  ;;  %v5277_v3 = vld [vmem:[%s6290_s1 + $0x1e0] sm:$0xff]   ;;  %v6039_v15 = vsel %vm5755_vm5, 0, %v703_v7  ;;  %v6059_v20 = vsel %vm5755_vm5, 0, %v710_v45  ;;  %v2641_v45 = vshll.u32 %v5794_v17, 16 }
  0x8e   : > { %4836 = vmatprep.subr.bf16.mxu0 %v5273_v43 }
  0x8f   : > { %4581 = vmatmul.mubr.bf16.gmra.mrb[20].mxu1 %v6007_v33 }
  0x90   : > { %4805 = vmatmul.mubr.bf16.gmra.mrb[4].mxu0 %v5908_v53  ;;  %4584 = vmatprep.mubr.bf16.mxu1 %v6013_v25 }
  0x91   : > { %4808 = vmatprep.mubr.bf16.mxu0 %v5920_v61  ;;  %4837 = vmatpush3.bf16.msra.mxu0 %v5273_v43  ;;  %v6311_v43 = vshll.u32 %v5470_v51, 16 }
  0x92   : > { %4838 = vmatprep.subr.bf16.mxu0 %v5275_v62 }
  0x93   : > { %v746_v8 = vrot.slane %v6311_v43, 1  ;;  %v5280_v43 = vld [vmem:[%s6290_s1 + $0xd0] sm:$0xff]  }
  0x95   : > { %4839 = vmatpush3.bf16.msra.mxu0 %v5275_v62  ;;  %v6313_v62 = vshrl.u32 %v5470_v51, 16  ;;  %v5283_v51 = vld [vmem:[%s6290_s1 + $0x1f8] sm:$0xff]  }
  0x96   : > { %4840 = vmatprep.subr.bf16.mxu0 %v5277_v3 }
  0x97   : > { %4585 = vmatmul.mubr.bf16.gmra.mrb[24].mxu1 %v6033_v14  ;;  %v747_v46 = vor.u32 %v746_v8, %v6313_v62  ;;  %v1644_v8 = vrot.slane %v1642_v52, 7  ;;  %v5284_v52 = vld [vmem:[%s6290_s1 + $0xe0] sm:$0xff]  }
  0x98   : > { %4809 = vmatmul.mubr.bf16.gmra.mrb[8].mxu0 %v5947_v6  ;;  %4588 = vmatprep.mubr.bf16.mxu1 %v6039_v15 }
  0x99   : > { %4812 = vmatprep.mubr.bf16.mxu0 %v5957_v11  ;;  %4841 = vmatpush3.bf16.msra.mxu0 %v5277_v3  ;;  %v797_v7 = vsel %vm5571_vm2, %v747_v46, 0  ;;  %v5285_v3 = vld [vmem:[%s6290_s1 + $0x200] sm:$0xff]  }
  0x9a   : > { %4842 = vmatprep.subr.bf16.mxu0 %v5279_v28 }
  0x9d   : > { %4843 = vmatpush3.bf16.msra.mxu0 %v5279_v28  ;;  %v1647_v28 = vor.u32 %v1645_v22, %v1644_v8  ;;  %v5286_v22 = vld [vmem:[%s6290_s1 + $0xe8] sm:$0xff]  }
  0x9e   : > { %4844 = vmatprep.subr.bf16.mxu0 %v5281_v60 }
  0x9f   : > { %4589 = vmatmul.mubr.bf16.gmra.mrb[28].mxu1 %v6059_v20  ;;  %v6103_v62 = vsel %vm5755_vm5, 0, %v1647_v28 }
  0xa0   : > { %4813 = vmatmul.mubr.bf16.gmra.mrb[12].mxu0 %v5979_v32  ;;  %4608 = vmatprep.mubr.bf16.mxu1 %v797_v7 }
  0xa1   : > { %4816 = vmatprep.mubr.bf16.mxu0 %v5985_v18  ;;  %4845 = vmatpush3.bf16.msra.mxu0 %v5281_v60  ;;  %v5288_v60 = vld [vmem:[%s6290_s1 + $0xf0] sm:$0xff]  }
  0xa2   : > { %4846 = vmatprep.subr.bf16.mxu0 %v5283_v51 }
  0xa5   : > { %4847 = vmatpush3.bf16.msra.mxu0 %v5283_v51  ;;  %v5290_v51 = vld [vmem:[%s6290_s1 + $0xf8] sm:$0xff]  }
  0xa6   : > { %4880 = vmatprep.subr.bf16.mxu0 %v5285_v3 }
  0xa7   : > { %4609 = vmatmul.mubr.bf16.vlgmr.msra.gmra.mrb[0].mxu1 %v5597_v26  ;;  %v5282_v26 = vld [vmem:[%s6290_s1 + $0xd8] sm:$0xff]  }
  0xa8   : > { %4817 = vmatmul.mubr.bf16.gmra.mrb[16].mxu0 %v6007_v33  ;;  %4641 = vmatpush3.bf16.msra.mxu1 %v5975_v10  ;;  %v2638_v10 = vshrl.u32 %v5794_v17, 16 }
  0xa9   : > { %4612 = vmatprep.mubr.bf16.mxu1 %v5631_v54  ;;  %4820 = vmatprep.mubr.bf16.mxu0 %v6013_v25 }
  0xaa   : > { %4642 = vmatprep.subr.bf16.mxu1 %v5278_v39  ;;  %v2640_v36 = vrot.slane %v2638_v10, 7 }
  0xac   : > { %4643 = vmatpush3.bf16.msra.mxu1 %v5278_v39  ;;  %v2643_v46 = vor.u32 %v2641_v45, %v2640_v36  ;;  %v5296_v39 = vld [vmem:[%s6290_s1 + $0x100] sm:$0xff]  }
  0xad   : > { %4644 = vmatprep.subr.bf16.mxu1 %v5280_v43 }
  0xae   : > { %v2675_v7 = vsel %vm5755_vm5, 0, %v2643_v46 }
  0xaf   : > { %4613 = vmatmul.mubr.bf16.gmra.mrb[4].mxu1 %v5647_v4 }
  0xb0   : > { %4821 = vmatmul.mubr.bf16.gmra.mrb[20].mxu0 %v6033_v14  ;;  %4616 = vmatprep.mubr.bf16.mxu1 %v5683_v41 }
  0xb1   : > { %4824 = vmatprep.mubr.bf16.mxu0 %v6039_v15  ;;  %4645 = vmatpush3.bf16.msra.mxu1 %v5280_v43  ;;  %v5291_v43 = vld [vmem:[%s6290_s1 + $0x218] sm:$0xff]  }
  0xb2   : > { %4646 = vmatprep.subr.bf16.mxu1 %v5282_v26 }
  0xb5   : > { %4647 = vmatpush3.bf16.msra.mxu1 %v5282_v26 }
  0xb6   : > { %4648 = vmatprep.subr.bf16.mxu1 %v5284_v52 }
  0xb7   : > { %4617 = vmatmul.mubr.bf16.gmra.mrb[8].mxu1 %v5690_v48 }
  0xb8   : > { %4825 = vmatmul.mubr.bf16.gmra.mrb[24].mxu0 %v6059_v20  ;;  %4620 = vmatprep.mubr.bf16.mxu1 %v5731_v40 }
  0xb9   : > { %4828 = vmatprep.mubr.bf16.mxu0 %v6103_v62  ;;  %4649 = vmatpush3.bf16.msra.mxu1 %v5284_v52 }
  0xba   : > { %4650 = vmatprep.subr.bf16.mxu1 %v5286_v22 }
  0xbd   : > { %4651 = vmatpush3.bf16.msra.mxu1 %v5286_v22 }
  0xbe   : > { %4652 = vmatprep.subr.bf16.mxu1 %v5288_v60 }
  0xbf   : > { %4621 = vmatmul.mubr.bf16.gmra.mrb[12].mxu1 %v5739_v63 }
  0xc0   : > { %4829 = vmatmul.mubr.bf16.gmra.mrb[28].mxu0 %v2675_v7  ;;  %4624 = vmatprep.mubr.bf16.mxu1 %v5774_v19 }
  0xc1   : > { %4848 = vmatprep.mubr.bf16.mxu0 %v5486_v1  ;;  %4653 = vmatpush3.bf16.msra.mxu1 %v5288_v60  ;;  %v5289_v1 = vld [vmem:[%s6290_s1 + $0x210] sm:$0xff]  }
  0xc2   : > { %4654 = vmatprep.subr.bf16.mxu1 %v5290_v51 }
  0xc5   : > { %4655 = vmatpush3.bf16.msra.mxu1 %v5290_v51 }
  0xc6   : > { %4928 = vmatprep.subr.bf16.mxu1 %v5296_v39 }
  0xc7   : > { %4625 = vmatmul.mubr.bf16.gmra.mrb[16].mxu1 %v5786_v56 }
  0xc8   : > { %4849 = vmatmul.mubr.bf16.vlgmr.msra.gmra.mrb[0].mxu0 %v5493_v9  ;;  %4628 = vmatprep.mubr.bf16.mxu1 %v5823_v58  ;;  %v5292_v9 = vld [vmem:[%s6290_s1 + $0x220] sm:$0xff]  }
  0xc9   : > { %4881 = vmatpush3.bf16.msra.mxu0 %v5285_v3  ;;  %4852 = vmatprep.mubr.bf16.mxu0 %v5513_v24  ;;  %v5293_v24 = vld [vmem:[%s6290_s1 + $0x228] sm:$0xff]  }
  0xca   : > { %4882 = vmatprep.subr.bf16.mxu0 %v5287_v16 }
  0xcd   : > { %4883 = vmatpush3.bf16.msra.mxu0 %v5287_v16 }
  0xce   : > { %4884 = vmatprep.subr.bf16.mxu0 %v5289_v1 }
  0xcf   : > { %4629 = vmatmul.mubr.bf16.gmra.mrb[20].mxu1 %v5834_v27 }
  0xd0   : > { %4853 = vmatmul.mubr.bf16.gmra.mrb[4].mxu0 %v5521_v31  ;;  %4632 = vmatprep.mubr.bf16.mxu1 %v5873_v13  ;;  %v5294_v31 = vld [vmem:[%s6290_s1 + $0x230] sm:$0xff]  }
  0xd1   : > { %4856 = vmatprep.mubr.bf16.mxu0 %v5542_v50  ;;  %4885 = vmatpush3.bf16.msra.mxu0 %v5289_v1  ;;  %v5295_v50 = vld [vmem:[%s6290_s1 + $0x238] sm:$0xff]  }
  0xd2   : > { %4886 = vmatprep.subr.bf16.mxu0 %v5291_v43 }
  0xd5   : > { %4887 = vmatpush3.bf16.msra.mxu0 %v5291_v43 }
  0xd6   : > { %4888 = vmatprep.subr.bf16.mxu0 %v5292_v9 }
  0xd7   : > { %4633 = vmatmul.mubr.bf16.gmra.mrb[24].mxu1 %v5882_v0 }
  0xd8   : > { %4857 = vmatmul.mubr.bf16.gmra.mrb[8].mxu0 %v5549_v55  ;;  %4636 = vmatprep.mubr.bf16.mxu1 %v5916_v12  ;;  %v5297_v55 = vld [vmem:[%s6290_s1 + $0x108] sm:$0xff]  }
  0xd9   : > { %4860 = vmatprep.mubr.bf16.mxu0 %v5590_v21  ;;  %4889 = vmatpush3.bf16.msra.mxu0 %v5292_v9  ;;  %v5298_v21 = vld [vmem:[%s6290_s1 + $0x110] sm:$0xff]  }
  0xda   : > { %4890 = vmatprep.subr.bf16.mxu0 %v5293_v24 }
  0xdd   : > { %4891 = vmatpush3.bf16.msra.mxu0 %v5293_v24 }
  0xde   : > { %4892 = vmatprep.subr.bf16.mxu0 %v5294_v31 }
  0xdf   : > { %4637 = vmatmul.mubr.bf16.gmra.mrb[28].mxu1 %v5927_v49 }
  0xe0   : > { %4861 = vmatmul.mubr.bf16.gmra.mrb[12].mxu0 %v5621_v47  ;;  %4656 = vmatprep.mubr.bf16.mxu1 %v5815_v42  ;;  %v5299_v42 = vld [vmem:[%s6290_s1 + $0x118] sm:$0xff]  }
  0xe1   : > { %4864 = vmatprep.mubr.bf16.mxu0 %v5633_v57  ;;  %4893 = vmatpush3.bf16.msra.mxu0 %v5294_v31 }
  0xe2   : > { %4894 = vmatprep.subr.bf16.mxu0 %v5295_v50 }
  0xe5   : > { %4895 = vmatpush3.bf16.msra.mxu0 %v5295_v50 }
  0xe7   : > { %4657 = vmatmul.mubr.bf16.vlgmr.msra.gmra.mrb[0].mxu1 %v5830_v2  ;;  %v5300_v2 = vld [vmem:[%s6290_s1 + $0x120] sm:$0xff]  }
  0xe8   : > { %4865 = vmatmul.mubr.bf16.gmra.mrb[16].mxu0 %v5667_v29  ;;  %4936 = vmatpush3.bf16.msra.mxu1 %v5296_v39 }
  0xe9   : > { %4660 = vmatprep.mubr.bf16.mxu1 %v5863_v44  ;;  %4868 = vmatprep.mubr.bf16.mxu0 %v5677_v38  ;;  %v5301_v44 = vld [vmem:[%s6290_s1 + $0x128] sm:$0xff]  }
  0xea   : > { %4929 = vmatprep.subr.bf16.mxu1 %v5297_v55 }
  0xec   : > { %4937 = vmatpush3.bf16.msra.mxu1 %v5297_v55 }
  0xed   : > { %4930 = vmatprep.subr.bf16.mxu1 %v5298_v21 }
  0xef   : > { %4661 = vmatmul.mubr.bf16.gmra.mrb[4].mxu1 %v5867_v30  ;;  %v5302_v30 = vld [vmem:[%s6290_s1 + $0x130] sm:$0xff]  }
  0xf0   : > { %4869 = vmatmul.mubr.bf16.gmra.mrb[20].mxu0 %v5715_v23  ;;  %4664 = vmatprep.mubr.bf16.mxu1 %v5908_v53  ;;  %v5303_v53 = vld [vmem:[%s6290_s1 + $0x138] sm:$0xff]  }
  0xf1   : > { %4872 = vmatprep.mubr.bf16.mxu0 %v5720_v34  ;;  %4938 = vmatpush3.bf16.msra.mxu1 %v5298_v21 }
  0xf2   : > { %4931 = vmatprep.subr.bf16.mxu1 %v5299_v42 }
  0xf5   : > { %4939 = vmatpush3.bf16.msra.mxu1 %v5299_v42 }
  0xf6   : > { %4932 = vmatprep.subr.bf16.mxu1 %v5300_v2 }
  0xf7   : > { %4665 = vmatmul.mubr.bf16.gmra.mrb[8].mxu1 %v5920_v61 }
  0xf8   : > { %4873 = vmatmul.mubr.bf16.gmra.mrb[24].mxu0 %v5768_v37  ;;  %4668 = vmatprep.mubr.bf16.mxu1 %v5947_v6 }
  0xf9   : > { %4876 = vmatprep.mubr.bf16.mxu0 %v5766_v35  ;;  %4940 = vmatpush3.bf16.msra.mxu1 %v5300_v2 }
  0xfa   : > { %4933 = vmatprep.subr.bf16.mxu1 %v5301_v44 }
  0xfd   : > { %4941 = vmatpush3.bf16.msra.mxu1 %v5301_v44 }
  0xfe   : > { %4934 = vmatprep.subr.bf16.mxu1 %v5302_v30 }
  0xff   : > { %4669 = vmatmul.mubr.bf16.gmra.mrb[12].mxu1 %v5957_v11 }
 0x100   : > { %4877 = vmatmul.mubr.bf16.gmra.mrb[28].mxu0 %v5794_v17  ;;  %4672 = vmatprep.mubr.bf16.mxu1 %v5979_v32 }
 0x101   : > { %4896 = vmatprep.mubr.bf16.mxu0 %v5631_v54  ;;  %4942 = vmatpush3.bf16.msra.mxu1 %v5302_v30 }
 0x102   : > { %4935 = vmatprep.subr.bf16.mxu1 %v5303_v53 }
 0x105   : > { %4943 = vmatpush3.bf16.msra.mxu1 %v5303_v53 }
 0x107   : > { %4673 = vmatmul.mubr.bf16.gmra.mrb[16].mxu1 %v5985_v18 }
 0x108   : > { %4897 = vmatmul.mubr.bf16.vlgmr.msra.gmra.mrb[0].mxu0 %v5647_v4  ;;  %4676 = vmatprep.mubr.bf16.mxu1 %v6007_v33 }
 0x109   : > { %4900 = vmatprep.mubr.bf16.mxu0 %v5683_v41 }
 0x10f   : > { %4677 = vmatmul.mubr.bf16.gmra.mrb[20].mxu1 %v6013_v25 }
 0x110   : > { %4901 = vmatmul.mubr.bf16.gmra.mrb[4].mxu0 %v5690_v48  ;;  %4680 = vmatprep.mubr.bf16.mxu1 %v6033_v14 }
 0x111   : > { %4904 = vmatprep.mubr.bf16.mxu0 %v5731_v40 }
 0x117   : > { %4681 = vmatmul.mubr.bf16.gmra.mrb[24].mxu1 %v6039_v15 }
 0x118   : > { %4905 = vmatmul.mubr.bf16.gmra.mrb[8].mxu0 %v5739_v63  ;;  %4684 = vmatprep.mubr.bf16.mxu1 %v6059_v20 }
 0x119   : > { %4908 = vmatprep.mubr.bf16.mxu0 %v5774_v19 }
 0x11f   : > { %4685 = vmatmul.mubr.bf16.gmra.mrb[28].mxu1 %v6103_v62 }
 0x120   : > { %4909 = vmatmul.mubr.bf16.gmra.mrb[12].mxu0 %v5786_v56  ;;  %4720 = vmatprep.mubr.bf16.mxu1 %v5621_v47  ;;  %v2706_v47 = vrot.slane %v2641_v45, 1 }
 0x121   : > { %4912 = vmatprep.mubr.bf16.mxu0 %v5823_v58 }
 0x122   : > { %v2707_v54 = vor.u32 %v2706_v47, %v2638_v10 }
 0x127   : > { %4721 = vmatmul.mubr.bf16.vlgmr.msra.gmra.mrb[16].mxu1 %v5633_v57  ;;  %v2739_v57 = vsel %vm5571_vm2, %v2707_v54, 0 }
 0x128   : > { %4913 = vmatmul.mubr.bf16.gmra.mrb[16].mxu0 %v5834_v27  ;;  %4724 = vmatprep.mubr.bf16.mxu1 %v5667_v29 }
 0x129   : > { %4916 = vmatprep.mubr.bf16.mxu0 %v5873_v13 }
 0x12f   : > { %4725 = vmatmul.mubr.bf16.gmra.mrb[20].mxu1 %v5677_v38 }
 0x130   : > { %4917 = vmatmul.mubr.bf16.gmra.mrb[20].mxu0 %v5882_v0  ;;  %4728 = vmatprep.mubr.bf16.mxu1 %v5715_v23 }
 0x131   : > { %4920 = vmatprep.mubr.bf16.mxu0 %v5916_v12 }
 0x137   : > { %4729 = vmatmul.mubr.bf16.gmra.mrb[24].mxu1 %v5720_v34 }
 0x138   : > { %4921 = vmatmul.mubr.bf16.gmra.mrb[24].mxu0 %v5927_v49  ;;  %4732 = vmatprep.mubr.bf16.mxu1 %v5768_v37 }
 0x139   : > { %4924 = vmatprep.mubr.bf16.mxu0 %v5953_v59 }
 0x13f   : > { %4733 = vmatmul.mubr.bf16.gmra.mrb[28].mxu1 %v5766_v35 }
 0x140   : > { %4925 = vmatmul.mubr.bf16.gmra.mrb[28].mxu0 %v2739_v57 }
 0x1ba   : > { %v4658_v4 = vpop.f32.mrb[0].mxu1 }
 0x1bb   : > { %v1842_v29 = vpop.f32.mrb[1].mxu1 }
 0x1bc   : > { %v4659_v38 = vpop.f32.mrb[2].mxu1 }
 0x1bd   : > { %v1845_v41 = vpop.f32.mrb[3].mxu1 }
 0x1c2   : > { %v4662_v48 = vpop.f32.mrb[4].mxu1 }
 0x1c3   : > { %v1858_v23 = vpop.f32.mrb[5].mxu1 }
 0x1c4   : > { %v4663_v34 = vpop.f32.mrb[6].mxu1 }
 0x1c5   : > { %v1861_v40 = vpop.f32.mrb[7].mxu1 }
 0x1ca   : > { %v4666_v63 = vpop.f32.mrb[8].mxu1 }
 0x1cb   : > { %v1874_v37 = vpop.f32.mrb[9].mxu1 }
 0x1cc   : > { %v4667_v19 = vpop.f32.mrb[10].mxu1 }
 0x1cd   : > { %v1877_v56 = vpop.f32.mrb[11].mxu1 }
 0x1d2   : > { %v6237_v17 = vpop.f32.mrb[12].mxu1 }
 0x1d3   : > { %v6239_v5 = vpop.f32.mrb[13].mxu1 }
 0x1d4   : > { %v6241_v58 = vpop.f32.mrb[14].mxu1 }
 0x1d5   : > { %v6243_v35 = vpop.f32.mrb[15].mxu1 }
 0x1db   : > { %v4898_v27 = vpop.f32.mrb[0].mxu0 }
 0x1dc   : > { %v4944_v13 = vadd.f32 %v4898_v27, %v4658_v4  ;;  %v3352_v0 = vpop.f32.mrb[1].mxu0 }
 0x1dd   : > { %v4945_v12 = vadd.f32 %v3352_v0, %v1842_v29  ;;  %v4899_v61 = vpop.f32.mrb[2].mxu0 }
 0x1de   : > { %v4946_v49 = vadd.f32 %v4899_v61, %v4659_v38  ;;  %v3355_v6 = vpop.f32.mrb[3].mxu0  ;;  %v3551_v14 = vmul.f32 %v4944_v13, %v4944_v13 }
 0x1df   : > { %v4947_v59 = vadd.f32 %v3355_v6, %v1845_v41  ;;  %v3549_v32 = vmul.f32 %v4945_v12, %v4945_v12 }
 0x1e0   : > { %v4177_v11 = vpack.c.bf16 %v4946_v49, %v4944_v13  ;;  %v3552_v10 = vmul.f32 %v4946_v49, %v4946_v49 }
 0x1e1   : > { %v3511_v18 = vadd.f32 %v4947_v59, %v4945_v12  ;;  %v3550_v33 = vmul.f32 %v4947_v59, %v4947_v59  ;;  %v4172_v25 = vpack.c.bf16 %v4947_v59, %v4945_v12 }
 0x1e2   : > { %4265 = vst [vmem:[%s6250_s25 + $0x8] sm:$0xff] %v4177_v11  }
 0x1e3   : > { %v3512_v15 = vadd.f32 %v4944_v13, %v3511_v18  ;;  %v3581_v20 = vadd.f32 %v3550_v33, %v3549_v32  ;;  %4173 = vst [vmem:[%s6250_s25] sm:$0xff] %v4172_v25   ;;  %v4902_v3 = vpop.f32.mrb[4].mxu0 }
 0x1e4   : > { %v4948_v8 = vadd.f32 %v4902_v3, %v4662_v48  ;;  %v3368_v26 = vpop.f32.mrb[5].mxu0 }
 0x1e5   : > { %v3582_v28 = vadd.f32 %v3581_v20, %v3551_v14  ;;  %v4949_v52 = vadd.f32 %v3368_v26, %v1858_v23  ;;  %v3513_v36 = vadd.f32 %v4946_v49, %v3512_v15  ;;  %v4903_v45 = vpop.f32.mrb[6].mxu0 }
 0x1e6   : > { %v4950_v62 = vadd.f32 %v4903_v45, %v4663_v34  ;;  %v3371_v22 = vpop.f32.mrb[7].mxu0  ;;  %v3555_v24 = vmul.f32 %v4948_v8, %v4948_v8 }
 0x1e7   : > { %v3514_v46 = vadd.f32 %v4949_v52, %v3513_v36  ;;  %v3553_v60 = vmul.f32 %v4949_v52, %v4949_v52  ;;  %v3583_v7 = vadd.f32 %v3582_v28, %v3552_v10  ;;  %v4951_v51 = vadd.f32 %v3371_v22, %v1861_v40 }
 0x1e8   : > { %v4187_v16 = vpack.c.bf16 %v4950_v62, %v4948_v8  ;;  %v3556_v2 = vmul.f32 %v4950_v62, %v4950_v62 }
 0x1e9   : > { %v3584_v39 = vadd.f32 %v3583_v7, %v3553_v60  ;;  %v3515_v1 = vadd.f32 %v4951_v51, %v3514_v46  ;;  %v3554_v43 = vmul.f32 %v4951_v51, %v4951_v51  ;;  %v4182_v9 = vpack.c.bf16 %v4951_v51, %v4949_v52 }
 0x1ea   : > { %4267 = vst [vmem:[%s6250_s25 + $0x18] sm:$0xff] %v4187_v16  }
 0x1eb   : > { %v3516_v31 = vadd.f32 %v4948_v8, %v3515_v1  ;;  %v3585_v50 = vadd.f32 %v3584_v39, %v3554_v43  ;;  %4266 = vst [vmem:[%s6250_s25 + $0x10] sm:$0xff] %v4182_v9   ;;  %v4906_v55 = vpop.f32.mrb[8].mxu0 }
 0x1ec   : > { %v4952_v21 = vadd.f32 %v4906_v55, %v4666_v63  ;;  %v3384_v42 = vpop.f32.mrb[9].mxu0 }
 0x1ed   : > { %v3586_v44 = vadd.f32 %v3585_v50, %v3555_v24  ;;  %v4953_v30 = vadd.f32 %v3384_v42, %v1874_v37  ;;  %v3517_v53 = vadd.f32 %v4950_v62, %v3516_v31  ;;  %v4907_v47 = vpop.f32.mrb[10].mxu0 }
 0x1ee   : > { %v4954_v54 = vadd.f32 %v4907_v47, %v4667_v19  ;;  %v3387_v57 = vpop.f32.mrb[11].mxu0  ;;  %v3559_v63 = vmul.f32 %v4952_v21, %v4952_v21 }
 0x1ef   : > { %v3518_v4 = vadd.f32 %v4953_v30, %v3517_v53  ;;  %v3557_v29 = vmul.f32 %v4953_v30, %v4953_v30  ;;  %v3587_v38 = vadd.f32 %v3586_v44, %v3556_v2  ;;  %v4955_v41 = vadd.f32 %v3387_v57, %v1877_v56 }
 0x1f0   : > { %v4197_v48 = vpack.c.bf16 %v4954_v54, %v4952_v21  ;;  %v3560_v19 = vmul.f32 %v4954_v54, %v4954_v54 }
 0x1f1   : > { %v3588_v23 = vadd.f32 %v3587_v38, %v3557_v29  ;;  %v3519_v34 = vadd.f32 %v4955_v41, %v3518_v4  ;;  %v3558_v40 = vmul.f32 %v4955_v41, %v4955_v41  ;;  %v4192_v27 = vpack.c.bf16 %v4955_v41, %v4953_v30 }
 0x1f2   : > { %4269 = vst [vmem:[%s6250_s25 + $0x28] sm:$0xff] %v4197_v48  }
 0x1f3   : > { %v3520_v13 = vadd.f32 %v4952_v21, %v3519_v34  ;;  %v3589_v0 = vadd.f32 %v3588_v23, %v3558_v40  ;;  %4268 = vst [vmem:[%s6250_s25 + $0x20] sm:$0xff] %v4192_v27   ;;  %v4910_v37 = vpop.f32.mrb[12].mxu0 }
 0x1f4   : > { %v4956_v12 = vadd.f32 %v4910_v37, %v6237_v17  ;;  %v3400_v61 = vpop.f32.mrb[13].mxu0 }
 0x1f5   : > { %v3590_v49 = vadd.f32 %v3589_v0, %v3559_v63  ;;  %v4957_v6 = vadd.f32 %v3400_v61, %v6239_v5  ;;  %v3521_v56 = vadd.f32 %v4954_v54, %v3520_v13  ;;  %v4911_v59 = vpop.f32.mrb[14].mxu0 }
 0x1f6   : > { %v4958_v11 = vadd.f32 %v4911_v59, %v6241_v58  ;;  %v3403_v32 = vpop.f32.mrb[15].mxu0  ;;  %v3563_v10 = vmul.f32 %v4956_v12, %v4956_v12 }
 0x1f7   : > { %v3522_v18 = vadd.f32 %v4957_v6, %v3521_v56  ;;  %v3561_v33 = vmul.f32 %v4957_v6, %v4957_v6  ;;  %v3591_v25 = vadd.f32 %v3590_v49, %v3560_v19  ;;  %v4959_v14 = vadd.f32 %v3403_v32, %v6243_v35 }
 0x1f8   : > { %v4207_v15 = vpack.c.bf16 %v4958_v11, %v4956_v12  ;;  %v3564_v22 = vmul.f32 %v4958_v11, %v4958_v11 }
 0x1f9   : > { %v3592_v20 = vadd.f32 %v3591_v25, %v3561_v33  ;;  %v3523_v17 = vadd.f32 %v4959_v14, %v3522_v18  ;;  %v3562_v3 = vmul.f32 %v4959_v14, %v4959_v14  ;;  %v4202_v8 = vpack.c.bf16 %v4959_v14, %v4957_v6 }
 0x1fa   : > { %4271 = vst [vmem:[%s6250_s25 + $0x38] sm:$0xff] %v4207_v15   ;;  %v4722_v26 = vpop.f32.mrb[16].mxu1 }
 0x1fb   : > { %v3524_v5 = vadd.f32 %v4956_v12, %v3523_v17  ;;  %v3593_v28 = vadd.f32 %v3592_v20, %v3562_v3  ;;  %4270 = vst [vmem:[%s6250_s25 + $0x30] sm:$0xff] %v4202_v8   ;;  %v4914_v52 = vpop.f32.mrb[16].mxu0  ;;  %v2163_v58 = vpop.f32.mrb[17].mxu1 }
 0x1fc   : > { %v4960_v36 = vadd.f32 %v4914_v52, %v4722_v26  ;;  %v3416_v45 = vpop.f32.mrb[17].mxu0  ;;  %v4723_v62 = vpop.f32.mrb[18].mxu1 }
 0x1fd   : > { %v3594_v46 = vadd.f32 %v3593_v28, %v3563_v10  ;;  %v4961_v35 = vadd.f32 %v3416_v45, %v2163_v58  ;;  %v3525_v60 = vadd.f32 %v4958_v11, %v3524_v5  ;;  %v4915_v7 = vpop.f32.mrb[18].mxu0  ;;  %v2166_v51 = vpop.f32.mrb[19].mxu1 }
 0x1fe   : > { %v4962_v16 = vadd.f32 %v4915_v7, %v4723_v62  ;;  %v3419_v39 = vpop.f32.mrb[19].mxu0  ;;  %v3567_v44 = vmul.f32 %v4960_v36, %v4960_v36 }
 0x1ff   : > { %v3526_v1 = vadd.f32 %v4961_v35, %v3525_v60  ;;  %v3565_v43 = vmul.f32 %v4961_v35, %v4961_v35  ;;  %v3595_v9 = vadd.f32 %v3594_v46, %v3564_v22  ;;  %v4963_v24 = vadd.f32 %v3419_v39, %v2166_v51 }
 0x200   : > { %v4217_v31 = vpack.c.bf16 %v4962_v16, %v4960_v36  ;;  %v3568_v38 = vmul.f32 %v4962_v16, %v4962_v16 }
 0x201   : > { %v3596_v50 = vadd.f32 %v3595_v9, %v3565_v43  ;;  %v3527_v55 = vadd.f32 %v4963_v24, %v3526_v1  ;;  %v3566_v21 = vmul.f32 %v4963_v24, %v4963_v24  ;;  %v4212_v42 = vpack.c.bf16 %v4963_v24, %v4961_v35 }
 0x202   : > { %4273 = vst [vmem:[%s6250_s25 + $0x48] sm:$0xff] %v4217_v31   ;;  %v4726_v2 = vpop.f32.mrb[20].mxu1 }
 0x203   : > { %v3528_v30 = vadd.f32 %v4960_v36, %v3527_v55  ;;  %v3597_v53 = vadd.f32 %v3596_v50, %v3566_v21  ;;  %4272 = vst [vmem:[%s6250_s25 + $0x40] sm:$0xff] %v4212_v42   ;;  %v4918_v47 = vpop.f32.mrb[20].mxu0  ;;  %v2179_v54 = vpop.f32.mrb[21].mxu1 }
 0x204   : > { %v4964_v57 = vadd.f32 %v4918_v47, %v4726_v2  ;;  %v3432_v4 = vpop.f32.mrb[21].mxu0  ;;  %v4727_v29 = vpop.f32.mrb[22].mxu1 }
 0x205   : > { %v3598_v41 = vadd.f32 %v3597_v53, %v3567_v44  ;;  %v4965_v48 = vadd.f32 %v3432_v4, %v2179_v54  ;;  %v3529_v23 = vadd.f32 %v4962_v16, %v3528_v30  ;;  %v4919_v34 = vpop.f32.mrb[22].mxu0  ;;  %v2182_v40 = vpop.f32.mrb[23].mxu1 }
 0x206   : > { %v4966_v27 = vadd.f32 %v4919_v34, %v4727_v29  ;;  %v3435_v63 = vpop.f32.mrb[23].mxu0  ;;  %v3571_v11 = vmul.f32 %v4964_v57, %v4964_v57 }
 0x207   : > { %v3530_v13 = vadd.f32 %v4965_v48, %v3529_v23  ;;  %v3569_v0 = vmul.f32 %v4965_v48, %v4965_v48  ;;  %v3599_v37 = vadd.f32 %v3598_v41, %v3568_v38  ;;  %v4967_v12 = vadd.f32 %v3435_v63, %v2182_v40 }
 0x208   : > { %v4227_v61 = vpack.c.bf16 %v4966_v27, %v4964_v57  ;;  %v3572_v17 = vmul.f32 %v4966_v27, %v4966_v27 }
 0x209   : > { %v3600_v19 = vadd.f32 %v3599_v37, %v3569_v0  ;;  %v3531_v49 = vadd.f32 %v4967_v12, %v3530_v13  ;;  %v3570_v6 = vmul.f32 %v4967_v12, %v4967_v12  ;;  %v4222_v56 = vpack.c.bf16 %v4967_v12, %v4965_v48 }
 0x20a   : > { %4275 = vst [vmem:[%s6250_s25 + $0x58] sm:$0xff] %v4227_v61   ;;  %v4730_v59 = vpop.f32.mrb[24].mxu1 }
 0x20b   : > { %v3532_v32 = vadd.f32 %v4964_v57, %v3531_v49  ;;  %v3601_v18 = vadd.f32 %v3600_v19, %v3570_v6  ;;  %4274 = vst [vmem:[%s6250_s25 + $0x50] sm:$0xff] %v4222_v56   ;;  %v4922_v33 = vpop.f32.mrb[24].mxu0  ;;  %v2195_v25 = vpop.f32.mrb[25].mxu1 }
 0x20c   : > { %v4968_v14 = vadd.f32 %v4922_v33, %v4730_v59  ;;  %v3448_v15 = vpop.f32.mrb[25].mxu0  ;;  %v4731_v20 = vpop.f32.mrb[26].mxu1 }
 0x20d   : > { %v3602_v3 = vadd.f32 %v3601_v18, %v3571_v11  ;;  %v4969_v8 = vadd.f32 %v3448_v15, %v2195_v25  ;;  %v3533_v26 = vadd.f32 %v4966_v27, %v3532_v32  ;;  %v4923_v10 = vpop.f32.mrb[26].mxu0  ;;  %v2198_v5 = vpop.f32.mrb[27].mxu1 }
 0x20e   : > { %v4970_v28 = vadd.f32 %v4923_v10, %v4731_v20  ;;  %v3451_v52 = vpop.f32.mrb[27].mxu0  ;;  %v3575_v16 = vmul.f32 %v4968_v14, %v4968_v14 }
 0x20f   : > { %v3534_v58 = vadd.f32 %v4969_v8, %v3533_v26  ;;  %v3573_v36 = vmul.f32 %v4969_v8, %v4969_v8  ;;  %v3603_v45 = vadd.f32 %v3602_v3, %v3572_v17  ;;  %v4971_v62 = vadd.f32 %v3451_v52, %v2198_v5 }
 0x210   : > { %v4237_v22 = vpack.c.bf16 %v4970_v28, %v4968_v14  ;;  %v3576_v55 = vmul.f32 %v4970_v28, %v4970_v28 }
 0x211   : > { %v3604_v46 = vadd.f32 %v3603_v45, %v3573_v36  ;;  %v3535_v35 = vadd.f32 %v4971_v62, %v3534_v58  ;;  %v3574_v60 = vmul.f32 %v4971_v62, %v4971_v62  ;;  %v4232_v7 = vpack.c.bf16 %v4971_v62, %v4969_v8 }
 0x212   : > { %4277 = vst [vmem:[%s6250_s25 + $0x68] sm:$0xff] %v4237_v22   ;;  %v4734_v51 = vpop.f32.mrb[28].mxu1 }
 0x213   : > { %v3536_v39 = vadd.f32 %v4968_v14, %v3535_v35  ;;  %v3605_v1 = vadd.f32 %v3604_v46, %v3574_v60  ;;  %4276 = vst [vmem:[%s6250_s25 + $0x60] sm:$0xff] %v4232_v7   ;;  %v4926_v43 = vpop.f32.mrb[28].mxu0  ;;  %v2211_v9 = vpop.f32.mrb[29].mxu1 }
 0x214   : > { %v4972_v24 = vadd.f32 %v4926_v43, %v4734_v51  ;;  %v3464_v31 = vpop.f32.mrb[29].mxu0  ;;  %v4735_v50 = vpop.f32.mrb[30].mxu1 }
 0x215   : > { %v3606_v21 = vadd.f32 %v3605_v1, %v3575_v16  ;;  %v4973_v42 = vadd.f32 %v3464_v31, %v2211_v9  ;;  %v3537_v2 = vadd.f32 %v4970_v28, %v3536_v39  ;;  %v4927_v44 = vpop.f32.mrb[30].mxu0  ;;  %v2214_v30 = vpop.f32.mrb[31].mxu1 }
 0x216   : > { %v4974_v53 = vadd.f32 %v4927_v44, %v4735_v50  ;;  %v3467_v47 = vpop.f32.mrb[31].mxu0  ;;  %v3579_v40 = vmul.f32 %v4972_v24, %v4972_v24 }
 0x217   : > { %v3538_v54 = vadd.f32 %v4973_v42, %v3537_v2  ;;  %v3577_v57 = vmul.f32 %v4973_v42, %v4973_v42  ;;  %v3607_v4 = vadd.f32 %v3606_v21, %v3576_v55  ;;  %v4975_v29 = vadd.f32 %v3467_v47, %v2214_v30 }
 0x218   : > { %v4247_v38 = vpack.c.bf16 %v4974_v53, %v4972_v24  ;;  %v3580_v13 = vmul.f32 %v4974_v53, %v4974_v53 }
 0x219   : > { %v3608_v41 = vadd.f32 %v3607_v4, %v3577_v57  ;;  %v3539_v48 = vadd.f32 %v4975_v29, %v3538_v54  ;;  %v3578_v23 = vmul.f32 %v4975_v29, %v4975_v29  ;;  %v4242_v34 = vpack.c.bf16 %v4975_v29, %v4973_v42 }
 0x21a   : > { %4279 = vst [vmem:[%s6250_s25 + $0x78] sm:$0xff] %v4247_v38  }
 0x21b   : > { %v3540_v27 = vadd.f32 %v4972_v24, %v3539_v48  ;;  %v3609_v63 = vadd.f32 %v3608_v41, %v3578_v23  ;;  %4278 = vst [vmem:[%s6250_s25 + $0x70] sm:$0xff] %v4242_v34  }
 0x21d   : > { %v3541_v0 = vadd.f32 %v4974_v53, %v3540_v27  ;;  %v3610_v37 = vadd.f32 %v3609_v63, %v3579_v40 }
 0x21f   : > { %v3542_v12 = vrot.slane %v3541_v0, 4  ;;  %v3611_v61 = vadd.f32 %v3610_v37, %v3580_v13 }
 0x221   : > { %v3543_v19 = vadd.f32 %v3542_v12, %v3541_v0  ;;  %v3612_v49 = vrot.slane %v3611_v61, 4 }
 0x223   : > { %v3544_v6 = vrot.slane %v3543_v19, 2  ;;  %v3613_v56 = vadd.f32 %v3612_v49, %v3611_v61 }
 0x225   : > { %v3545_v59 = vadd.f32 %v3544_v6, %v3543_v19  ;;  %v3614_v11 = vrot.slane %v3613_v56, 2 }
 0x227   : > { %v3546_v32 = vrot.slane %v3545_v59, 1  ;;  %v3615_v18 = vadd.f32 %v3614_v11, %v3613_v56 }
 0x229   : > { %v3547_v33 = vadd.f32 %v3546_v32, %v3545_v59  ;;  %v3616_v25 = vrot.slane %v3615_v18, 1 }
 0x22b   : > { %3548 = vst [vmem:[%s303_s27] sm:$0x1] %v3547_v33  ;;  %v3617_v14 = vadd.f32 %v3616_v25, %v3615_v18 }
 0x22d   : > { %3618 = vst [vmem:[%s309_s7] sm:$0x1] %v3617_v14 }
 0x22e PF: > { %s17_s23 = sadd.s32 1, %s5326_s23   ;;  %s6314_s21 = smov %s5322_s22 }
 0x22f   : > { %p14_p5 = scmp.ge.s32.totalorder %s17_s23, 4   ;;  %s6315_s22 = smov %s6317_s24 }
 0x231   :  { %16 = sbr.rel (!%p14_p5) target bundleno = 2 (0x2), region = 96 }

</bundles_post_ra>
